<compile_context>
chip_gen: v7x
topology: tpu7x:2x2x1
jax: 0.10.0
libtpu: 0.0.40
codegen_flags: <defaults>
</compile_context>

<pallas_src>
import jax
import jax.numpy as jnp
from jax.experimental import pallas as pl
from jax.experimental.pallas import tpu as pltpu

block_size = 8                     # T (sequence length)
n_embd = 32                        # C
num_heads = 4                      # H
head_size = n_embd // num_heads    # hs = 8


def mha_kernel(x_ref, wqkv_ref, wp_ref, bp_ref, o_ref):
    # x_ref: (TB, T, C); wqkv_ref: (C, 3C) = [scaled-Q | K | V], head-major inside
    # each C-wide block; wp_ref: (C, C) = W_proj^T; bp_ref: (1, C); o_ref: (TB,T,C).
    TB, T, C = x_ref.shape
    H, hs = num_heads, head_size
    M = TB * T

    x2 = x_ref[...].reshape(M, C)                                    # (M, C)

    # Fused Q/K/V projection for every head in one MXU push: (M, C) @ (C, 3C).
    qkv = jnp.dot(x2, wqkv_ref[...], preferred_element_type=jnp.float32)  # (M, 3C)

    # Additive causal-mask bias, computed once and reused by every head.
    row = jax.lax.broadcasted_iota(jnp.int32, (T, T), 0)
    col = jax.lax.broadcasted_iota(jnp.int32, (T, T), 1)
    mask_bias = jnp.where(row >= col, jnp.float32(0.0),
                          jnp.float32(-1e30))[None]                  # (1, T, T)

    wp_t = wp_ref[...]                                               # (C, C)
    bias = bp_ref[...]                                               # (1, C)
    acc = jnp.zeros((M, C), jnp.float32)

    for h in range(H):                     # H = 4, static, fully unrolled
        q = qkv[:, h * hs:(h + 1) * hs].reshape(TB, T, hs)           # scale folded in
        k = qkv[:, C + h * hs:C + (h + 1) * hs].reshape(TB, T, hs)
        v = qkv[:, 2 * C + h * hs:2 * C + (h + 1) * hs].reshape(TB, T, hs)

        # Scores: contract last dims directly (no explicit k transpose); batched
        # over the TB batch elements in this block.
        s = jnp.einsum('bqd,bkd->bqk', q, k,
                       preferred_element_type=jnp.float32)           # (TB, T, T)
        s = s + mask_bias

        # Numerically stable softmax; divide via EUP approximate reciprocal.
        s = s - jnp.max(s, axis=-1, keepdims=True)
        p = jnp.exp(s)
        p = p * pl.reciprocal(jnp.sum(p, axis=-1, keepdims=True), approx=True)

        o_h = jnp.einsum('bqk,bkd->bqd', p, v,
                         preferred_element_type=jnp.float32)         # (TB, T, hs)

        # Accumulate straight into the output projection (no concat / relayout).
        acc = acc + jnp.dot(o_h.reshape(M, hs), wp_t[h * hs:(h + 1) * hs, :],
                            preferred_element_type=jnp.float32)      # (M, C)

    out = acc + bias                                                 # (M, C)
    o_ref[...] = out.reshape(TB, T, C).astype(o_ref.dtype)


def multi_head_attention(x, wq, wk, wv, wp, bp):
    """x: (B, T, C); wq/wk/wv: (H, C, hs); wp: (C, C) torch-style (out,in); bp: (C,)."""
    B, T, C = x.shape
    H, hs = num_heads, head_size
    scale = jnp.float32(hs) ** -0.5

    # Pack per-head Q/K/V weights into one (C, 3C) matrix; fold the constant
    # 1/sqrt(hs) attention scale into the Q block.
    wq_all = jnp.transpose(wq, (1, 0, 2)).reshape(C, H * hs) * scale
    wk_all = jnp.transpose(wk, (1, 0, 2)).reshape(C, H * hs)
    wv_all = jnp.transpose(wv, (1, 0, 2)).reshape(C, H * hs)
    wqkv = jnp.concatenate([wq_all, wk_all, wv_all], axis=1)         # (C, 3C)

    wp_t = wp.T                                                      # (C, C)
    bp2 = bp.reshape(1, C)

    # Batch-tile: TB batch elements per grid step (target TB*T = 128 rows), and
    # keep >=2 parallel grid steps so both v7x TensorCores get work.
    tb = max(1, min(B, 128 // T))
    while B % tb:
        tb -= 1

    grid_spec = pl.GridSpec(
        grid=(B // tb,),
        in_specs=[
            pl.BlockSpec((tb, T, C), lambda b: (b, 0, 0)),
            pl.BlockSpec((C, 3 * C), lambda b: (0, 0)),
            pl.BlockSpec((C, C), lambda b: (0, 0)),
            pl.BlockSpec((1, C), lambda b: (0, 0)),
        ],
        out_specs=pl.BlockSpec((tb, T, C), lambda b: (b, 0, 0)),
    )
    return pl.pallas_call(
        mha_kernel,
        out_shape=jax.ShapeDtypeStruct((B, T, C), x.dtype),
        grid_spec=grid_spec,
        compiler_params=pltpu.CompilerParams(
            dimension_semantics=("parallel",)),
    )(x, wqkv, wp_t, bp2)


def reference(x, wq, wk, wv, wp, bp):
    """Pure-JAX reference mirroring the PyTorch module."""
    T = x.shape[1]
    scale = head_size ** -0.5
    tril = jnp.tril(jnp.ones((T, T), dtype=bool))
    outs = []
    for h in range(num_heads):
        q = x @ wq[h]
        k = x @ wk[h]
        v = x @ wv[h]
        wei = (q @ jnp.swapaxes(k, -2, -1)) * scale
        wei = jnp.where(tril, wei, -jnp.inf)
        wei = jax.nn.softmax(wei, axis=-1)
        outs.append(wei @ v)
    cat = jnp.concatenate(outs, axis=-1)
    return cat @ wp.T + bp


if __name__ == "__main__":
    key = jax.random.PRNGKey(0)
    kx, kq, kk, kv, kp, kb = jax.random.split(key, 6)

    # 32 batch elements -> 2 parallel grid steps, each a 128-row block.
    B, T, C = 32, block_size, n_embd
    x = jax.random.normal(kx, (B, T, C), dtype=jnp.float32)

    # Deterministic synthetic parameters (PyTorch-Linear-like scale 1/sqrt(in)).
    s_in = 1.0 / (n_embd ** 0.5)
    wq = jax.random.uniform(kq, (num_heads, C, head_size), jnp.float32, -s_in, s_in)
    wk = jax.random.uniform(kk, (num_heads, C, head_size), jnp.float32, -s_in, s_in)
    wv = jax.random.uniform(kv, (num_heads, C, head_size), jnp.float32, -s_in, s_in)
    wp = jax.random.uniform(kp, (C, C), jnp.float32, -s_in, s_in)    # torch (out, in)
    bp = jax.random.uniform(kb, (C,), jnp.float32, -s_in, s_in)

    out = jax.block_until_ready(multi_head_attention(x, wq, wk, wv, wp, bp))
    ref = reference(x, wq, wk, wv, wp, bp)

    assert out.shape == (B, T, C)
    # Slightly looser tolerance than pure-f32: the softmax uses the EUP
    # approximate reciprocal.
    assert jnp.allclose(out, ref, atol=5e-3, rtol=5e-3), "mismatch vs reference"

    print("KERNEL_OK")
</pallas_src>

<mosaic_0001>
module attributes {stable_mosaic.version = 11 : i64} {
  func.func @mha_kernel(%arg0: i32, %arg1: memref<16x8x32xf32, #tpu.memory_space<vmem>>, %arg2: memref<32x96xf32, #tpu.memory_space<vmem>>, %arg3: memref<32x32xf32, #tpu.memory_space<vmem>>, %arg4: memref<1x32xf32, #tpu.memory_space<vmem>>, %arg5: memref<16x8x32xf32, #tpu.memory_space<vmem>>) attributes {dimension_semantics = [#tpu.dimension_semantics<parallel>], iteration_bounds = array<i64: 2>, scalar_prefetch = 0 : i64, scratch_operands = 0 : i64, tpu.core_type = #tpu.core_type<tc>, window_params = [{transform_indices = @transform_0, window_bounds = array<i64: 16, 8, 32>}, {pipeline_mode = #tpu.pipeline_mode<synchronous>, transform_indices = @transform_1, window_bounds = array<i64: 32, 96>}, {pipeline_mode = #tpu.pipeline_mode<synchronous>, transform_indices = @transform_2, window_bounds = array<i64: 32, 32>}, {pipeline_mode = #tpu.pipeline_mode<synchronous>, transform_indices = @transform_3, window_bounds = array<i64: 1, 32>}, {transform_indices = @transform_4, window_bounds = array<i64: 16, 8, 32>}]} {
    %c0 = arith.constant 0 : index
    %c0_0 = arith.constant 0 : index
    %c0_1 = arith.constant 0 : index
    %0 = vector.load %arg1[%c0, %c0_0, %c0_1] : memref<16x8x32xf32, #tpu.memory_space<vmem>>, vector<16x8x32xf32>
    %1 = vector.shape_cast %0 : vector<16x8x32xf32> to vector<128x32xf32>
    %c0_2 = arith.constant 0 : index
    %c0_3 = arith.constant 0 : index
    %2 = vector.load %arg2[%c0_2, %c0_3] : memref<32x96xf32, #tpu.memory_space<vmem>>, vector<32x96xf32>
    %cst = arith.constant dense<0.000000e+00> : vector<128x96xf32>
    %3 = tpu.matmul %1, %2, %cst {dimension_numbers = #tpu.dot_dimension_numbers<[1], [0], [0], [1], [0, 0, 1, 1], [], []>} : vector<128x32xf32>, vector<32x96xf32>, vector<128x96xf32> -> vector<128x96xf32>
    %4 = tpu.iota {dimensions = array<i32: 0>} : vector<8x8xi32>
    %5 = tpu.iota {dimensions = array<i32: 1>} : vector<8x8xi32>
    %6 = arith.cmpi sge, %4, %5 : vector<8x8xi32>
    %cst_4 = arith.constant 0.000000e+00 : f32
    %cst_5 = arith.constant -1.000000e+30 : f32
    %7 = vector.broadcast %cst_4 : f32 to vector<8x8xf32>
    %8 = vector.broadcast %cst_5 : f32 to vector<8x8xf32>
    %9 = arith.select %6, %7, %8 : vector<8x8xi1>, vector<8x8xf32>
    %10 = vector.shape_cast %9 : vector<8x8xf32> to vector<1x8x8xf32>
    %c0_6 = arith.constant 0 : index
    %c0_7 = arith.constant 0 : index
    %11 = vector.load %arg3[%c0_6, %c0_7] : memref<32x32xf32, #tpu.memory_space<vmem>>, vector<32x32xf32>
    %c0_8 = arith.constant 0 : index
    %c0_9 = arith.constant 0 : index
    %12 = vector.load %arg4[%c0_8, %c0_9] : memref<1x32xf32, #tpu.memory_space<vmem>>, vector<1x32xf32>
    %cst_10 = arith.constant 0.000000e+00 : f32
    %13 = vector.broadcast %cst_10 : f32 to vector<128x32xf32>
    %14 = vector.extract_strided_slice %3 {offsets = [0, 0], sizes = [128, 8], strides = [1, 1]} : vector<128x96xf32> to vector<128x8xf32>
    %15 = vector.shape_cast %14 : vector<128x8xf32> to vector<16x8x8xf32>
    %16 = vector.extract_strided_slice %3 {offsets = [0, 32], sizes = [128, 8], strides = [1, 1]} : vector<128x96xf32> to vector<128x8xf32>
    %17 = vector.shape_cast %16 : vector<128x8xf32> to vector<16x8x8xf32>
    %18 = vector.extract_strided_slice %3 {offsets = [0, 64], sizes = [128, 8], strides = [1, 1]} : vector<128x96xf32> to vector<128x8xf32>
    %19 = vector.shape_cast %18 : vector<128x8xf32> to vector<16x8x8xf32>
    "tpu.trace_start"() <{level = 10 : i32, message = "bqd,bkd->bqk"}> : () -> ()
    %cst_11 = arith.constant dense<0.000000e+00> : vector<16x8x8xf32>
    %20 = tpu.matmul %15, %17, %cst_11 {dimension_numbers = #tpu.dot_dimension_numbers<[2], [2], [1], [1], [0, 0, 0, 1, 1, 1], [0], [0]>} : vector<16x8x8xf32>, vector<16x8x8xf32>, vector<16x8x8xf32> -> vector<16x8x8xf32>
    "tpu.trace_stop"() : () -> ()
    %21 = vector.broadcast %10 : vector<1x8x8xf32> to vector<16x8x8xf32>
    %22 = arith.addf %20, %21 : vector<16x8x8xf32>
    %cst_12 = arith.constant dense<0xFF800000> : vector<16x8xf32>
    %23 = vector.multi_reduction <maximumf>, %22, %cst_12 [2] : vector<16x8x8xf32> to vector<16x8xf32>
    %24 = vector.shape_cast %23 : vector<16x8xf32> to vector<16x8x1xf32>
    %25 = vector.broadcast %24 : vector<16x8x1xf32> to vector<16x8x8xf32>
    %26 = arith.subf %22, %25 : vector<16x8x8xf32>
    %27 = math.exp %26 : vector<16x8x8xf32>
    %cst_13 = arith.constant dense<0.000000e+00> : vector<16x8xf32>
    %28 = vector.multi_reduction <add>, %27, %cst_13 [2] : vector<16x8x8xf32> to vector<16x8xf32>
    %29 = vector.shape_cast %28 : vector<16x8xf32> to vector<16x8x1xf32>
    %30 = tpu.reciprocal %29 {approx = true} : vector<16x8x1xf32> -> vector<16x8x1xf32>
    %31 = vector.broadcast %30 : vector<16x8x1xf32> to vector<16x8x8xf32>
    %32 = arith.mulf %27, %31 : vector<16x8x8xf32>
    "tpu.trace_start"() <{level = 10 : i32, message = "bqk,bkd->bqd"}> : () -> ()
    %cst_14 = arith.constant dense<0.000000e+00> : vector<16x8x8xf32>
    %33 = tpu.matmul %32, %19, %cst_14 {dimension_numbers = #tpu.dot_dimension_numbers<[2], [1], [1], [2], [0, 0, 0, 1, 1, 2], [0], [0]>} : vector<16x8x8xf32>, vector<16x8x8xf32>, vector<16x8x8xf32> -> vector<16x8x8xf32>
    "tpu.trace_stop"() : () -> ()
    %34 = vector.shape_cast %33 : vector<16x8x8xf32> to vector<128x8xf32>
    %35 = vector.extract_strided_slice %11 {offsets = [0, 0], sizes = [8, 32], strides = [1, 1]} : vector<32x32xf32> to vector<8x32xf32>
    %cst_15 = arith.constant dense<0.000000e+00> : vector<128x32xf32>
    %36 = tpu.matmul %34, %35, %cst_15 {dimension_numbers = #tpu.dot_dimension_numbers<[1], [0], [0], [1], [0, 0, 1, 1], [], []>} : vector<128x8xf32>, vector<8x32xf32>, vector<128x32xf32> -> vector<128x32xf32>
    %37 = arith.addf %13, %36 : vector<128x32xf32>
    %38 = vector.extract_strided_slice %3 {offsets = [0, 8], sizes = [128, 8], strides = [1, 1]} : vector<128x96xf32> to vector<128x8xf32>
    %39 = vector.shape_cast %38 : vector<128x8xf32> to vector<16x8x8xf32>
    %40 = vector.extract_strided_slice %3 {offsets = [0, 40], sizes = [128, 8], strides = [1, 1]} : vector<128x96xf32> to vector<128x8xf32>
    %41 = vector.shape_cast %40 : vector<128x8xf32> to vector<16x8x8xf32>
    %42 = vector.extract_strided_slice %3 {offsets = [0, 72], sizes = [128, 8], strides = [1, 1]} : vector<128x96xf32> to vector<128x8xf32>
    %43 = vector.shape_cast %42 : vector<128x8xf32> to vector<16x8x8xf32>
    "tpu.trace_start"() <{level = 10 : i32, message = "bqd,bkd->bqk"}> : () -> ()
    %cst_16 = arith.constant dense<0.000000e+00> : vector<16x8x8xf32>
    %44 = tpu.matmul %39, %41, %cst_16 {dimension_numbers = #tpu.dot_dimension_numbers<[2], [2], [1], [1], [0, 0, 0, 1, 1, 1], [0], [0]>} : vector<16x8x8xf32>, vector<16x8x8xf32>, vector<16x8x8xf32> -> vector<16x8x8xf32>
    "tpu.trace_stop"() : () -> ()
    %45 = vector.broadcast %10 : vector<1x8x8xf32> to vector<16x8x8xf32>
    %46 = arith.addf %44, %45 : vector<16x8x8xf32>
    %cst_17 = arith.constant dense<0xFF800000> : vector<16x8xf32>
    %47 = vector.multi_reduction <maximumf>, %46, %cst_17 [2] : vector<16x8x8xf32> to vector<16x8xf32>
    %48 = vector.shape_cast %47 : vector<16x8xf32> to vector<16x8x1xf32>
    %49 = vector.broadcast %48 : vector<16x8x1xf32> to vector<16x8x8xf32>
    %50 = arith.subf %46, %49 : vector<16x8x8xf32>
    %51 = math.exp %50 : vector<16x8x8xf32>
    %cst_18 = arith.constant dense<0.000000e+00> : vector<16x8xf32>
    %52 = vector.multi_reduction <add>, %51, %cst_18 [2] : vector<16x8x8xf32> to vector<16x8xf32>
    %53 = vector.shape_cast %52 : vector<16x8xf32> to vector<16x8x1xf32>
    %54 = tpu.reciprocal %53 {approx = true} : vector<16x8x1xf32> -> vector<16x8x1xf32>
    %55 = vector.broadcast %54 : vector<16x8x1xf32> to vector<16x8x8xf32>
    %56 = arith.mulf %51, %55 : vector<16x8x8xf32>
    "tpu.trace_start"() <{level = 10 : i32, message = "bqk,bkd->bqd"}> : () -> ()
    %cst_19 = arith.constant dense<0.000000e+00> : vector<16x8x8xf32>
    %57 = tpu.matmul %56, %43, %cst_19 {dimension_numbers = #tpu.dot_dimension_numbers<[2], [1], [1], [2], [0, 0, 0, 1, 1, 2], [0], [0]>} : vector<16x8x8xf32>, vector<16x8x8xf32>, vector<16x8x8xf32> -> vector<16x8x8xf32>
    "tpu.trace_stop"() : () -> ()
    %58 = vector.shape_cast %57 : vector<16x8x8xf32> to vector<128x8xf32>
    %59 = vector.extract_strided_slice %11 {offsets = [8, 0], sizes = [8, 32], strides = [1, 1]} : vector<32x32xf32> to vector<8x32xf32>
    %cst_20 = arith.constant dense<0.000000e+00> : vector<128x32xf32>
    %60 = tpu.matmul %58, %59, %cst_20 {dimension_numbers = #tpu.dot_dimension_numbers<[1], [0], [0], [1], [0, 0, 1, 1], [], []>} : vector<128x8xf32>, vector<8x32xf32>, vector<128x32xf32> -> vector<128x32xf32>
    %61 = arith.addf %37, %60 : vector<128x32xf32>
    %62 = vector.extract_strided_slice %3 {offsets = [0, 16], sizes = [128, 8], strides = [1, 1]} : vector<128x96xf32> to vector<128x8xf32>
    %63 = vector.shape_cast %62 : vector<128x8xf32> to vector<16x8x8xf32>
    %64 = vector.extract_strided_slice %3 {offsets = [0, 48], sizes = [128, 8], strides = [1, 1]} : vector<128x96xf32> to vector<128x8xf32>
    %65 = vector.shape_cast %64 : vector<128x8xf32> to vector<16x8x8xf32>
    %66 = vector.extract_strided_slice %3 {offsets = [0, 80], sizes = [128, 8], strides = [1, 1]} : vector<128x96xf32> to vector<128x8xf32>
    %67 = vector.shape_cast %66 : vector<128x8xf32> to vector<16x8x8xf32>
    "tpu.trace_start"() <{level = 10 : i32, message = "bqd,bkd->bqk"}> : () -> ()
    %cst_21 = arith.constant dense<0.000000e+00> : vector<16x8x8xf32>
    %68 = tpu.matmul %63, %65, %cst_21 {dimension_numbers = #tpu.dot_dimension_numbers<[2], [2], [1], [1], [0, 0, 0, 1, 1, 1], [0], [0]>} : vector<16x8x8xf32>, vector<16x8x8xf32>, vector<16x8x8xf32> -> vector<16x8x8xf32>
    "tpu.trace_stop"() : () -> ()
    %69 = vector.broadcast %10 : vector<1x8x8xf32> to vector<16x8x8xf32>
    %70 = arith.addf %68, %69 : vector<16x8x8xf32>
    %cst_22 = arith.constant dense<0xFF800000> : vector<16x8xf32>
    %71 = vector.multi_reduction <maximumf>, %70, %cst_22 [2] : vector<16x8x8xf32> to vector<16x8xf32>
    %72 = vector.shape_cast %71 : vector<16x8xf32> to vector<16x8x1xf32>
    %73 = vector.broadcast %72 : vector<16x8x1xf32> to vector<16x8x8xf32>
    %74 = arith.subf %70, %73 : vector<16x8x8xf32>
    %75 = math.exp %74 : vector<16x8x8xf32>
    %cst_23 = arith.constant dense<0.000000e+00> : vector<16x8xf32>
    %76 = vector.multi_reduction <add>, %75, %cst_23 [2] : vector<16x8x8xf32> to vector<16x8xf32>
    %77 = vector.shape_cast %76 : vector<16x8xf32> to vector<16x8x1xf32>
    %78 = tpu.reciprocal %77 {approx = true} : vector<16x8x1xf32> -> vector<16x8x1xf32>
    %79 = vector.broadcast %78 : vector<16x8x1xf32> to vector<16x8x8xf32>
    %80 = arith.mulf %75, %79 : vector<16x8x8xf32>
    "tpu.trace_start"() <{level = 10 : i32, message = "bqk,bkd->bqd"}> : () -> ()
    %cst_24 = arith.constant dense<0.000000e+00> : vector<16x8x8xf32>
    %81 = tpu.matmul %80, %67, %cst_24 {dimension_numbers = #tpu.dot_dimension_numbers<[2], [1], [1], [2], [0, 0, 0, 1, 1, 2], [0], [0]>} : vector<16x8x8xf32>, vector<16x8x8xf32>, vector<16x8x8xf32> -> vector<16x8x8xf32>
    "tpu.trace_stop"() : () -> ()
    %82 = vector.shape_cast %81 : vector<16x8x8xf32> to vector<128x8xf32>
    %83 = vector.extract_strided_slice %11 {offsets = [16, 0], sizes = [8, 32], strides = [1, 1]} : vector<32x32xf32> to vector<8x32xf32>
    %cst_25 = arith.constant dense<0.000000e+00> : vector<128x32xf32>
    %84 = tpu.matmul %82, %83, %cst_25 {dimension_numbers = #tpu.dot_dimension_numbers<[1], [0], [0], [1], [0, 0, 1, 1], [], []>} : vector<128x8xf32>, vector<8x32xf32>, vector<128x32xf32> -> vector<128x32xf32>
    %85 = arith.addf %61, %84 : vector<128x32xf32>
    %86 = vector.extract_strided_slice %3 {offsets = [0, 24], sizes = [128, 8], strides = [1, 1]} : vector<128x96xf32> to vector<128x8xf32>
    %87 = vector.shape_cast %86 : vector<128x8xf32> to vector<16x8x8xf32>
    %88 = vector.extract_strided_slice %3 {offsets = [0, 56], sizes = [128, 8], strides = [1, 1]} : vector<128x96xf32> to vector<128x8xf32>
    %89 = vector.shape_cast %88 : vector<128x8xf32> to vector<16x8x8xf32>
    %90 = vector.extract_strided_slice %3 {offsets = [0, 88], sizes = [128, 8], strides = [1, 1]} : vector<128x96xf32> to vector<128x8xf32>
    %91 = vector.shape_cast %90 : vector<128x8xf32> to vector<16x8x8xf32>
    "tpu.trace_start"() <{level = 10 : i32, message = "bqd,bkd->bqk"}> : () -> ()
    %cst_26 = arith.constant dense<0.000000e+00> : vector<16x8x8xf32>
    %92 = tpu.matmul %87, %89, %cst_26 {dimension_numbers = #tpu.dot_dimension_numbers<[2], [2], [1], [1], [0, 0, 0, 1, 1, 1], [0], [0]>} : vector<16x8x8xf32>, vector<16x8x8xf32>, vector<16x8x8xf32> -> vector<16x8x8xf32>
    "tpu.trace_stop"() : () -> ()
    %93 = vector.broadcast %10 : vector<1x8x8xf32> to vector<16x8x8xf32>
    %94 = arith.addf %92, %93 : vector<16x8x8xf32>
    %cst_27 = arith.constant dense<0xFF800000> : vector<16x8xf32>
    %95 = vector.multi_reduction <maximumf>, %94, %cst_27 [2] : vector<16x8x8xf32> to vector<16x8xf32>
    %96 = vector.shape_cast %95 : vector<16x8xf32> to vector<16x8x1xf32>
    %97 = vector.broadcast %96 : vector<16x8x1xf32> to vector<16x8x8xf32>
    %98 = arith.subf %94, %97 : vector<16x8x8xf32>
    %99 = math.exp %98 : vector<16x8x8xf32>
    %cst_28 = arith.constant dense<0.000000e+00> : vector<16x8xf32>
    %100 = vector.multi_reduction <add>, %99, %cst_28 [2] : vector<16x8x8xf32> to vector<16x8xf32>
    %101 = vector.shape_cast %100 : vector<16x8xf32> to vector<16x8x1xf32>
    %102 = tpu.reciprocal %101 {approx = true} : vector<16x8x1xf32> -> vector<16x8x1xf32>
    %103 = vector.broadcast %102 : vector<16x8x1xf32> to vector<16x8x8xf32>
    %104 = arith.mulf %99, %103 : vector<16x8x8xf32>
    "tpu.trace_start"() <{level = 10 : i32, message = "bqk,bkd->bqd"}> : () -> ()
    %cst_29 = arith.constant dense<0.000000e+00> : vector<16x8x8xf32>
    %105 = tpu.matmul %104, %91, %cst_29 {dimension_numbers = #tpu.dot_dimension_numbers<[2], [1], [1], [2], [0, 0, 0, 1, 1, 2], [0], [0]>} : vector<16x8x8xf32>, vector<16x8x8xf32>, vector<16x8x8xf32> -> vector<16x8x8xf32>
    "tpu.trace_stop"() : () -> ()
    %106 = vector.shape_cast %105 : vector<16x8x8xf32> to vector<128x8xf32>
    %107 = vector.extract_strided_slice %11 {offsets = [24, 0], sizes = [8, 32], strides = [1, 1]} : vector<32x32xf32> to vector<8x32xf32>
    %cst_30 = arith.constant dense<0.000000e+00> : vector<128x32xf32>
    %108 = tpu.matmul %106, %107, %cst_30 {dimension_numbers = #tpu.dot_dimension_numbers<[1], [0], [0], [1], [0, 0, 1, 1], [], []>} : vector<128x8xf32>, vector<8x32xf32>, vector<128x32xf32> -> vector<128x32xf32>
    %109 = arith.addf %85, %108 : vector<128x32xf32>
    %110 = vector.broadcast %12 : vector<1x32xf32> to vector<128x32xf32>
    %111 = arith.addf %109, %110 : vector<128x32xf32>
    %112 = vector.shape_cast %111 : vector<128x32xf32> to vector<16x8x32xf32>
    %c0_31 = arith.constant 0 : index
    %c0_32 = arith.constant 0 : index
    %c0_33 = arith.constant 0 : index
    %113 = vector.load %arg5[%c0_31, %c0_32, %c0_33] : memref<16x8x32xf32, #tpu.memory_space<vmem>>, vector<16x8x32xf32>
    tpu.vector_store %arg5[%c0_31, %c0_32, %c0_33], %112 {strides = array<i32>} : memref<16x8x32xf32, #tpu.memory_space<vmem>>, vector<16x8x32xf32>,
    return
  }
  func.func @transform_0(%arg0: i32) -> (i32, i32, i32) {
    %c0_i32 = arith.constant 0 : i32
    %c0_i32_0 = arith.constant 0 : i32
    %c0_i32_1 = arith.constant 0 : i32
    return %arg0, %c0_i32, %c0_i32_0 : i32, i32, i32
  }
  func.func @transform_1(%arg0: i32) -> (i32, i32) {
    %c0_i32 = arith.constant 0 : i32
    %c0_i32_0 = arith.constant 0 : i32
    %c0_i32_1 = arith.constant 0 : i32
    return %c0_i32, %c0_i32_0 : i32, i32
  }
  func.func @transform_2(%arg0: i32) -> (i32, i32) {
    %c0_i32 = arith.constant 0 : i32
    %c0_i32_0 = arith.constant 0 : i32
    %c0_i32_1 = arith.constant 0 : i32
    return %c0_i32, %c0_i32_0 : i32, i32
  }
  func.func @transform_3(%arg0: i32) -> (i32, i32) {
    %c0_i32 = arith.constant 0 : i32
    %c0_i32_0 = arith.constant 0 : i32
    %c0_i32_1 = arith.constant 0 : i32
    return %c0_i32, %c0_i32_0 : i32, i32
  }
  func.func @transform_4(%arg0: i32) -> (i32, i32, i32) {
    %c0_i32 = arith.constant 0 : i32
    %c0_i32_0 = arith.constant 0 : i32
    %c0_i32_1 = arith.constant 0 : i32
    return %arg0, %c0_i32, %c0_i32_0 : i32, i32, i32
  }
}

</mosaic_0001>

<bundles_post_ra>
// kernel: tpu_custom_call.1
= control target key start
LH: loop header
LB: loop body
LE: loop exit
PB: predicated region body
PF: predicated region fallthrough
CT: control target
= control target key end

     0   :  { %9 = vsyncpa [#allocation3], 0  ;;  %s16281_s0 = inlined_call_operand.hbm [shape: f32[32,8,32], index: 0, kind: input, shape index: {}]   ;;  %s16282_s1 = inlined_call_operand.hbm [shape: f32[32,96], index: 1, kind: input, shape index: {}]   ;;  %s16283_s2 = inlined_call_operand.hbm [shape: f32[32,32], index: 2, kind: input, shape index: {}]   ;;  %s16284_s3 = inlined_call_operand.vmem [shape: f32[1,32], index: 3, kind: input, shape index: {}]   ;;  %s16285_s4 = inlined_call_operand.hbm [shape: f32[32,8,32], index: 4, kind: output, shape index: {}]  }
   0x1   :  { %11 = vsyncpa [#allocation3 + $0x1], 0 }
   0x2   :  { %12 = vsyncpa [#allocation6], 0 }
   0x3   :  { %13 = vsyncpa [#allocation4], 0 }
   0x4   :  { %15 = vsyncpa [#allocation4 + $0x1], 0  ;;  %s13982_s15 = smov 0   ;;  %s13984_s16 = smov 0  }
   0x5   :  { %s13986_s17 = smov 0   ;;  %s13988_s18 = smov 0  }
   0x6 LB: > { %s14003_s19 = sadd.s32 4294967295, %s13933_s18   ;;  %s11965_s20 = sadd.s32 4294967294, %s13933_s18   ;;  %s13933_s18 = sphi %s13988_s18, %s16372_s18   ;;  %s13929_s17 = sphi %s13986_s17, %s16371_s17   ;;  %s13925_s16 = sphi %s13984_s16, %s16370_s16   ;;  %s13921_s15 = sphi %s13982_s15, %s16369_s15  }
   0x7   : > { %p41_p0 = scmp.ne.s32.totalorder %s13925_s16, %s13921_s15  ;;  %p16286_p1 = scmp.eq.s32.totalorder %s14003_s19, 0 }
   0x8   : > { %p134_p3 = scmp.eq.s32.totalorder %s11965_s20, 1  ;;  %p11966_p5 = scmp.ge.s32.totalorder %s13933_s18, 1 }
   0x9   : > { %p14012_p4 = por %p16286_p1, %p41_p0  ;;  %p141_p7 = scmp.lt.s32.totalorder %s13933_s18, 3 }
   0xa   : > { %p14017_p6 = por %p134_p3, %p41_p0  ;;  %s13935_s24 = smov [#allocation5]  }
   0xb   : > { %s16303_s21 = scalar_select %p14012_p4, 1, 0 }
   0xc   : > { %s16304_s22 = scalar_select %p14017_p6, 1, 0 }
   0xd   : > { %p14022_p8 = pnand %p11966_p5, %p141_p7  ;;  %s153_s25 = sshll.u32 %s13935_s24, 4  ;;  %s14026_s25 = int_to_ptr.vmem [resolvable:$true] %s153_s25 }
   0xe   : > { %s13936_s27 = smov [#allocation7]   ;;  %s13777_s5 = scalar_lea.hbm %s16282_s1, 512 }
   0xf   : > { %p13448_p9 = pneg %p14022_p8  ;;  %s166_s28 = sshll.u32 %s13936_s27, 4  ;;  %s14037_s28 = int_to_ptr.vmem [resolvable:$true] %s166_s28 }
  0x10   : > { %p13778_p12 = scmp.ne.s32.totalorder %s16282_s1, %s13777_s5  ;;  %p13784_p5 = scmp.lt.u32.totalorder %s13777_s5, %s16282_s1 }
  0x11   : > { %p14033_p11 = pnand %p13448_p9, %p16286_p1 }
  0x13   : > { %p13779_p13 = pneg %p14033_p11 }
  0x15   : > { %p13780_p0 = pnand %p13779_p13, %p13778_p12 }
  0x17   : > { %p13781_p3 = pneg %p13780_p0 }
  0x19   : > { %p13786_p7 = pnand %p13784_p5, %p13781_p3 }
  0x1b   : > { %13789 = shalt.err (!%p13786_p7)
}
  0x1c   : > { %s13790_s10 = scalar_lea.vmem %s14026_s25, 512  ;;  %p13798_p2 = scmp.lt.s32.totalorder %s14026_s25, %s14026_s25 }
  0x1d   : > { %p13791_p9 = scmp.ne.s32.totalorder %s14026_s25, %s13790_s10  ;;  %p13799_p12 = scmp.lt.s32.totalorder %s13790_s10, %s13790_s10 }
  0x1f   : > { %p13793_p10 = pnand %p13791_p9, %p13779_p13  ;;  %p13800_p0 = por %p13799_p12, %p13798_p2 }
  0x21   : > { %p13794_p1 = pneg %p13793_p10 }
  0x23   : > { %p13801_p6 = pnand %p13800_p0, %p13794_p1 }
  0x25   : > { %13804 = shalt.err (!%p13801_p6)
}
  0x26   : > { %s13937_s11 = smov 128   ;;  %s13938_s12 = smov 8  }
  0x27   : > { %13451 = dma.hbm_to_vmem [thread:$0]  (!%p14033_p11), %s16282_s1, 512, %s14026_s25, [#allocation6], %s13937_s11, %s13937_s11, %s13938_s12  }
  0x28   : > { %s13805_s27 = scalar_lea.hbm %s16283_s2, 512 }
  0x29   : > { %p13806_p1 = scmp.ne.s32.totalorder %s16283_s2, %s13805_s27  ;;  %p13812_p10 = scmp.lt.u32.totalorder %s13805_s27, %s16283_s2 }
  0x2b   : > { %p13808_p2 = pnand %p13806_p1, %p13779_p13 }
  0x2d   : > { %p13809_p6 = pneg %p13808_p2 }
  0x2f   : > { %p13814_p3 = pnand %p13812_p10, %p13809_p6 }
  0x31   : > { %13817 = shalt.err (!%p13814_p3)
}
  0x32   : > { %s13818_s25 = scalar_lea.vmem %s14037_s28, 512  ;;  %p13826_p12 = scmp.lt.s32.totalorder %s14037_s28, %s14037_s28 }
  0x33   : > { %p13819_p5 = scmp.ne.s32.totalorder %s14037_s28, %s13818_s25  ;;  %p13827_p0 = scmp.lt.s32.totalorder %s13818_s25, %s13818_s25 }
  0x35   : > { %p13821_p7 = pnand %p13819_p5, %p13779_p13  ;;  %p13828_p1 = por %p13827_p0, %p13826_p12 }
  0x37   : > { %p13822_p9 = pneg %p13821_p7 }
  0x39   : > { %p13829_p2 = pnand %p13828_p1, %p13822_p9 }
  0x3b   : > { %13832 = shalt.err (!%p13829_p2)
}
  0x3c   : > { %13454 = dma.hbm_to_vmem [thread:$0]  (!%p14033_p11), %s16283_s2, 512, %s14037_s28, [#allocation6], %s13937_s11, %s13937_s11, %s13938_s12  }
  0x3d   : > { %s14098_s26 = sadd.s32 1, %s13933_s18   ;;  %s28_s9 = sadd.s32 1, %s13929_s17 }
  0x3e   : > { %s25_s10 = ssub.s32 %s13933_s18, %s14098_s26  ;;  %p35_p13 = scmp.ne.s32.totalorder %s13929_s17, %s13925_s16 }
  0x3f   : > { %p26_p6 = scmp.eq.s32.totalorder %s25_s10, 0  ;;  %p36_p10 = scmp.eq.s32.totalorder %s13933_s18, 0 }
  0x40   : > { %p16307_p3 = scmp.eq.s32.totalorder %s14003_s19, 1  ;;  %p13465_p7 = scmp.lt.s32.totalorder %s13933_s18, 2 }
  0x41   : > { %s14114_s14 = scalar_select %p26_p6, %s13929_s17, %s28_s9  }
  0x42   : > { %p14108_p5 = por %p16307_p3, %p35_p13  ;;  %p37_p9 = por %p36_p10, %p35_p13 }
  0x43   : > { %s183_s20 = sand.u32 1, %s13929_s17   ;;  %s12256_s28 = sshll.u32 %s13933_s18, 11 }
  0x44   : > { %s16308_s13 = scalar_select %p14108_p5, 1, 0 }
  0x45   : > { %s11970_s24 = sshll.u32 %s183_s20, 7  ;;  %s14121_s30 = scalar_lea.hbm %s16281_s0, %s12256_s28 }
  0x46   : > { %s187_s5 = scalar_lea.vmem [#allocation2], %s11970_s24  ;;  %p14125_p11 = pnand %p13465_p7, %p37_p9 }
  0x47   : > { %s194_s6 = sshll.u32 %s187_s5, 4  ;;  %s14129_s7 = scalar_lea.sflag [#allocation3], %s183_s20  ;;  %s14123_s6 = int_to_ptr.vmem [resolvable:$true] %s194_s6 }
  0x48   : > { %s13833_s8 = scalar_lea.hbm %s14121_s30, 2048  ;;  %p13835_p0 = pneg %p14125_p11 }
  0x49   : > { %p13834_p12 = scmp.ne.s32.totalorder %s14121_s30, %s13833_s8  ;;  %s13838_s24 = scalar_lea.hbm %s16281_s0, 4096 }
  0x4a   : > { %p13839_p13 = scmp.lt.u32.totalorder %s14121_s30, %s16281_s0  ;;  %p13840_p6 = scmp.lt.u32.totalorder %s13838_s24, %s13833_s8 }
  0x4b   : > { %p13836_p1 = pnand %p13835_p0, %p13834_p12  ;;  %p13842_p3 = scmp.lt.u32.totalorder %s13833_s8, %s14121_s30 }
  0x4c   : > { %p13841_p10 = por %p13840_p6, %p13839_p13 }
  0x4d   : > { %p13837_p2 = pneg %p13836_p1 }
  0x4e   : > { %p13843_p7 = por %p13842_p3, %p13841_p10 }
  0x50   : > { %p13844_p9 = pnand %p13843_p7, %p13837_p2 }
  0x52   : > { %13847 = shalt.err (!%p13844_p9)
}
  0x53   : > { %s13848_s20 = scalar_lea.vmem %s14123_s6, 2048  ;;  %s13939_s29 = smov [#allocation2]  }
  0x54   : > { %p13849_p12 = scmp.ne.s32.totalorder %s14123_s6, %s13848_s20  ;;  %s13853_s5 = sshll.u32 %s13939_s29, 4  ;;  %s13854_s5 = int_to_ptr.vmem [resolvable:$false] %s13853_s5 }
  0x55   : > { %s13855_s9 = scalar_lea.vmem %s13854_s5, 4096  ;;  %p13856_p4 = scmp.lt.s32.totalorder %s14123_s6, %s13854_s5 }
  0x56   : > { %p13851_p1 = pnand %p13849_p12, %p13835_p0  ;;  %p13857_p13 = scmp.lt.s32.totalorder %s13855_s9, %s13848_s20 }
  0x58   : > { %p13852_p5 = pneg %p13851_p1  ;;  %p13858_p6 = por %p13857_p13, %p13856_p4 }
  0x5a   : > { %p13859_p10 = pnand %p13858_p6, %p13852_p5 }
  0x5c   : > { %13862 = shalt.err (!%p13859_p10)
}
  0x5d   : > { %13458 = dma.hbm_to_vmem [thread:$0]  (!%p14125_p11), %s14121_s30, 2048, %s14123_s6, %s14129_s7, %s13937_s11, %s13937_s11, %s13938_s12  }
  0x5e   : > { %206 = sbr.rel (%p14022_p8) target bundleno = 3708 (0xe7c), region = 36 }
  0x65   : > { %s14163_s8 = sand.u32 1, %s13925_s16   ;;  %p16310_p4 = scmp.ne.s32.totalorder %s16303_s21, 0 }
  0x66   : > { %s11974_s10 = sshll.u32 %s14163_s8, 7  ;;  %s209_s24 = scalar_lea.sflag [#allocation3], %s14163_s8 }
  0x67   : > { %s14169_s25 = scalar_lea.vmem [#allocation2], %s11974_s10 }
  0x68   : > { %13908 = dma.done.wait (%p16310_p4), %s209_s24, 2048  }
  0x69   : > { %13910 = vsyncadd (%p16310_p4), %s209_s24, 4294965248  ;;  %p16311_p5 = scmp.eq.s32.totalorder %s14003_s19, 0 }
  0x6b   : > { %13912 = dma.done.wait (%p16311_p5), [#allocation6], 1024   ;;  %p16312_p8 = pmov %p16311_p5 }
  0x6c   : > { %vm267_vm0 = vcmask 261120   ;;  %v263_v0 = vld [vmem:[#allocation5] sm:$0xff]  ;;  %v264_v1 = vld [vmem:[#allocation5 + $0x8] sm:$0xff]  ;;  %v265_v2 = vld [vmem:[#allocation5 + $0x10] sm:$0xff]  ;;  %v16289_v22 = vmov 0.0   ;;  %vm13941_vm1 = vmmov 0   ;;  %v461_v57 = vlaneseq }
  0x6d   : > { %13914 = vsyncadd (%p16312_p8), [#allocation6], 4294966272  ;;  %v13378_v3 = vpack.c.bf16 %v264_v1, %v263_v0  ;;  %v266_v4 = vld [vmem:[#allocation5 + $0x18] sm:$0xff]  ;;  %v247_v5 = vld [vmem:[%s14169_s25] sm:$0xff]  ;;  %12634 = vmatprep.subr.mxu1 %v16289_v22  ;;  %12636 = vmatprep.mubr.msk.f32.mxu1 %vm13941_vm1, %v16289_v22  ;;  %s13942_s21 = smov 96   ;;  %s13943_s23 = smov 64  }
  0x6e   : > { %v13382_v6 = vpack.c.bf16 %v266_v4, %v265_v2  ;;  %12610 = vmatprep.mubr.msk.f32.mxu0 %vm267_vm0, %v247_v5  ;;  %v248_v7 = vld [vmem:[%s14169_s25 + $0x8] sm:$0xff]  ;;  %v249_v8 = vld [vmem:[%s14169_s25 + $0x10] sm:$0xff]  ;;  %v250_v9 = vld [vmem:[%s14169_s25 + $0x18] sm:$0xff]  ;;  %vm475_vm2 = vcmask 64512   ;;  %v462_v58 = vshrl.u32 %v461_v57, 7  ;;  %v464_v59 = vand.u32 127, %v461_v57 }
  0x6f   : > { %13379 = vmatprep.subr.bf16.mxu0 %v13378_v3  ;;  %v251_v10 = vld [vmem:[%s14169_s25 + $0x20] sm:$0xff]  ;;  %v252_v11 = vld [vmem:[%s14169_s25 + $0x28] sm:$0xff]  ;;  %v253_v12 = vld [vmem:[%s14169_s25 + $0x30] sm:$0xff]  ;;  %v13944_v60 = vmov -1e+30   ;;  %s13945_s11 = smov 88  }
  0x70   : > { %13381 = vmatpush3.bf16.msra.mxu0 %v13378_v3  ;;  %v254_v13 = vld [vmem:[%s14169_s25 + $0x38] sm:$0xff]  ;;  %v255_v14 = vld [vmem:[%s14169_s25 + $0x40] sm:$0xff]  ;;  %v256_v15 = vld [vmem:[%s14169_s25 + $0x48] sm:$0xff]  ;;  %vm465_vm3 = vcmp.ge.s32.totalorder %v462_v58, %v464_v59  ;;  %s13946_s12 = smov 120   ;;  %s13947_s30 = smov 56  }
  0x71   : > { %13383 = vmatprep.subr.bf16.mxu0 %v13382_v6  ;;  %v257_v16 = vld [vmem:[%s14169_s25 + $0x50] sm:$0xff]  ;;  %v258_v17 = vld [vmem:[%s14169_s25 + $0x58] sm:$0xff]  ;;  %v259_v18 = vld [vmem:[%s14169_s25 + $0x60] sm:$0xff]  ;;  %v14379_v61 = vsel %vm465_vm3, 0.0, %v13944_v60  ;;  %s13948_s6 = smov 80   ;;  %s13949_s7 = smov 112  }
  0x72   : > { %v260_v19 = vld [vmem:[%s14169_s25 + $0x68] sm:$0xff]  ;;  %v261_v20 = vld [vmem:[%s14169_s25 + $0x70] sm:$0xff]  ;;  %v262_v21 = vld [vmem:[%s14169_s25 + $0x78] sm:$0xff]  ;;  %16318 = vst [vmem:[#allocation17_spill] sm:$0xff] %v14379_v61  ;;  %s13950_s28 = smov 48   ;;  %s13951_s27 = smov 104  }
  0x73   : > { %s13952_s20 = smov 72   ;;  %s13953_s29 = smov 40  }
  0x74   : > { %13385 = vmatpush3.bf16.msra.mxu0 %v13382_v6  ;;  %s16192_s24 = scalar_lea.vmem [#allocation8], %s11974_s10  ;;  %s12257_s10 = sshll.u32 %s14003_s19, 11 }
  0x75   : > { %12679 = vmatprep.subr.mxu0 %v16289_v22  ;;  %s11873_s25 = sshll.u32 %s16192_s24, 4  ;;  %s11860_s19 = scalar_lea.sflag [#allocation4], %s14163_s8  ;;  %s16233_s25 = int_to_ptr.vmem [resolvable:$true] %s11873_s25 }
  0x76   : > { %p16366_p0 = scmp.ne.s32.totalorder %s16308_s13, 0 }
  0x77   : > { %12611 = vmatmul.mubr.msk.f32.vlgmr.msra.gmra.mrb[0].mxu0 %vm267_vm0, %v248_v7 }
  0x78   : > { %12613 = vmatprep.mubr.msk.f32.mxu0 %vm267_vm0, %v249_v8 }
  0x7b   : > { %12614 = vmatmul.mubr.msk.f32.gmra.mrb[2].mxu0 %vm267_vm0, %v250_v9 }
  0x7c   : > { %12616 = vmatprep.mubr.msk.f32.mxu0 %vm267_vm0, %v251_v10 }
  0x7f   : > { %12617 = vmatmul.mubr.msk.f32.gmra.mrb[4].mxu0 %vm267_vm0, %v252_v11 }
  0x80   : > { %12619 = vmatprep.mubr.msk.f32.mxu0 %vm267_vm0, %v253_v12 }
  0x83   : > { %12620 = vmatmul.mubr.msk.f32.gmra.mrb[6].mxu0 %vm267_vm0, %v254_v13 }
  0x84   : > { %12622 = vmatprep.mubr.msk.f32.mxu0 %vm267_vm0, %v255_v14 }
  0x87   : > { %12623 = vmatmul.mubr.msk.f32.gmra.mrb[8].mxu0 %vm267_vm0, %v256_v15 }
  0x88   : > { %12625 = vmatprep.mubr.msk.f32.mxu0 %vm267_vm0, %v257_v16 }
  0x8b   : > { %12626 = vmatmul.mubr.msk.f32.gmra.mrb[10].mxu0 %vm267_vm0, %v258_v17 }
  0x8c   : > { %12628 = vmatprep.mubr.msk.f32.mxu0 %vm267_vm0, %v259_v18 }
  0x8f   : > { %12629 = vmatmul.mubr.msk.f32.gmra.mrb[12].mxu0 %vm267_vm0, %v260_v19 }
  0x90   : > { %12631 = vmatprep.mubr.msk.f32.mxu0 %vm267_vm0, %v261_v20 }
  0x93   : > { %12632 = vmatmul.mubr.msk.f32.gmra.mrb[14].mxu0 %vm267_vm0, %v262_v21 }
  0x94   : > { %12681 = vmatprep.mubr.msk.f32.mxu0 %vm13941_vm1, %v16289_v22 }
 0x14a   : > { %v14217_v23 = vpop.f32.mrb[0].mxu0 }
 0x14b   : > { %16313 = vst [vmem:[#allocation12_spill] sm:$0xff] %v14217_v23  ;;  %v14219_v24 = vpop.f32.mrb[1].mxu0 }
 0x14c   : > { %473 = vrot.lane.b32.xlu0 %v14219_v24, %s13942_s21 }
 0x14e   : > { %v14222_v25 = vpop.f32.mrb[2].mxu0 }
 0x14f   : > { %16314 = vst [vmem:[#allocation13_spill] sm:$0xff] %v14222_v25  ;;  %v14224_v26 = vpop.f32.mrb[3].mxu0 }
 0x150   : > { %551 = vrot.lane.b32.xlu0 %v14217_v23, %s13942_s21  ;;  %628 = vrot.lane.b32.xlu1 %v14224_v26, %s13942_s21 }
 0x152   : > { %v14228_v27 = vpop.f32.mrb[4].mxu0 }
 0x153   : > { %v14230_v28 = vpop.f32.mrb[5].mxu0 }
 0x154   : > { %705 = vrot.lane.b32.xlu1 %v14222_v25, %s13942_s21  ;;  %782 = vrot.lane.b32.xlu0 %v14230_v28, %s13942_s21 }
 0x156   : > { %v14234_v29 = vpop.f32.mrb[6].mxu0 }
 0x157   : > { %v14236_v30 = vpop.f32.mrb[7].mxu0 }
 0x158   : > { %859 = vrot.lane.b32.xlu1 %v14228_v27, %s13942_s21  ;;  %936 = vrot.lane.b32.xlu0 %v14236_v30, %s13942_s21 }
 0x15a   : > { %v14240_v31 = vpop.f32.mrb[8].mxu0 }
 0x15b   : > { %v14242_v32 = vpop.f32.mrb[9].mxu0 }
 0x15c   : > { %1013 = vrot.lane.b32.xlu1 %v14234_v29, %s13942_s21  ;;  %1090 = vrot.lane.b32.xlu0 %v14242_v32, %s13942_s21 }
 0x15e   : > { %v14246_v33 = vpop.f32.mrb[10].mxu0 }
 0x15f   : > { %16315 = vst [vmem:[#allocation14_spill] sm:$0xff] %v14246_v33  ;;  %v14248_v34 = vpop.f32.mrb[11].mxu0 }
 0x160   : > { %1167 = vrot.lane.b32.xlu1 %v14240_v31, %s13942_s21  ;;  %1244 = vrot.lane.b32.xlu0 %v14248_v34, %s13942_s21 }
 0x162   : > { %v14252_v35 = vpop.f32.mrb[12].mxu0 }
 0x163   : > { %16316 = vst [vmem:[#allocation15_spill] sm:$0xff] %v14252_v35  ;;  %v14254_v36 = vpop.f32.mrb[13].mxu0 }
 0x164   : > { %1321 = vrot.lane.b32.xlu1 %v14246_v33, %s13942_s21  ;;  %1398 = vrot.lane.b32.xlu0 %v14254_v36, %s13942_s21 }
 0x166   : > { %v14258_v37 = vpop.f32.mrb[14].mxu0 }
 0x167   : > { %16317 = vst [vmem:[#allocation16_spill] sm:$0xff] %v14258_v37  ;;  %v14260_v38 = vpop.f32.mrb[15].mxu0 }
 0x168   : > { %1475 = vrot.lane.b32.xlu1 %v14252_v35, %s13942_s21  ;;  %1552 = vrot.lane.b32.xlu0 %v14260_v38, %s13942_s21 }
 0x16c   : > { %1629 = vrot.lane.b32.xlu1 %v14258_v37, %s13942_s21  ;;  %1957 = vrot.lane.b32.xlu0 %v14217_v23, %s13943_s23 }
 0x170   : > { %1881 = vrot.lane.b32.xlu1 %v14219_v24, %s13943_s23  ;;  %2033 = vrot.lane.b32.xlu0 %v14224_v26, %s13943_s23 }
 0x174   : > { %2109 = vrot.lane.b32.xlu1 %v14222_v25, %s13943_s23  ;;  %2185 = vrot.lane.b32.xlu0 %v14230_v28, %s13943_s23 }
 0x178   : > { %2261 = vrot.lane.b32.xlu1 %v14228_v27, %s13943_s23 }
 0x17c   : > { %2337 = vrot.lane.b32.xlu1 %v14236_v30, %s13943_s23 }
 0x180   : > { %2413 = vrot.lane.b32.xlu1 %v14234_v29, %s13943_s23 }
 0x1be   : > { %v474_v39 = vpop.permute.xlu0 %473 }
 0x1bf   : > { %12635 = vmatpush3.xpose.msk.msra.mxu1 %vm475_vm2, %v474_v39 }
 0x1c0   : > { %12639 = vmatprep.subr.mxu1 %v16289_v22 }
 0x1c2   : > { %12637 = vmatmul.mubr.msk.f32.vlgmr.msra.gmra.mrb[0].mxu1 %vm475_vm2, %v14219_v24  ;;  %v552_v40 = vpop.permute.xlu0 %551  ;;  %v629_v41 = vpop.permute.xlu1 %628 }
 0x1c3   : > { %12640 = vmatpush3.xpose.msk.msra.mxu1 %vm475_vm2, %v552_v40  ;;  %12641 = vmatprep.mubr.msk.f32.mxu1 %vm13941_vm1, %v16289_v22 }
 0x1c4   : > { %12644 = vmatprep.subr.mxu1 %v16289_v22 }
 0x1c6   : > { %12642 = vmatmul.mubr.msk.f32.vlgmr.msra.gmra.mrb[2].mxu1 %vm475_vm2, %v14217_v23  ;;  %v706_v42 = vpop.permute.xlu1 %705  ;;  %v783_v43 = vpop.permute.xlu0 %782 }
 0x1c7   : > { %12645 = vmatpush3.xpose.msk.msra.mxu1 %vm475_vm2, %v629_v41  ;;  %12646 = vmatprep.mubr.msk.f32.mxu1 %vm13941_vm1, %v16289_v22 }
 0x1c8   : > { %12649 = vmatprep.subr.mxu1 %v16289_v22 }
 0x1ca   : > { %12647 = vmatmul.mubr.msk.f32.vlgmr.msra.gmra.mrb[4].mxu1 %vm475_vm2, %v14224_v26  ;;  %v860_v44 = vpop.permute.xlu1 %859  ;;  %v937_v45 = vpop.permute.xlu0 %936 }
 0x1cb   : > { %12650 = vmatpush3.xpose.msk.msra.mxu1 %vm475_vm2, %v706_v42  ;;  %12651 = vmatprep.mubr.msk.f32.mxu1 %vm13941_vm1, %v16289_v22 }
 0x1cc   : > { %12654 = vmatprep.subr.mxu1 %v16289_v22 }
 0x1ce   : > { %12652 = vmatmul.mubr.msk.f32.vlgmr.msra.gmra.mrb[6].mxu1 %vm475_vm2, %v14222_v25  ;;  %v1014_v46 = vpop.permute.xlu1 %1013  ;;  %v1091_v47 = vpop.permute.xlu0 %1090 }
 0x1cf   : > { %12655 = vmatpush3.xpose.msk.msra.mxu1 %vm475_vm2, %v783_v43  ;;  %12656 = vmatprep.mubr.msk.f32.mxu1 %vm13941_vm1, %v16289_v22 }
 0x1d0   : > { %12659 = vmatprep.subr.mxu1 %v16289_v22 }
 0x1d2   : > { %12657 = vmatmul.mubr.msk.f32.vlgmr.msra.gmra.mrb[8].mxu1 %vm475_vm2, %v14230_v28  ;;  %v1168_v48 = vpop.permute.xlu1 %1167  ;;  %v1245_v49 = vpop.permute.xlu0 %1244 }
 0x1d3   : > { %12660 = vmatpush3.xpose.msk.msra.mxu1 %vm475_vm2, %v860_v44  ;;  %12680 = vmatpush3.xpose.msk.msra.mxu0 %vm475_vm2, %v1168_v48 }
 0x1d4   : > { %12661 = vmatprep.mubr.msk.f32.mxu1 %vm13941_vm1, %v16289_v22  ;;  %12664 = vmatprep.subr.mxu1 %v16289_v22 }
 0x1d5   : > { %12689 = vmatprep.subr.mxu0 %v16289_v22 }
 0x1d6   : > { %12662 = vmatmul.mubr.msk.f32.vlgmr.msra.gmra.mrb[10].mxu1 %vm475_vm2, %v14228_v27  ;;  %12682 = vmatmul.mubr.msk.f32.vlgmr.msra.gmra.mrb[16].mxu0 %vm475_vm2, %v14240_v31  ;;  %v1322_v50 = vpop.permute.xlu1 %1321  ;;  %v1399_v51 = vpop.permute.xlu0 %1398 }
 0x1d7   : > { %12665 = vmatpush3.xpose.msk.msra.mxu1 %vm475_vm2, %v937_v45  ;;  %12690 = vmatpush3.xpose.msk.msra.mxu0 %vm475_vm2, %v1322_v50 }
 0x1d8   : > { %12666 = vmatprep.mubr.msk.f32.mxu1 %vm13941_vm1, %v16289_v22  ;;  %12691 = vmatprep.mubr.msk.f32.mxu0 %vm13941_vm1, %v16289_v22 }
 0x1d9   : > { %12669 = vmatprep.subr.mxu1 %v16289_v22  ;;  %12699 = vmatprep.subr.mxu0 %v16289_v22 }
 0x1da   : > { %12667 = vmatmul.mubr.msk.f32.vlgmr.msra.gmra.mrb[12].mxu1 %vm475_vm2, %v14236_v30  ;;  %12692 = vmatmul.mubr.msk.f32.vlgmr.msra.gmra.mrb[18].mxu0 %vm475_vm2, %v14246_v33  ;;  %v1476_v52 = vpop.permute.xlu1 %1475  ;;  %v1553_v53 = vpop.permute.xlu0 %1552 }
 0x1db   : > { %12670 = vmatpush3.xpose.msk.msra.mxu1 %vm475_vm2, %v1014_v46  ;;  %12700 = vmatpush3.xpose.msk.msra.mxu0 %vm475_vm2, %v1476_v52 }
 0x1dc   : > { %12671 = vmatprep.mubr.msk.f32.mxu1 %vm13941_vm1, %v16289_v22  ;;  %12701 = vmatprep.mubr.msk.f32.mxu0 %vm13941_vm1, %v16289_v22 }
 0x1dd   : > { %12674 = vmatprep.subr.mxu1 %v16289_v22  ;;  %12709 = vmatprep.subr.mxu0 %v16289_v22 }
 0x1de   : > { %12672 = vmatmul.mubr.msk.f32.vlgmr.msra.gmra.mrb[14].mxu1 %vm475_vm2, %v14234_v29  ;;  %12702 = vmatmul.mubr.msk.f32.vlgmr.msra.gmra.mrb[20].mxu0 %vm475_vm2, %v14252_v35  ;;  %v1630_v54 = vpop.permute.xlu1 %1629  ;;  %v1958_v55 = vpop.permute.xlu0 %1957 }
 0x1df   : > { %12675 = vmatpush3.xpose.msk.msra.mxu1 %vm475_vm2, %v1091_v47  ;;  %12710 = vmatpush3.xpose.msk.msra.mxu0 %vm475_vm2, %v1630_v54 }
 0x1e0   : > { %12676 = vmatprep.mubr.msk.f32.mxu1 %vm13941_vm1, %v16289_v22  ;;  %12711 = vmatprep.mubr.msk.f32.mxu0 %vm13941_vm1, %v16289_v22 }
 0x1e1   : > { %12684 = vmatprep.subr.mxu1 %v16289_v22  ;;  %12719 = vmatprep.subr.mxu0 %v16289_v22 }
 0x1e2   : > { %12677 = vmatmul.mubr.msk.f32.vlgmr.msra.gmra.mrb[16].mxu1 %vm475_vm2, %v14242_v32  ;;  %12712 = vmatmul.mubr.msk.f32.vlgmr.msra.gmra.mrb[22].mxu0 %vm475_vm2, %v14258_v37  ;;  %v1882_v56 = vpop.permute.xlu1 %1881 }
 0x1e3   : > { %12685 = vmatpush3.xpose.msk.msra.mxu1 %vm475_vm2, %v1245_v49  ;;  %12720 = vmatpush3.msra.mxu0 %v1958_v55 }
 0x1e4   : > { %12686 = vmatprep.mubr.msk.f32.mxu1 %vm13941_vm1, %v16289_v22  ;;  %12694 = vmatprep.subr.mxu1 %v16289_v22 }
 0x1e5   : > { %12721 = vmatprep.mubr.msk.f32.mxu0 %vm13941_vm1, %v16289_v22  ;;  %12729 = vmatprep.subr.mxu0 %v16289_v22 }
 0x1e6   : > { %12687 = vmatmul.mubr.msk.f32.vlgmr.msra.gmra.mrb[18].mxu1 %vm475_vm2, %v14248_v34 }
 0x1e7   : > { %12695 = vmatpush3.xpose.msk.msra.mxu1 %vm475_vm2, %v1399_v51  ;;  %12696 = vmatprep.mubr.msk.f32.mxu1 %vm13941_vm1, %v16289_v22 }
 0x1e8   : > { %12704 = vmatprep.subr.mxu1 %v16289_v22 }
 0x1ea   : > { %12697 = vmatmul.mubr.msk.f32.vlgmr.msra.gmra.mrb[20].mxu1 %vm475_vm2, %v14254_v36 }
 0x1eb   : > { %12705 = vmatpush3.xpose.msk.msra.mxu1 %vm475_vm2, %v1553_v53  ;;  %12706 = vmatprep.mubr.msk.f32.mxu1 %vm13941_vm1, %v16289_v22 }
 0x1ec   : > { %12714 = vmatprep.subr.mxu1 %v16289_v22 }
 0x1ee   : > { %12707 = vmatmul.mubr.msk.f32.vlgmr.msra.gmra.mrb[22].mxu1 %vm475_vm2, %v14260_v38 }
 0x1ef   : > { %12715 = vmatpush3.msra.mxu1 %v1882_v56  ;;  %12716 = vmatprep.mubr.msk.f32.mxu1 %vm13941_vm1, %v16289_v22 }
 0x1f0   : > { %12724 = vmatprep.subr.mxu1 %v16289_v22 }
 0x295   : > { %v546_v62 = vpop.f32.mrb[0].mxu1 }
 0x296   : > { %v14382_v63 = vadd.f32 %v546_v62, %v14379_v61  ;;  %v12638_v0 = vpop.f32.mrb[1].mxu1 }
 0x298   : > { %v1705_v1 = vsel %vm475_vm2, %v14382_v63, -inf }
 0x299   : > { %v623_v2 = vpop.f32.mrb[2].mxu1  ;;  %1706 = vmax.xlane.f32.xlu0 %v1705_v1 }
 0x29a   : > { %v14387_v3 = vadd.f32 %v623_v2, %v14379_v61  ;;  %v12643_v4 = vpop.f32.mrb[3].mxu1 }
 0x29c   : > { %v1708_v5 = vsel %vm475_vm2, %v14387_v3, -inf }
 0x29d   : > { %v700_v6 = vpop.f32.mrb[4].mxu1  ;;  %1709 = vmax.xlane.f32.xlu1 %v1708_v5 }
 0x29e   : > { %v14392_v7 = vadd.f32 %v700_v6, %v14379_v61  ;;  %v12648_v8 = vpop.f32.mrb[5].mxu1 }
 0x2a0   : > { %v1711_v9 = vsel %vm475_vm2, %v14392_v7, -inf }
 0x2a1   : > { %v777_v10 = vpop.f32.mrb[6].mxu1  ;;  %1712 = vmax.xlane.f32.xlu0 %v1711_v9 }
 0x2a2   : > { %v14397_v11 = vadd.f32 %v777_v10, %v14379_v61  ;;  %v12653_v12 = vpop.f32.mrb[7].mxu1 }
 0x2a4   : > { %v1714_v13 = vsel %vm475_vm2, %v14397_v11, -inf }
 0x2a5   : > { %v854_v14 = vpop.f32.mrb[8].mxu1  ;;  %1715 = vmax.xlane.f32.xlu0 %v1714_v13 }
 0x2a6   : > { %v14402_v15 = vadd.f32 %v854_v14, %v14379_v61  ;;  %v12658_v16 = vpop.f32.mrb[9].mxu1 }
 0x2a8   : > { %v1717_v17 = vsel %vm475_vm2, %v14402_v15, -inf }
 0x2a9   : > { %v931_v18 = vpop.f32.mrb[10].mxu1  ;;  %1718 = vmax.xlane.f32.xlu1 %v1717_v17  ;;  %v1239_v19 = vpop.f32.mrb[16].mxu0 }
 0x2aa   : > { %v14407_v20 = vadd.f32 %v1239_v19, %v14379_v61  ;;  %v12663_v21 = vpop.f32.mrb[11].mxu1  ;;  %v12683_v39 = vpop.f32.mrb[17].mxu0  ;;  %v14418_v47 = vadd.f32 %v931_v18, %v14379_v61 }
 0x2ab   : > { %v14469_v39 = vpop.permute.xlu1 %2109 }
 0x2ac   : > { %v1732_v40 = vsel %vm475_vm2, %v14407_v20, -inf  ;;  %v1720_v55 = vsel %vm475_vm2, %v14418_v47, -inf }
 0x2ad   : > { %v1008_v41 = vpop.f32.mrb[12].mxu1  ;;  %1733 = vmax.xlane.f32.xlu0 %v1732_v40  ;;  %v1393_v42 = vpop.f32.mrb[18].mxu0 }
 0x2ae   : > { %v14412_v43 = vadd.f32 %v1008_v41, %v14379_v61  ;;  %v14415_v44 = vadd.f32 %v1393_v42, %v14379_v61  ;;  %v12668_v45 = vpop.f32.mrb[13].mxu1  ;;  %v12693_v46 = vpop.f32.mrb[19].mxu0 }
 0x2af   : > { %v14471_v40 = vpop.permute.xlu1 %2261  ;;  %v14473_v41 = vpop.permute.xlu0 %2033 }
 0x2b0   : > { %v1723_v48 = vsel %vm475_vm2, %v14412_v43, -inf  ;;  %v1738_v49 = vsel %vm475_vm2, %v14415_v44, -inf }
 0x2b1   : > { %v1085_v50 = vpop.f32.mrb[14].mxu1  ;;  %1724 = vmax.xlane.f32.xlu1 %v1723_v48  ;;  %1739 = vmax.xlane.f32.xlu0 %v1738_v49  ;;  %v1547_v51 = vpop.f32.mrb[20].mxu0 }
 0x2b2   : > { %v12673_v52 = vpop.f32.mrb[15].mxu1  ;;  %v12703_v53 = vpop.f32.mrb[21].mxu0  ;;  %v14425_v54 = vadd.f32 %v1547_v51, %v14379_v61  ;;  %v14435_v2 = vadd.f32 %v1085_v50, %v14379_v61 }
 0x2b3   : > { %v14475_v42 = vpop.permute.xlu1 %2337  ;;  %v14477_v45 = vpop.permute.xlu0 %2185 }
 0x2b4   : > { %v1744_v62 = vsel %vm475_vm2, %v14425_v54, -inf  ;;  %v1726_v8 = vsel %vm475_vm2, %v14435_v2, -inf }
 0x2b5   : > { %v1162_v56 = vpop.f32.mrb[16].mxu1  ;;  %1721 = vmax.xlane.f32.xlu0 %v1720_v55  ;;  %v1701_v57 = vpop.f32.mrb[22].mxu0 }
 0x2b6   : > { %v12678_v58 = vpop.f32.mrb[17].mxu1  ;;  %v12713_v59 = vpop.f32.mrb[23].mxu0  ;;  %v14430_v60 = vadd.f32 %v1701_v57, %v14379_v61  ;;  %v14450_v12 = vadd.f32 %v1162_v56, %v14379_v61 }
 0x2b7   : > { %v14479_v46 = vpop.permute.xlu1 %2413 }
 0x2b8   : > { %v1750_v4 = vsel %vm475_vm2, %v14430_v60, -inf  ;;  %v1729_v14 = vsel %vm475_vm2, %v14450_v12, -inf }
 0x2b9   : > { %v1316_v0 = vpop.f32.mrb[18].mxu1  ;;  %1745 = vmax.xlane.f32.xlu0 %v1744_v62 }
 0x2ba   : > { %v12688_v1 = vpop.f32.mrb[19].mxu1  ;;  %v14453_v13 = vadd.f32 %v1316_v0, %v14379_v61 }
 0x2bc   : > { %v1735_v17 = vsel %vm475_vm2, %v14453_v13, -inf }
 0x2bd   : > { %v1470_v5 = vpop.f32.mrb[20].mxu1  ;;  %1751 = vmax.xlane.f32.xlu0 %v1750_v4 }
 0x2be   : > { %v12698_v6 = vpop.f32.mrb[21].mxu1  ;;  %v14458_v16 = vadd.f32 %v1470_v5, %v14379_v61 }
 0x2c0   : > { %v1741_v19 = vsel %vm475_vm2, %v14458_v16, -inf }
 0x2c1   : > { %v1624_v9 = vpop.f32.mrb[22].mxu1  ;;  %1727 = vmax.xlane.f32.xlu0 %v1726_v8 }
 0x2c2   : > { %2565 = vrot.lane.b32.xlu1 %v14240_v31, %s13943_s23  ;;  %v12708_v10 = vpop.f32.mrb[23].mxu1  ;;  %v14463_v18 = vadd.f32 %v1624_v9, %v14379_v61 }
 0x2c4   : > { %v1747_v21 = vsel %vm475_vm2, %v14463_v18, -inf }
 0x2c6   : > { %2717 = vrot.lane.b32.xlu1 %v14246_v33, %s13943_s23 }
 0x2d7   : > { %2489 = vrot.lane.b32.xlu0 %v14242_v32, %s13943_s23 }
 0x2db   : > { %2641 = vrot.lane.b32.xlu0 %v14248_v34, %s13943_s23 }
 0x2ea   : > { %1730 = vmax.xlane.f32.xlu1 %v1729_v14 }
 0x2ee   : > { %1736 = vmax.xlane.f32.xlu1 %v1735_v17 }
 0x2f2   : > { %1742 = vmax.xlane.f32.xlu1 %v1741_v19 }
 0x2f6   : > { %1748 = vmax.xlane.f32.xlu1 %v1747_v21 }
 0x326   : > { %v1707_v48 = vpop.xlane.xlu0 %1706 }
 0x327   : > { %v1753_v49 = vsub.f32 %v14382_v63, %v1707_v48 }
 0x329   : > { %v1769_v50 = vmul.f32 1.442695, %v1753_v49 }
 0x32a   : > { %v1710_v51 = vpop.xlane.xlu1 %1709 }
 0x32b   : > { %13521 = vpow2.f32 %v1769_v50  ;;  %v1754_v52 = vsub.f32 %v14387_v3, %v1710_v51 }
 0x32d   : > { %v1771_v53 = vmul.f32 1.442695, %v1754_v52 }
 0x32e   : > { %v1713_v55 = vpop.xlane.xlu0 %1712 }
 0x32f   : > { %13523 = vpow2.f32 %v1771_v53  ;;  %v1755_v56 = vsub.f32 %v14392_v7, %v1713_v55 }
 0x331   : > { %v1773_v57 = vmul.f32 1.442695, %v1755_v56 }
 0x332   : > { %v1716_v58 = vpop.xlane.xlu0 %1715 }
 0x333   : > { %13525 = vpow2.f32 %v1773_v57  ;;  %v1756_v59 = vsub.f32 %v14397_v11, %v1716_v58 }
 0x335   : > { %v14485_v62 = vpop.eup %13521  ;;  %v1775_v0 = vmul.f32 1.442695, %v1756_v59 }
 0x336   : > { %v1719_v1 = vpop.xlane.xlu1 %1718  ;;  %v1801_v63 = vsel %vm475_vm2, %v14485_v62, 0.0 }
 0x337   : > { %13527 = vpow2.f32 %v1775_v0  ;;  %v1757_v3 = vsub.f32 %v14402_v15, %v1719_v1  ;;  %1802 = vadd.xlane.f32.xlu1 %v1801_v63 }
 0x339   : > { %v14490_v4 = vpop.eup %13523  ;;  %v1777_v5 = vmul.f32 1.442695, %v1757_v3 }
 0x33a   : > { %v1734_v7 = vpop.xlane.xlu0 %1733  ;;  %v1804_v6 = vsel %vm475_vm2, %v14490_v4, 0.0 }
 0x33b   : > { %13529 = vpow2.f32 %v1777_v5  ;;  %v1762_v11 = vsub.f32 %v14407_v20, %v1734_v7  ;;  %1805 = vadd.xlane.f32.xlu0 %v1804_v6 }
 0x33d   : > { %v14495_v8 = vpop.eup %13525  ;;  %v1787_v9 = vmul.f32 1.442695, %v1762_v11 }
 0x33e   : > { %v1725_v10 = vpop.xlane.xlu1 %1724  ;;  %v1740_v14 = vpop.xlane.xlu0 %1739  ;;  %v1807_v15 = vsel %vm475_vm2, %v14495_v8, 0.0 }
 0x33f   : > { %13531 = vpow2.f32 %v1787_v9  ;;  %v1759_v17 = vsub.f32 %v14412_v43, %v1725_v10  ;;  %v1764_v19 = vsub.f32 %v14415_v44, %v1740_v14  ;;  %1808 = vadd.xlane.f32.xlu1 %v1807_v15 }
 0x341   : > { %v14501_v21 = vpop.eup %13527  ;;  %v1781_v48 = vmul.f32 1.442695, %v1759_v17  ;;  %v1791_v49 = vmul.f32 1.442695, %v1764_v19 }
 0x342   : > { %v1722_v20 = vpop.xlane.xlu0 %1721  ;;  %v1810_v50 = vsel %vm475_vm2, %v14501_v21, 0.0  ;;  %v14549_v19 = vpop.permute.xlu1 %2565 }
 0x343   : > { %13533 = vpow2.f32 %v1781_v48  ;;  %v1758_v51 = vsub.f32 %v14418_v47, %v1722_v20  ;;  %1811 = vadd.xlane.f32.xlu0 %v1810_v50 }
 0x344   : > { %13535 = vpow2.f32 %v1791_v49 }
 0x345   : > { %v14506_v52 = vpop.eup %13529  ;;  %v1779_v53 = vmul.f32 1.442695, %v1758_v51 }
 0x346   : > { %v1746_v43 = vpop.xlane.xlu0 %1745  ;;  %v1813_v44 = vsel %vm475_vm2, %v14506_v52, 0.0  ;;  %v14553_v48 = vpop.permute.xlu1 %2717 }
 0x347   : > { %13537 = vpow2.f32 %v1779_v53  ;;  %v1766_v55 = vsub.f32 %v14425_v54, %v1746_v43  ;;  %1814 = vadd.xlane.f32.xlu1 %v1813_v44 }
 0x349   : > { %v14511_v56 = vpop.eup %13531  ;;  %v1795_v57 = vmul.f32 1.442695, %v1766_v55 }
 0x34a   : > { %v1752_v58 = vpop.xlane.xlu0 %1751  ;;  %v1828_v47 = vsel %vm475_vm2, %v14511_v56, 0.0 }
 0x34b   : > { %13539 = vpow2.f32 %v1795_v57  ;;  %v1768_v59 = vsub.f32 %v14430_v60, %v1752_v58  ;;  %1829 = vadd.xlane.f32.xlu0 %v1828_v47 }
 0x34d   : > { %v14516_v0 = vpop.eup %13533  ;;  %v1799_v1 = vmul.f32 1.442695, %v1768_v59 }
 0x34e   : > { %v14518_v63 = vpop.eup %13535  ;;  %v1728_v3 = vpop.xlane.xlu0 %1727  ;;  %v1819_v54 = vsel %vm475_vm2, %v14516_v0, 0.0 }
 0x34f   : > { %13541 = vpow2.f32 %v1799_v1  ;;  %v1760_v5 = vsub.f32 %v14435_v2, %v1728_v3  ;;  %1820 = vadd.xlane.f32.xlu1 %v1819_v54  ;;  %v1834_v7 = vsel %vm475_vm2, %v14518_v63, 0.0 }
 0x350   : > { %1835 = vadd.xlane.f32.xlu0 %v1834_v7 }
 0x351   : > { %v14525_v6 = vpop.eup %13537  ;;  %v1783_v60 = vmul.f32 1.442695, %v1760_v5 }
 0x352   : > { %v1816_v11 = vsel %vm475_vm2, %v14525_v6, 0.0  ;;  %v2490_v54 = vpop.permute.xlu0 %2489 }
 0x353   : > { %13543 = vpow2.f32 %v1783_v60 }
 0x354   : > { %1817 = vadd.xlane.f32.xlu0 %v1816_v11 }
 0x355   : > { %v14529_v9 = vpop.eup %13539 }
 0x356   : > { %v1840_v10 = vsel %vm475_vm2, %v14529_v9, 0.0  ;;  %v14599_v7 = vpop.permute.xlu0 %2641 }
 0x358   : > { %1841 = vadd.xlane.f32.xlu0 %v1840_v10 }
 0x359   : > { %v14533_v2 = vpop.eup %13541 }
 0x35a   : > { %v1846_v14 = vsel %vm475_vm2, %v14533_v2, 0.0 }
 0x35c   : > { %1847 = vadd.xlane.f32.xlu0 %v1846_v14 }
 0x35d   : > { %v14537_v15 = vpop.eup %13543 }
 0x35e   : > { %v1822_v17 = vsel %vm475_vm2, %v14537_v15, 0.0 }
 0x360   : > { %1823 = vadd.xlane.f32.xlu0 %v1822_v17  ;;  %2869 = vrot.lane.b32.xlu1 %v14252_v35, %s13943_s23 }
 0x364   : > { %3021 = vrot.lane.b32.xlu1 %v14258_v37, %s13943_s23 }
 0x368   : > { %3177 = vrot.lane.b32.xlu1 %v14217_v23, %s13945_s11 }
 0x36c   : > { %3175 = vrot.lane.b32.xlu1 %v14217_v23, %s13946_s12 }
 0x370   : > { %3333 = vrot.lane.b32.xlu1 %v14222_v25, %s13945_s11 }
 0x376   : > { %2793 = vrot.lane.b32.xlu0 %v14254_v36, %s13943_s23 }
 0x377   : > { %v1731_v49 = vpop.xlane.xlu1 %1730 }
 0x378   : > { %v1761_v50 = vsub.f32 %v14450_v12, %v1731_v49 }
 0x37a   : > { %2945 = vrot.lane.b32.xlu0 %v14260_v38, %s13943_s23  ;;  %v1785_v51 = vmul.f32 1.442695, %v1761_v50 }
 0x37b   : > { %v1737_v20 = vpop.xlane.xlu1 %1736 }
 0x37c   : > { %v1763_v53 = vsub.f32 %v14453_v13, %v1737_v20  ;;  %13545 = vpow2.f32 %v1785_v51 }
 0x37e   : > { %3099 = vrot.lane.b32.xlu0 %v14219_v24, %s13945_s11  ;;  %v1789_v44 = vmul.f32 1.442695, %v1763_v53 }
 0x37f   : > { %v1743_v43 = vpop.xlane.xlu1 %1742 }
 0x380   : > { %v1765_v55 = vsub.f32 %v14458_v16, %v1743_v43  ;;  %13547 = vpow2.f32 %v1789_v44 }
 0x382   : > { %3097 = vrot.lane.b32.xlu0 %v14219_v24, %s13946_s12  ;;  %v1793_v57 = vmul.f32 1.442695, %v1765_v55 }
 0x383   : > { %v1749_v1 = vpop.xlane.xlu1 %1748 }
 0x384   : > { %13549 = vpow2.f32 %v1793_v57  ;;  %v1767_v3 = vsub.f32 %v14463_v18, %v1749_v1 }
 0x386   : > { %3255 = vrot.lane.b32.xlu0 %v14224_v26, %s13945_s11  ;;  %v14572_v12 = vpop.eup %13545  ;;  %v1797_v5 = vmul.f32 1.442695, %v1767_v3 }
 0x387   : > { %v1825_v13 = vsel %vm475_vm2, %v14572_v12, 0.0 }
 0x388   : > { %13551 = vpow2.f32 %v1797_v5 }
 0x38a   : > { %3253 = vrot.lane.b32.xlu0 %v14224_v26, %s13946_s12  ;;  %v14578_v16 = vpop.eup %13547 }
 0x38b   : > { %v1831_v58 = vsel %vm475_vm2, %v14578_v16, 0.0 }
 0x38e   : > { %3411 = vrot.lane.b32.xlu0 %v14230_v28, %s13945_s11  ;;  %v14584_v47 = vpop.eup %13549 }
 0x38f   : > { %v1837_v59 = vsel %vm475_vm2, %v14584_v47, 0.0 }
 0x392   : > { %3409 = vrot.lane.b32.xlu0 %v14230_v28, %s13946_s12  ;;  %v14601_v14 = vpop.eup %13551 }
 0x393   : > { %v1843_v20 = vsel %vm475_vm2, %v14601_v14, 0.0 }
 0x394   : > { %1826 = vadd.xlane.f32.xlu1 %v1825_v13 }
 0x396   : > { %3645 = vrot.lane.b32.xlu0 %v14234_v29, %s13945_s11 }
 0x398   : > { %1832 = vadd.xlane.f32.xlu1 %v1831_v58 }
 0x39a   : > { %3801 = vrot.lane.b32.xlu0 %v14240_v31, %s13945_s11 }
 0x39c   : > { %1838 = vadd.xlane.f32.xlu1 %v1837_v59 }
 0x39e   : > { %3957 = vrot.lane.b32.xlu0 %v14246_v33, %s13945_s11 }
 0x3a2   : > { %4113 = vrot.lane.b32.xlu0 %v14252_v35, %s13945_s11 }
 0x3a6   : > { %4269 = vrot.lane.b32.xlu0 %v14258_v37, %s13945_s11 }
 0x3ad   : > { %3331 = vrot.lane.b32.xlu1 %v14222_v25, %s13946_s12 }
 0x3c4   : > { %v1803_v60 = vpop.xlane.xlu1 %1802 }
 0x3c5   : > { %13553 = vrcp.f32 %v1803_v60 }
 0x3c8   : > { %v1806_v11 = vpop.xlane.xlu0 %1805 }
 0x3c9   : > { %13555 = vrcp.f32 %v1806_v11 }
 0x3cc   : > { %v1809_v10 = vpop.xlane.xlu1 %1808 }
 0x3cd   : > { %13557 = vrcp.f32 %v1809_v10 }
 0x3cf   : > { %v13554_v17 = vpop.eup %13553 }
 0x3d0   : > { %v1812_v49 = vpop.xlane.xlu0 %1811  ;;  %v1865_v18 = vmul.f32 %v13554_v17, %v14485_v62 }
 0x3d1   : > { %13559 = vrcp.f32 %v1812_v49  ;;  %1844 = vadd.xlane.f32.xlu1 %v1843_v20 }
 0x3d2   : > { %12717 = vmatmul.mubr.msk.f32.vlgmr.msra.gmra.mrb[24].mxu1 %vm475_vm2, %v1865_v18 }
 0x3d3   : > { %v13556_v50 = vpop.eup %13555  ;;  %12725 = vmatpush3.msra.mxu1 %v14473_v41  ;;  %12726 = vmatprep.mubr.msk.f32.mxu1 %vm13941_vm1, %v16289_v22 }
 0x3d4   : > { %v1815_v51 = vpop.xlane.xlu1 %1814  ;;  %v1866_v53 = vmul.f32 %v13556_v50, %v14490_v4  ;;  %12734 = vmatprep.subr.mxu1 %v16289_v22 }
 0x3d5   : > { %13561 = vrcp.f32 %v1815_v51 }
 0x3d6   : > { %12722 = vmatmul.mubr.msk.f32.vlgmr.msra.gmra.mrb[24].mxu0 %vm475_vm2, %v1866_v53 }
 0x3d7   : > { %v13558_v43 = vpop.eup %13557  ;;  %12730 = vmatpush3.msra.mxu0 %v14469_v39  ;;  %12731 = vmatprep.mubr.msk.f32.mxu0 %vm13941_vm1, %v16289_v22 }
 0x3d8   : > { %v1830_v62 = vpop.xlane.xlu0 %1829  ;;  %v1867_v41 = vmul.f32 %v13558_v43, %v14495_v8  ;;  %12739 = vmatprep.subr.mxu0 %v16289_v22 }
 0x3da   : > { %12727 = vmatmul.mubr.msk.f32.vlgmr.msra.gmra.mrb[26].mxu1 %vm475_vm2, %v1867_v41 }
 0x3db   : > { %v13560_v44 = vpop.eup %13559  ;;  %12735 = vmatpush3.msra.mxu1 %v14477_v45  ;;  %12736 = vmatprep.mubr.msk.f32.mxu1 %vm13941_vm1, %v16289_v22 }
 0x3dc   : > { %v1821_v4 = vpop.xlane.xlu1 %1820  ;;  %v1868_v55 = vmul.f32 %v13560_v44, %v14501_v21  ;;  %12744 = vmatprep.subr.mxu1 %v16289_v22 }
 0x3dd   : > { %13563 = vrcp.f32 %v1821_v4  ;;  %v1836_v39 = vpop.xlane.xlu0 %1835 }
 0x3de   : > { %12732 = vmatmul.mubr.msk.f32.vlgmr.msra.gmra.mrb[26].mxu0 %vm475_vm2, %v1868_v55 }
 0x3df   : > { %v13562_v8 = vpop.eup %13561  ;;  %12740 = vmatpush3.msra.mxu0 %v14471_v40  ;;  %12741 = vmatprep.mubr.msk.f32.mxu0 %vm13941_vm1, %v16289_v22 }
 0x3e0   : > { %v1869_v45 = vmul.f32 %v13562_v8, %v14506_v52  ;;  %12749 = vmatprep.subr.mxu0 %v16289_v22  ;;  %v2870_v3 = vpop.permute.xlu1 %2869 }
 0x3e1   : > { %v1818_v57 = vpop.xlane.xlu0 %1817 }
 0x3e2   : > { %13565 = vrcp.f32 %v1818_v57  ;;  %3489 = vrot.lane.b32.xlu1 %v14228_v27, %s13945_s11  ;;  %12737 = vmatmul.mubr.msk.f32.vlgmr.msra.gmra.mrb[28].mxu1 %vm475_vm2, %v1869_v45 }
 0x3e3   : > { %12745 = vmatpush3.msra.mxu1 %v14475_v42  ;;  %12746 = vmatprep.mubr.msk.f32.mxu1 %vm13941_vm1, %v16289_v22 }
 0x3e4   : > { %12754 = vmatprep.subr.mxu1 %v16289_v22 }
 0x3e5   : > { %v1842_v40 = vpop.xlane.xlu0 %1841 }
 0x3e6   : > { %3487 = vrot.lane.b32.xlu1 %v14228_v27, %s13946_s12 }
 0x3e7   : > { %v13564_v21 = vpop.eup %13563 }
 0x3e8   : > { %v1871_v52 = vmul.f32 %v13564_v21, %v14516_v0 }
 0x3e9   : > { %v1848_v13 = vpop.xlane.xlu0 %1847 }
 0x3ea   : > { %3643 = vrot.lane.b32.xlu1 %v14234_v29, %s13946_s12  ;;  %12747 = vmatmul.mubr.msk.f32.vlgmr.msra.gmra.mrb[30].mxu1 %vm475_vm2, %v1871_v52 }
 0x3eb   : > { %12755 = vmatpush3.msra.mxu1 %v2490_v54  ;;  %12756 = vmatprep.mubr.msk.f32.mxu1 %vm13941_vm1, %v16289_v22 }
 0x3ec   : > { %v13566_v42 = vpop.eup %13565  ;;  %12764 = vmatprep.subr.mxu1 %v16289_v22 }
 0x3ed   : > { %v1824_v58 = vpop.xlane.xlu0 %1823  ;;  %v1870_v59 = vmul.f32 %v13566_v42, %v14525_v6 }
 0x3ee   : > { %13567 = vrcp.f32 %v1824_v58  ;;  %3799 = vrot.lane.b32.xlu1 %v14240_v31, %s13946_s12 }
 0x3ef   : > { %12742 = vmatmul.mubr.msk.f32.vlgmr.msra.gmra.mrb[28].mxu0 %vm475_vm2, %v1870_v59  ;;  %13569 = vrcp.f32 %v1830_v62 }
 0x3f0   : > { %12750 = vmatpush3.msra.mxu0 %v14479_v46  ;;  %12751 = vmatprep.mubr.msk.f32.mxu0 %vm13941_vm1, %v16289_v22  ;;  %13571 = vrcp.f32 %v1836_v39 }
 0x3f1   : > { %12759 = vmatprep.subr.mxu0 %v16289_v22  ;;  %13573 = vrcp.f32 %v1842_v40  ;;  %v2794_v50 = vpop.permute.xlu0 %2793 }
 0x3f2   : > { %3955 = vrot.lane.b32.xlu1 %v14246_v33, %s13946_s12  ;;  %13575 = vrcp.f32 %v1848_v13 }
 0x3f5   : > { %v2946_v43 = vpop.permute.xlu0 %2945 }
 0x3f6   : > { %4111 = vrot.lane.b32.xlu1 %v14252_v35, %s13946_s12 }
 0x3f8   : > { %v13568_v0 = vpop.eup %13567 }
 0x3f9   : > { %v1872_v6 = vmul.f32 %v13568_v0, %v14537_v15  ;;  %v13570_v1 = vpop.eup %13569  ;;  %v3022_v15 = vpop.permute.xlu1 %3021 }
 0x3fa   : > { %4267 = vrot.lane.b32.xlu1 %v14258_v37, %s13946_s12  ;;  %v1874_v46 = vmul.f32 %v13570_v1, %v14511_v56  ;;  %v13572_v54 = vpop.eup %13571 }
 0x3fb   : > { %12752 = vmatmul.mubr.msk.f32.vlgmr.msra.gmra.mrb[30].mxu0 %vm475_vm2, %v1872_v6  ;;  %v13574_v5 = vpop.eup %13573 }
 0x3fc   : > { %12760 = vmatpush3.msra.mxu0 %v14549_v19  ;;  %12761 = vmatprep.mubr.msk.f32.mxu0 %vm13941_vm1, %v16289_v22  ;;  %v1876_v19 = vmul.f32 %v13572_v54, %v14518_v63  ;;  %v1878_v56 = vmul.f32 %v13574_v5, %v14529_v9  ;;  %v13576_v60 = vpop.eup %13575 }
 0x3fd   : > { %12769 = vmatprep.subr.mxu0 %v16289_v22  ;;  %v1880_v63 = vmul.f32 %v13576_v60, %v14533_v2 }
 0x3ff   : > { %12762 = vmatmul.mubr.msk.f32.vlgmr.msra.gmra.mrb[32].mxu0 %vm475_vm2, %v1874_v46 }
 0x400   : > { %12770 = vmatpush3.msra.mxu0 %v14553_v48  ;;  %12771 = vmatprep.mubr.msk.f32.mxu0 %vm13941_vm1, %v16289_v22  ;;  %v3178_v48 = vpop.permute.xlu1 %3177 }
 0x401   : > { %12779 = vmatprep.subr.mxu0 %v16289_v22 }
 0x403   : > { %12772 = vmatmul.mubr.msk.f32.vlgmr.msra.gmra.mrb[34].mxu0 %vm475_vm2, %v1876_v19 }
 0x404   : > { %12780 = vmatpush3.msra.mxu0 %v2870_v3  ;;  %12781 = vmatprep.mubr.msk.f32.mxu0 %vm13941_vm1, %v16289_v22  ;;  %v3176_v11 = vpop.permute.xlu1 %3175 }
 0x405   : > { %12789 = vmatprep.subr.mxu0 %v16289_v22 }
 0x407   : > { %12782 = vmatmul.mubr.msk.f32.vlgmr.msra.gmra.mrb[36].mxu0 %vm475_vm2, %v1878_v56 }
 0x408   : > { %12790 = vmatpush3.msra.mxu0 %v3022_v15  ;;  %12791 = vmatprep.mubr.msk.f32.mxu0 %vm13941_vm1, %v16289_v22  ;;  %v3334_v9 = vpop.permute.xlu1 %3333 }
 0x409   : > { %12799 = vmatprep.subr.mxu0 %v16289_v22 }
 0x40b   : > { %12792 = vmatmul.mubr.msk.f32.vlgmr.msra.gmra.mrb[38].mxu0 %vm475_vm2, %v1880_v63 }
 0x40c   : > { %12801 = vmatprep.mubr.msk.f32.mxu0 %vm13941_vm1, %v16289_v22 }
 0x40f   : > { %12800 = vmatpush3.xpose.msk.msra.mxu0 %vm475_vm2, %v3178_v48 }
 0x410   : > { %12809 = vmatprep.subr.mxu0 %v16289_v22 }
 0x412   : > { %12802 = vmatmul.mubr.msk.f32.vlgmr.msra.gmra.mrb[40].mxu0 %vm475_vm2, %v3176_v11 }
 0x413   : > { %12810 = vmatpush3.xpose.msk.msra.mxu0 %vm475_vm2, %v3334_v9  ;;  %12811 = vmatprep.mubr.msk.f32.mxu0 %vm13941_vm1, %v16289_v22 }
 0x414   : > { %12819 = vmatprep.subr.mxu0 %v16289_v22 }
 0x421   : > { %v1827_v2 = vpop.xlane.xlu1 %1826 }
 0x422   : > { %13577 = vrcp.f32 %v1827_v2 }
 0x425   : > { %v1833_v10 = vpop.xlane.xlu1 %1832 }
 0x426   : > { %13579 = vrcp.f32 %v1833_v10 }
 0x429   : > { %v1839_v17 = vpop.xlane.xlu1 %1838 }
 0x42a   : > { %13581 = vrcp.f32 %v1839_v17 }
 0x42c   : > { %v13578_v49 = vpop.eup %13577 }
 0x42d   : > { %v3332_v20 = vpop.permute.xlu1 %3331  ;;  %v1873_v18 = vmul.f32 %v13578_v49, %v14572_v12 }
 0x42e   : > { %12812 = vmatmul.mubr.msk.f32.vlgmr.msra.gmra.mrb[42].mxu0 %vm475_vm2, %v3332_v20 }
 0x42f   : > { %12757 = vmatmul.mubr.msk.f32.vlgmr.msra.gmra.mrb[32].mxu1 %vm475_vm2, %v1873_v18  ;;  %12821 = vmatprep.mubr.msk.f32.mxu0 %vm13941_vm1, %v16289_v22 }
 0x430   : > { %v13580_v51 = vpop.eup %13579  ;;  %12765 = vmatpush3.msra.mxu1 %v14599_v7  ;;  %12766 = vmatprep.mubr.msk.f32.mxu1 %vm13941_vm1, %v16289_v22 }
 0x431   : > { %12774 = vmatprep.subr.mxu1 %v16289_v22  ;;  %v1875_v53 = vmul.f32 %v13580_v51, %v14578_v16  ;;  %v3100_v16 = vpop.permute.xlu0 %3099 }
 0x433   : > { %12767 = vmatmul.mubr.msk.f32.vlgmr.msra.gmra.mrb[34].mxu1 %vm475_vm2, %v1875_v53 }
 0x434   : > { %v13582_v12 = vpop.eup %13581  ;;  %12775 = vmatpush3.msra.mxu1 %v2794_v50  ;;  %12776 = vmatprep.mubr.msk.f32.mxu1 %vm13941_vm1, %v16289_v22 }
 0x435   : > { %12784 = vmatprep.subr.mxu1 %v16289_v22  ;;  %v1877_v62 = vmul.f32 %v13582_v12, %v14584_v47  ;;  %v3098_v7 = vpop.permute.xlu0 %3097 }
 0x437   : > { %12777 = vmatmul.mubr.msk.f32.vlgmr.msra.gmra.mrb[36].mxu1 %vm475_vm2, %v1877_v62 }
 0x438   : > { %12785 = vmatpush3.msra.mxu1 %v2946_v43  ;;  %12786 = vmatprep.mubr.msk.f32.mxu1 %vm13941_vm1, %v16289_v22 }
 0x439   : > { %12794 = vmatprep.subr.mxu1 %v16289_v22  ;;  %v3256_v41 = vpop.permute.xlu0 %3255 }
 0x43d   : > { %v3254_v44 = vpop.permute.xlu0 %3253 }
 0x441   : > { %v3412_v4 = vpop.permute.xlu0 %3411 }
 0x445   : > { %v3410_v55 = vpop.permute.xlu0 %3409 }
 0x449   : > { %v3646_v8 = vpop.permute.xlu0 %3645 }
 0x44d   : > { %v3802_v47 = vpop.permute.xlu0 %3801 }
 0x451   : > { %v3958_v13 = vpop.permute.xlu0 %3957 }
 0x45e   : > { %v1845_v39 = vpop.xlane.xlu1 %1844 }
 0x45f   : > { %13583 = vrcp.f32 %v1845_v39 }
 0x462   : > { %v3490_v45 = vpop.permute.xlu1 %3489 }
 0x463   : > { %12820 = vmatpush3.xpose.msk.msra.mxu0 %vm475_vm2, %v3490_v45 }
 0x464   : > { %12829 = vmatprep.subr.mxu0 %v16289_v22 }
 0x466   : > { %v3488_v57 = vpop.permute.xlu1 %3487 }
 0x467   : > { %12822 = vmatmul.mubr.msk.f32.vlgmr.msra.gmra.mrb[44].mxu0 %vm475_vm2, %v3488_v57 }
 0x468   : > { %12830 = vmatpush3.xpose.msk.msra.mxu0 %vm475_vm2, %v3646_v8  ;;  %12831 = vmatprep.mubr.msk.f32.mxu0 %vm13941_vm1, %v16289_v22 }
 0x469   : > { %v13584_v40 = vpop.eup %13583  ;;  %12839 = vmatprep.subr.mxu0 %v16289_v22 }
 0x46a   : > { %v3644_v21 = vpop.permute.xlu1 %3643  ;;  %v1879_v52 = vmul.f32 %v13584_v40, %v14601_v14  ;;  %v4114_v14 = vpop.permute.xlu0 %4113 }
 0x46b   : > { %12832 = vmatmul.mubr.msk.f32.vlgmr.msra.gmra.mrb[46].mxu0 %vm475_vm2, %v3644_v21 }
 0x46c   : > { %12840 = vmatpush3.xpose.msk.msra.mxu0 %vm475_vm2, %v3802_v47  ;;  %12787 = vmatmul.mubr.msk.f32.vlgmr.msra.gmra.mrb[38].mxu1 %vm475_vm2, %v1879_v52 }
 0x46d   : > { %12795 = vmatpush3.xpose.msk.msra.mxu1 %vm475_vm2, %v3100_v16  ;;  %12841 = vmatprep.mubr.msk.f32.mxu0 %vm13941_vm1, %v16289_v22 }
 0x46e   : > { %v3800_v42 = vpop.permute.xlu1 %3799  ;;  %12849 = vmatprep.subr.mxu0 %v16289_v22  ;;  %12796 = vmatprep.mubr.msk.f32.mxu1 %vm13941_vm1, %v16289_v22  ;;  %v4270_v0 = vpop.permute.xlu0 %4269 }
 0x46f   : > { %12804 = vmatprep.subr.mxu1 %v16289_v22  ;;  %12842 = vmatmul.mubr.msk.f32.vlgmr.msra.gmra.mrb[48].mxu0 %vm475_vm2, %v3800_v42 }
 0x470   : > { %12850 = vmatpush3.xpose.msk.msra.mxu0 %vm475_vm2, %v3958_v13  ;;  %12797 = vmatmul.mubr.msk.f32.vlgmr.msra.gmra.mrb[40].mxu1 %vm475_vm2, %v3098_v7 }
 0x471   : > { %12805 = vmatpush3.xpose.msk.msra.mxu1 %vm475_vm2, %v3256_v41  ;;  %12851 = vmatprep.mubr.msk.f32.mxu0 %vm13941_vm1, %v16289_v22 }
 0x472   : > { %v3956_v58 = vpop.permute.xlu1 %3955  ;;  %12859 = vmatprep.subr.mxu0 %v16289_v22  ;;  %12806 = vmatprep.mubr.msk.f32.mxu1 %vm13941_vm1, %v16289_v22 }
 0x473   : > { %12814 = vmatprep.subr.mxu1 %v16289_v22  ;;  %12852 = vmatmul.mubr.msk.f32.vlgmr.msra.gmra.mrb[50].mxu0 %vm475_vm2, %v3956_v58 }
 0x474   : > { %12860 = vmatpush3.xpose.msk.msra.mxu0 %vm475_vm2, %v4114_v14  ;;  %12807 = vmatmul.mubr.msk.f32.vlgmr.msra.gmra.mrb[42].mxu1 %vm475_vm2, %v3254_v44 }
 0x475   : > { %12815 = vmatpush3.xpose.msk.msra.mxu1 %vm475_vm2, %v3412_v4  ;;  %12861 = vmatprep.mubr.msk.f32.mxu0 %vm13941_vm1, %v16289_v22 }
 0x476   : > { %v4112_v59 = vpop.permute.xlu1 %4111  ;;  %12869 = vmatprep.subr.mxu0 %v16289_v22  ;;  %12816 = vmatprep.mubr.msk.f32.mxu1 %vm13941_vm1, %v16289_v22 }
 0x477   : > { %12862 = vmatmul.mubr.msk.f32.vlgmr.msra.gmra.mrb[52].mxu0 %vm475_vm2, %v4112_v59  ;;  %12824 = vmatprep.subr.mxu1 %v16289_v22 }
 0x478   : > { %12870 = vmatpush3.xpose.msk.msra.mxu0 %vm475_vm2, %v4270_v0  ;;  %12817 = vmatmul.mubr.msk.f32.vlgmr.msra.gmra.mrb[44].mxu1 %vm475_vm2, %v3410_v55 }
 0x479   : > { %12871 = vmatprep.mubr.msk.f32.mxu0 %vm13941_vm1, %v16289_v22  ;;  %12826 = vmatprep.mubr.msk.f32.mxu1 %vm13941_vm1, %v16289_v22 }
 0x47a   : > { %v4268_v6 = vpop.permute.xlu1 %4267  ;;  %12879 = vmatprep.subr.mxu0 %v16289_v22 }
 0x47b   : > { %12872 = vmatmul.mubr.msk.f32.vlgmr.msra.gmra.mrb[54].mxu0 %vm475_vm2, %v4268_v6 }
 0x47c   : > { %12881 = vmatprep.mubr.msk.f32.mxu0 %vm13941_vm1, %v16289_v22 }
 0x4a5   : > { %v14761_v1 = vpop.f32.mrb[24].mxu1 }
 0x4a6   : > { %16319 = vst [vmem:[#allocation18_spill] sm:$0xff] %v14761_v1  ;;  %v12718_v3 = vpop.f32.mrb[25].mxu1 }
 0x4a9   : > { %v14763_v46 = vpop.f32.mrb[24].mxu0 }
 0x4aa   : > { %16320 = vst [vmem:[#allocation19_spill] sm:$0xff] %v14763_v46  ;;  %v12723_v54 = vpop.f32.mrb[25].mxu0 }
 0x4ad   : > { %v14765_v15 = vpop.f32.mrb[26].mxu1 }
 0x4ae   : > { %16321 = vst [vmem:[#allocation20_spill] sm:$0xff] %v14765_v15  ;;  %v12728_v19 = vpop.f32.mrb[27].mxu1 }
 0x4b1   : > { %v14767_v5 = vpop.f32.mrb[26].mxu0 }
 0x4b2   : > { %16322 = vst [vmem:[#allocation21_spill] sm:$0xff] %v14767_v5  ;;  %v12733_v56 = vpop.f32.mrb[27].mxu0 }
 0x4b5   : > { %v14769_v60 = vpop.f32.mrb[28].mxu1 }
 0x4b6   : > { %16323 = vst [vmem:[#allocation22_spill] sm:$0xff] %v14769_v60  ;;  %v12738_v48 = vpop.f32.mrb[29].mxu1 }
 0x4bd   : > { %v14771_v63 = vpop.f32.mrb[30].mxu1 }
 0x4be   : > { %16324 = vst [vmem:[#allocation23_spill] sm:$0xff] %v14771_v63  ;;  %v12748_v11 = vpop.f32.mrb[31].mxu1 }
 0x4c2   : > { %v14773_v9 = vpop.f32.mrb[28].mxu0 }
 0x4c3   : > { %16325 = vst [vmem:[#allocation24_spill] sm:$0xff] %v14773_v9  ;;  %v12743_v2 = vpop.f32.mrb[29].mxu0 }
 0x4ce   : > { %v14775_v10 = vpop.f32.mrb[30].mxu0 }
 0x4cf   : > { %16326 = vst [vmem:[#allocation25_spill] sm:$0xff] %v14775_v10  ;;  %v12753_v17 = vpop.f32.mrb[31].mxu0 }
 0x4d2   : > { %v14777_v49 = vpop.f32.mrb[32].mxu0 }
 0x4d3   : > { %16327 = vst [vmem:[#allocation26_spill] sm:$0xff] %v14777_v49  ;;  %v12763_v20 = vpop.f32.mrb[33].mxu0 }
 0x4d6   : > { %v14779_v18 = vpop.f32.mrb[34].mxu0 }
 0x4d7   : > { %16328 = vst [vmem:[#allocation27_spill] sm:$0xff] %v14779_v18  ;;  %v12773_v50 = vpop.f32.mrb[35].mxu0 }
 0x4da   : > { %v14781_v51 = vpop.f32.mrb[36].mxu0 }
 0x4db   : > { %16329 = vst [vmem:[#allocation28_spill] sm:$0xff] %v14781_v51  ;;  %v12783_v53 = vpop.f32.mrb[37].mxu0 }
 0x4de   : > { %v14783_v12 = vpop.f32.mrb[38].mxu0 }
 0x4df   : > { %16330 = vst [vmem:[#allocation29_spill] sm:$0xff] %v14783_v12  ;;  %v12793_v43 = vpop.f32.mrb[39].mxu0 }
 0x4e5   : > { %v3249_v62 = vpop.f32.mrb[40].mxu0 }
 0x4e6   : > { %v14786_v16 = vadd.f32 %v3249_v62, %v14379_v61  ;;  %v12803_v7 = vpop.f32.mrb[41].mxu0 }
 0x4e8   : > { %v4348_v41 = vsel %vm475_vm2, %v14786_v16, -inf }
 0x4e9   : > { %4349 = vmax.xlane.f32.xlu1 %v4348_v41 }
 0x501   : > { %v3405_v44 = vpop.f32.mrb[42].mxu0 }
 0x502   : > { %v14790_v4 = vpop.f32.mrb[32].mxu1  ;;  %v12813_v55 = vpop.f32.mrb[43].mxu0  ;;  %v3406_v17 = vadd.f32 %v3405_v44, %v14379_v61 }
 0x503   : > { %16331 = vst [vmem:[#allocation30_spill] sm:$0xff] %v14790_v4  ;;  %v12758_v39 = vpop.f32.mrb[33].mxu1 }
 0x506   : > { %v14792_v8 = vpop.f32.mrb[34].mxu1 }
 0x507   : > { %16332 = vst [vmem:[#allocation31_spill] sm:$0xff] %v14792_v8  ;;  %v12768_v45 = vpop.f32.mrb[35].mxu1 }
 0x508   : > { %v4354_v45 = vsel %vm475_vm2, %v3406_v17, -inf }
 0x50a   : > { %v14794_v47 = vpop.f32.mrb[36].mxu1 }
 0x50b   : > { %16333 = vst [vmem:[#allocation32_spill] sm:$0xff] %v14794_v47  ;;  %v12778_v57 = vpop.f32.mrb[37].mxu1 }
 0x53a   : > { %v3561_v40 = vpop.f32.mrb[44].mxu0 }
 0x53b   : > { %v12823_v21 = vpop.f32.mrb[45].mxu0  ;;  %v3562_v41 = vadd.f32 %v3561_v40, %v14379_v61 }
 0x53d   : > { %v4360_v57 = vsel %vm475_vm2, %v3562_v41, -inf }
 0x53e   : > { %v14796_v52 = vpop.f32.mrb[46].mxu0 }
 0x53f   : > { %v14798_v13 = vpop.f32.mrb[38].mxu1  ;;  %v12833_v42 = vpop.f32.mrb[47].mxu0 }
 0x540   : > { %16334 = vst [vmem:[#allocation33_spill] sm:$0xff] %v14798_v13  ;;  %v12788_v14 = vpop.f32.mrb[39].mxu1 }
 0x542   : > { %v14800_v58 = vpop.f32.mrb[48].mxu0 }
 0x543   : > { %v3171_v59 = vpop.f32.mrb[40].mxu1  ;;  %v12843_v0 = vpop.f32.mrb[49].mxu0 }
 0x544   : > { %v3172_v6 = vadd.f32 %v3171_v59, %v14379_v61  ;;  %v12798_v3 = vpop.f32.mrb[41].mxu1 }
 0x546   : > { %v14803_v54 = vpop.f32.mrb[50].mxu0  ;;  %v4345_v19 = vsel %vm475_vm2, %v3172_v6, -inf }
 0x547   : > { %4346 = vmax.xlane.f32.xlu0 %v4345_v19  ;;  %v3327_v56 = vpop.f32.mrb[42].mxu1  ;;  %v12853_v48 = vpop.f32.mrb[51].mxu0 }
 0x548   : > { %v3328_v11 = vadd.f32 %v3327_v56, %v14379_v61  ;;  %v12808_v2 = vpop.f32.mrb[43].mxu1 }
 0x54a   : > { %v14808_v20 = vpop.f32.mrb[52].mxu0  ;;  %v4351_v50 = vsel %vm475_vm2, %v3328_v11, -inf }
 0x54b   : > { %4352 = vmax.xlane.f32.xlu0 %v4351_v50  ;;  %v3483_v53 = vpop.f32.mrb[44].mxu1  ;;  %v12863_v43 = vpop.f32.mrb[53].mxu0 }
 0x54c   : > { %v3484_v62 = vadd.f32 %v3483_v53, %v14379_v61  ;;  %v12818_v7 = vpop.f32.mrb[45].mxu1 }
 0x54e   : > { %v14813_v55 = vpop.f32.mrb[54].mxu0  ;;  %v4357_v39 = vsel %vm475_vm2, %v3484_v62, -inf }
 0x54f   : > { %4358 = vmax.xlane.f32.xlu1 %v4357_v39  ;;  %4355 = vmax.xlane.f32.xlu0 %v4354_v45  ;;  %v12873_v44 = vpop.f32.mrb[55].mxu0 }
 0x553   : > { %4361 = vmax.xlane.f32.xlu0 %v4360_v57 }
 0x560   : > { %3567 = vrot.lane.b32.xlu1 %v14236_v30, %s13945_s11 }
 0x564   : > { %3723 = vrot.lane.b32.xlu1 %v14242_v32, %s13945_s11 }
 0x568   : > { %3721 = vrot.lane.b32.xlu1 %v14242_v32, %s13946_s12 }
 0x569   : > { %3565 = vrot.lane.b32.xlu0 %v14236_v30, %s13946_s12 }
 0x56c   : > { %3877 = vrot.lane.b32.xlu1 %v14248_v34, %s13946_s12 }
 0x56d   : > { %3879 = vrot.lane.b32.xlu0 %v14248_v34, %s13945_s11 }
 0x570   : > { %4035 = vrot.lane.b32.xlu1 %v14254_v36, %s13945_s11 }
 0x571   : > { %4191 = vrot.lane.b32.xlu0 %v14260_v38, %s13945_s11  ;;  %s16231_s11 = scalar_lea.hbm %s16285_s4, %s12257_s10 }
 0x574   : > { %4033 = vrot.lane.b32.xlu1 %v14254_v36, %s13946_s12 }
 0x575   : > { %4521 = vrot.lane.b32.xlu0 %v14219_v24, %s13947_s30 }
 0x576   : > { %v4350_v40 = vpop.xlane.xlu1 %4349 }
 0x577   : > { %v4394_v21 = vsub.f32 %v14786_v16, %v4350_v40 }
 0x578   : > { %4189 = vrot.lane.b32.xlu1 %v14260_v38, %s13946_s12  ;;  %s13863_s12 = scalar_lea.vmem %s16233_s25, 2048 }
 0x579   : > { %4673 = vrot.lane.b32.xlu0 %v14224_v26, %s13947_s30  ;;  %v4411_v42 = vmul.f32 1.442695, %v4394_v21  ;;  %p13864_p11 = scmp.ne.s32.totalorder %s16233_s25, %s13863_s12 }
 0x57b   : > { %13585 = vpow2.f32 %v4411_v42  ;;  %p13865_p2 = pnand %p13864_p11, %p16366_p0 }
 0x57c   : > { %4597 = vrot.lane.b32.xlu1 %v14217_v23, %s13947_s30 }
 0x57d   : > { %p13866_p3 = pneg %p13865_p2 }
 0x580   : > { %4749 = vrot.lane.b32.xlu1 %v14222_v25, %s13947_s30 }
 0x585   : > { %v14847_v14 = vpop.eup %13585 }
 0x586   : > { %v4444_v59 = vsel %vm475_vm2, %v14847_v14, 0.0 }
 0x598   : > { %4445 = vadd.xlane.f32.xlu0 %v4444_v59 }
 0x5d4   : > { %v4347_v0 = vpop.xlane.xlu0 %4346 }
 0x5d5   : > { %v4393_v3 = vsub.f32 %v3172_v6, %v4347_v0 }
 0x5d7   : > { %v4409_v19 = vmul.f32 1.442695, %v4393_v3 }
 0x5d8   : > { %v4353_v56 = vpop.xlane.xlu0 %4352 }
 0x5d9   : > { %13587 = vpow2.f32 %v4409_v19  ;;  %v4395_v48 = vsub.f32 %v3328_v11, %v4353_v56 }
 0x5db   : > { %v4413_v2 = vmul.f32 1.442695, %v4395_v48 }
 0x5dc   : > { %v4359_v50 = vpop.xlane.xlu1 %4358  ;;  %v4356_v53 = vpop.xlane.xlu0 %4355 }
 0x5dd   : > { %13589 = vpow2.f32 %v4413_v2  ;;  %v4397_v43 = vsub.f32 %v3484_v62, %v4359_v50  ;;  %v4396_v16 = vsub.f32 %v3406_v17, %v4356_v53 }
 0x5df   : > { %v4417_v7 = vmul.f32 1.442695, %v4397_v43  ;;  %v4415_v39 = vmul.f32 1.442695, %v4396_v16 }
 0x5e0   : > { %v3568_v45 = vpop.permute.xlu1 %3567  ;;  %v4362_v44 = vpop.xlane.xlu0 %4361 }
 0x5e1   : > { %13591 = vpow2.f32 %v4417_v7  ;;  %v4398_v57 = vsub.f32 %v3562_v41, %v4362_v44  ;;  %12825 = vmatpush3.xpose.msk.msra.mxu1 %vm475_vm2, %v3568_v45  ;;  %v14904_v44 = vadd.f32 %v14800_v58, %v14379_v61  ;;  %v14922_v58 = vadd.f32 %v14803_v54, %v14379_v61 }
 0x5e2   : > { %13593 = vpow2.f32 %v4415_v39  ;;  %12834 = vmatprep.subr.mxu1 %v16289_v22 }
 0x5e3   : > { %v14853_v6 = vpop.eup %13587  ;;  %v4419_v11 = vmul.f32 1.442695, %v4398_v57  ;;  %v14908_v57 = vadd.f32 %v14813_v55, %v14379_v61 }
 0x5e4   : > { %v3724_v40 = vpop.permute.xlu1 %3723  ;;  %v3566_v21 = vpop.permute.xlu0 %3565  ;;  %v4441_v62 = vsel %vm475_vm2, %v14853_v6, 0.0 }
 0x5e5   : > { %13595 = vpow2.f32 %v4419_v11  ;;  %4442 = vadd.xlane.f32.xlu1 %v4441_v62  ;;  %12827 = vmatmul.mubr.msk.f32.vlgmr.msra.gmra.mrb[46].mxu1 %vm475_vm2, %v3566_v21  ;;  %v14916_v21 = vadd.f32 %v14796_v52, %v14379_v61  ;;  %v4378_v52 = vsel %vm475_vm2, %v14922_v58, -inf }
 0x5e6   : > { %12835 = vmatpush3.xpose.msk.msra.mxu1 %vm475_vm2, %v3724_v40  ;;  %12836 = vmatprep.mubr.msk.f32.mxu1 %vm13941_vm1, %v16289_v22  ;;  %v4372_v40 = vsel %vm475_vm2, %v14904_v44, -inf }
 0x5e7   : > { %v14861_v17 = vpop.eup %13589  ;;  %12844 = vmatprep.subr.mxu1 %v16289_v22  ;;  %v4366_v55 = vsel %vm475_vm2, %v14916_v21, -inf }
 0x5e8   : > { %v3722_v41 = vpop.permute.xlu1 %3721  ;;  %v3880_v42 = vpop.permute.xlu0 %3879  ;;  %v4447_v59 = vsel %vm475_vm2, %v14861_v17, 0.0 }
 0x5e9   : > { %4448 = vadd.xlane.f32.xlu0 %v4447_v59  ;;  %12837 = vmatmul.mubr.msk.f32.vlgmr.msra.gmra.mrb[48].mxu1 %vm475_vm2, %v3722_v41  ;;  %v4390_v41 = vsel %vm475_vm2, %v14908_v57, -inf }
 0x5ea   : > { %12845 = vmatpush3.xpose.msk.msra.mxu1 %vm475_vm2, %v3880_v42  ;;  %12846 = vmatprep.mubr.msk.f32.mxu1 %vm13941_vm1, %v16289_v22  ;;  %v14928_v42 = vadd.f32 %v14808_v20, %v14379_v61 }
 0x5eb   : > { %v14870_v0 = vpop.eup %13591  ;;  %12854 = vmatprep.subr.mxu1 %v16289_v22 }
 0x5ec   : > { %v14873_v3 = vpop.eup %13593  ;;  %v3878_v19 = vpop.permute.xlu1 %3877  ;;  %v4453_v56 = vsel %vm475_vm2, %v14870_v0, 0.0  ;;  %v4384_v59 = vsel %vm475_vm2, %v14928_v42, -inf }
 0x5ed   : > { %4454 = vadd.xlane.f32.xlu1 %v4453_v56  ;;  %v4450_v48 = vsel %vm475_vm2, %v14873_v3, 0.0  ;;  %12847 = vmatmul.mubr.msk.f32.vlgmr.msra.gmra.mrb[50].mxu1 %vm475_vm2, %v3878_v19  ;;  %v4192_v43 = vpop.permute.xlu0 %4191 }
 0x5ee   : > { %4451 = vadd.xlane.f32.xlu0 %v4450_v48  ;;  %12856 = vmatprep.mubr.msk.f32.mxu1 %vm13941_vm1, %v16289_v22 }
 0x5ef   : > { %v14882_v2 = vpop.eup %13595 }
 0x5f0   : > { %v4036_v50 = vpop.permute.xlu1 %4035  ;;  %v4456_v53 = vsel %vm475_vm2, %v14882_v2, 0.0 }
 0x5f1   : > { %12855 = vmatpush3.xpose.msk.msra.mxu1 %vm475_vm2, %v4036_v50  ;;  %v4522_v39 = vpop.permute.xlu0 %4521 }
 0x5f2   : > { %4457 = vadd.xlane.f32.xlu0 %v4456_v53  ;;  %12864 = vmatprep.subr.mxu1 %v16289_v22 }
 0x5f4   : > { %v4034_v16 = vpop.permute.xlu1 %4033 }
 0x5f5   : > { %12857 = vmatmul.mubr.msk.f32.vlgmr.msra.gmra.mrb[52].mxu1 %vm475_vm2, %v4034_v16  ;;  %v14910_v11 = vpop.permute.xlu0 %4673 }
 0x5f6   : > { %12865 = vmatpush3.xpose.msk.msra.mxu1 %vm475_vm2, %v4192_v43  ;;  %12866 = vmatprep.mubr.msk.f32.mxu1 %vm13941_vm1, %v16289_v22 }
 0x5f7   : > { %12874 = vmatprep.subr.mxu1 %v16289_v22 }
 0x5f8   : > { %v4190_v7 = vpop.permute.xlu1 %4189 }
 0x5f9   : > { %12867 = vmatmul.mubr.msk.f32.vlgmr.msra.gmra.mrb[54].mxu1 %vm475_vm2, %v4190_v7 }
 0x5fa   : > { %12875 = vmatpush3.msra.mxu1 %v4522_v39  ;;  %12876 = vmatprep.mubr.msk.f32.mxu1 %vm13941_vm1, %v16289_v22 }
 0x5fb   : > { %12884 = vmatprep.subr.mxu1 %v16289_v22 }
 0x5fc   : > { %v4598_v45 = vpop.permute.xlu1 %4597 }
 0x5fd   : > { %12880 = vmatpush3.msra.mxu0 %v4598_v45 }
 0x5fe   : > { %4901 = vrot.lane.b32.xlu1 %v14228_v27, %s13947_s30  ;;  %12889 = vmatprep.subr.mxu0 %v16289_v22 }
 0x600   : > { %v4750_v56 = vpop.permute.xlu1 %4749 }
 0x608   : > { %4825 = vrot.lane.b32.xlu0 %v14230_v28, %s13947_s30 }
 0x622   : > { %4373 = vmax.xlane.f32.xlu1 %v4372_v40 }
 0x625   : > { %v4446_v62 = vpop.xlane.xlu0 %4445 }
 0x626   : > { %13597 = vrcp.f32 %v4446_v62  ;;  %4391 = vmax.xlane.f32.xlu1 %v4390_v41 }
 0x627   : > { %4367 = vmax.xlane.f32.xlu0 %v4366_v55 }
 0x62b   : > { %4379 = vmax.xlane.f32.xlu0 %v4378_v52 }
 0x62f   : > { %4385 = vmax.xlane.f32.xlu0 %v4384_v59 }
 0x630   : > { %v13598_v54 = vpop.eup %13597 }
 0x631   : > { %v4506_v19 = vmul.f32 %v13598_v54, %v14847_v14 }
 0x633   : > { %12882 = vmatmul.mubr.msk.f32.vlgmr.msra.gmra.mrb[56].mxu0 %vm475_vm2, %v4506_v19 }
 0x634   : > { %12890 = vmatpush3.msra.mxu0 %v4750_v56  ;;  %12891 = vmatprep.mubr.msk.f32.mxu0 %vm13941_vm1, %v16289_v22 }
 0x635   : > { %12899 = vmatprep.subr.mxu0 %v16289_v22 }
 0x637   : > { %5053 = vrot.lane.b32.xlu1 %v14234_v29, %s13947_s30 }
 0x63b   : > { %5357 = vrot.lane.b32.xlu1 %v14246_v33, %s13947_s30 }
 0x63f   : > { %5509 = vrot.lane.b32.xlu1 %v14252_v35, %s13947_s30 }
 0x643   : > { %6125 = vrot.lane.b32.xlu1 %v14219_v24, %s13948_s6 }
 0x645   : > { %5205 = vrot.lane.b32.xlu0 %v14240_v31, %s13947_s30 }
 0x647   : > { %6203 = vrot.lane.b32.xlu1 %v14217_v23, %s13948_s6 }
 0x649   : > { %5661 = vrot.lane.b32.xlu0 %v14258_v37, %s13947_s30 }
 0x64b   : > { %6281 = vrot.lane.b32.xlu1 %v14224_v26, %s13948_s6 }
 0x64d   : > { %6123 = vrot.lane.b32.xlu0 %v14219_v24, %s13949_s7 }
 0x64f   : > { %6359 = vrot.lane.b32.xlu1 %v14222_v25, %s13948_s6 }
 0x651   : > { %6201 = vrot.lane.b32.xlu0 %v14217_v23, %s13949_s7 }
 0x653   : > { %6437 = vrot.lane.b32.xlu1 %v14230_v28, %s13948_s6 }
 0x655   : > { %6279 = vrot.lane.b32.xlu0 %v14224_v26, %s13949_s7 }
 0x657   : > { %6515 = vrot.lane.b32.xlu1 %v14228_v27, %s13948_s6 }
 0x659   : > { %6357 = vrot.lane.b32.xlu0 %v14222_v25, %s13949_s7 }
 0x65b   : > { %6593 = vrot.lane.b32.xlu1 %v14236_v30, %s13948_s6 }
 0x65d   : > { %6435 = vrot.lane.b32.xlu0 %v14230_v28, %s13949_s7 }
 0x65f   : > { %6671 = vrot.lane.b32.xlu1 %v14234_v29, %s13948_s6 }
 0x661   : > { %6513 = vrot.lane.b32.xlu0 %v14228_v27, %s13949_s7 }
 0x663   : > { %6749 = vrot.lane.b32.xlu1 %v14242_v32, %s13948_s6 }
 0x665   : > { %6591 = vrot.lane.b32.xlu0 %v14236_v30, %s13949_s7 }
 0x667   : > { %6827 = vrot.lane.b32.xlu1 %v14240_v31, %s13948_s6 }
 0x669   : > { %6669 = vrot.lane.b32.xlu0 %v14234_v29, %s13949_s7 }
 0x66b   : > { %6905 = vrot.lane.b32.xlu1 %v14248_v34, %s13948_s6 }
 0x66d   : > { %6747 = vrot.lane.b32.xlu0 %v14242_v32, %s13949_s7 }
 0x66f   : > { %6903 = vrot.lane.b32.xlu1 %v14248_v34, %s13949_s7 }
 0x671   : > { %6825 = vrot.lane.b32.xlu0 %v14240_v31, %s13949_s7 }
 0x672   : > { %v4443_v20 = vpop.xlane.xlu1 %4442 }
 0x673   : > { %13599 = vrcp.f32 %v4443_v20  ;;  %6983 = vrot.lane.b32.xlu1 %v14246_v33, %s13948_s6 }
 0x676   : > { %v4449_v14 = vpop.xlane.xlu0 %4448 }
 0x677   : > { %13601 = vrcp.f32 %v4449_v14 }
 0x67a   : > { %v4455_v48 = vpop.xlane.xlu1 %4454 }
 0x67b   : > { %13603 = vrcp.f32 %v4455_v48  ;;  %v4452_v50 = vpop.xlane.xlu0 %4451 }
 0x67c   : > { %13605 = vrcp.f32 %v4452_v50 }
 0x67d   : > { %v13600_v53 = vpop.eup %13599 }
 0x67e   : > { %v4505_v43 = vmul.f32 %v13600_v53, %v14853_v6  ;;  %v4902_v41 = vpop.permute.xlu1 %4901 }
 0x67f   : > { %v4458_v16 = vpop.xlane.xlu0 %4457 }
 0x680   : > { %13607 = vrcp.f32 %v4458_v16  ;;  %12877 = vmatmul.mubr.msk.f32.vlgmr.msra.gmra.mrb[56].mxu1 %vm475_vm2, %v4505_v43 }
 0x681   : > { %v13602_v7 = vpop.eup %13601  ;;  %12885 = vmatpush3.msra.mxu1 %v14910_v11  ;;  %12886 = vmatprep.mubr.msk.f32.mxu1 %vm13941_vm1, %v16289_v22 }
 0x682   : > { %12894 = vmatprep.subr.mxu1 %v16289_v22  ;;  %v4507_v39 = vmul.f32 %v13602_v7, %v14861_v17 }
 0x683   : > { %v4826_v45 = vpop.permute.xlu0 %4825 }
 0x684   : > { %12887 = vmatmul.mubr.msk.f32.vlgmr.msra.gmra.mrb[58].mxu1 %vm475_vm2, %v4507_v39 }
 0x685   : > { %v13604_v40 = vpop.eup %13603  ;;  %12895 = vmatpush3.msra.mxu1 %v4826_v45  ;;  %12896 = vmatprep.mubr.msk.f32.mxu1 %vm13941_vm1, %v16289_v22 }
 0x686   : > { %v13606_v6 = vpop.eup %13605  ;;  %v4509_v62 = vmul.f32 %v13604_v40, %v14870_v0  ;;  %12904 = vmatprep.subr.mxu1 %v16289_v22 }
 0x687   : > { %v4508_v11 = vmul.f32 %v13606_v6, %v14873_v3 }
 0x688   : > { %12897 = vmatmul.mubr.msk.f32.vlgmr.msra.gmra.mrb[60].mxu1 %vm475_vm2, %v4509_v62 }
 0x689   : > { %12892 = vmatmul.mubr.msk.f32.vlgmr.msra.gmra.mrb[58].mxu0 %vm475_vm2, %v4508_v11  ;;  %12906 = vmatprep.mubr.msk.f32.mxu1 %vm13941_vm1, %v16289_v22 }
 0x68a   : > { %v13608_v17 = vpop.eup %13607  ;;  %12900 = vmatpush3.msra.mxu0 %v4902_v41  ;;  %12901 = vmatprep.mubr.msk.f32.mxu0 %vm13941_vm1, %v16289_v22 }
 0x68b   : > { %v4510_v55 = vmul.f32 %v13608_v17, %v14882_v2  ;;  %12909 = vmatprep.subr.mxu0 %v16289_v22 }
 0x68d   : > { %12902 = vmatmul.mubr.msk.f32.vlgmr.msra.gmra.mrb[60].mxu0 %vm475_vm2, %v4510_v55 }
 0x68e   : > { %12911 = vmatprep.mubr.msk.f32.mxu0 %vm13941_vm1, %v16289_v22 }
 0x6af   : > { %v4374_v0 = vpop.xlane.xlu1 %4373 }
 0x6b0   : > { %v4402_v3 = vsub.f32 %v14904_v44, %v4374_v0 }
 0x6b2   : > { %v4427_v52 = vmul.f32 1.442695, %v4402_v3 }
 0x6b3   : > { %v4392_v59 = vpop.xlane.xlu1 %4391 }
 0x6b4   : > { %13609 = vpow2.f32 %v4427_v52  ;;  %v4368_v54 = vpop.xlane.xlu0 %4367  ;;  %v4408_v20 = vsub.f32 %v14908_v57, %v4392_v59 }
 0x6b5   : > { %v4400_v19 = vsub.f32 %v14916_v21, %v4368_v54 }
 0x6b6   : > { %v4439_v43 = vmul.f32 1.442695, %v4408_v20 }
 0x6b7   : > { %v4423_v56 = vmul.f32 1.442695, %v4400_v19  ;;  %v5054_v2 = vpop.permute.xlu1 %5053 }
 0x6b8   : > { %v4380_v14 = vpop.xlane.xlu0 %4379  ;;  %v3639_v48 = vpop.f32.mrb[46].mxu1  ;;  %12910 = vmatpush3.msra.mxu0 %v5054_v2 }
 0x6b9   : > { %13611 = vpow2.f32 %v4423_v56  ;;  %v4404_v50 = vsub.f32 %v14922_v58, %v4380_v14  ;;  %v15024_v53 = vadd.f32 %v3639_v48, %v14379_v61  ;;  %v12828_v44 = vpop.f32.mrb[47].mxu1  ;;  %12919 = vmatprep.subr.mxu0 %v16289_v22 }
 0x6bb   : > { %v4431_v16 = vmul.f32 1.442695, %v4404_v50  ;;  %v4363_v21 = vsel %vm475_vm2, %v15024_v53, -inf  ;;  %v15063_v48 = vpop.permute.xlu1 %5357 }
 0x6bc   : > { %v4386_v7 = vpop.xlane.xlu0 %4385  ;;  %v3795_v57 = vpop.f32.mrb[48].mxu1  ;;  %4364 = vmax.xlane.f32.xlu0 %v4363_v21 }
 0x6bd   : > { %13613 = vpow2.f32 %v4431_v16  ;;  %v4406_v39 = vsub.f32 %v14928_v42, %v4386_v7  ;;  %v12838_v45 = vpop.f32.mrb[49].mxu1  ;;  %v15033_v6 = vadd.f32 %v3795_v57, %v14379_v61 }
 0x6be   : > { %v15030_v40 = vpop.eup %13609  ;;  %13615 = vpow2.f32 %v4439_v43 }
 0x6bf   : > { %v4435_v58 = vmul.f32 1.442695, %v4406_v39  ;;  %v4468_v62 = vsel %vm475_vm2, %v15030_v40, 0.0  ;;  %v4369_v42 = vsel %vm475_vm2, %v15033_v6, -inf  ;;  %v15065_v50 = vpop.permute.xlu1 %5509 }
 0x6c0   : > { %v3951_v11 = vpop.f32.mrb[50].mxu1  ;;  %4469 = vadd.xlane.f32.xlu1 %v4468_v62  ;;  %v15074_v21 = vpop.permute.xlu0 %5205 }
 0x6c1   : > { %13617 = vpow2.f32 %v4435_v58  ;;  %v12848_v41 = vpop.f32.mrb[51].mxu1  ;;  %v15068_v44 = vadd.f32 %v3951_v11, %v14379_v61 }
 0x6c3   : > { %v15037_v17 = vpop.eup %13611  ;;  %v15070_v43 = vpop.permute.xlu1 %6125  ;;  %v4375_v16 = vsel %vm475_vm2, %v15068_v44, -inf }
 0x6c4   : > { %v4462_v55 = vsel %vm475_vm2, %v15037_v17, 0.0  ;;  %4370 = vmax.xlane.f32.xlu1 %v4369_v42  ;;  %v15083_v58 = vpop.permute.xlu0 %5661 }
 0x6c5   : > { %4463 = vadd.xlane.f32.xlu0 %v4462_v55 }
 0x6c7   : > { %v15043_v0 = vpop.eup %13613  ;;  %v15081_v39 = vpop.permute.xlu1 %6203 }
 0x6c8   : > { %v4107_v3 = vpop.f32.mrb[52].mxu1  ;;  %v4474_v52 = vsel %vm475_vm2, %v15043_v0, 0.0  ;;  %v15047_v59 = vpop.eup %13615 }
 0x6c9   : > { %4475 = vadd.xlane.f32.xlu0 %v4474_v52  ;;  %v12858_v54 = vpop.f32.mrb[53].mxu1  ;;  %v4486_v2 = vsel %vm475_vm2, %v15047_v59, 0.0  ;;  %v15077_v7 = vadd.f32 %v4107_v3, %v14379_v61  ;;  %v15089_v41 = vpop.permute.xlu0 %6123 }
 0x6cb   : > { %v15049_v19 = vpop.eup %13617  ;;  %v4381_v62 = vsel %vm475_vm2, %v15077_v7, -inf  ;;  %v15087_v11 = vpop.permute.xlu1 %6281 }
 0x6cc   : > { %v4263_v56 = vpop.f32.mrb[54].mxu1  ;;  %v4480_v20 = vsel %vm475_vm2, %v15049_v19, 0.0 }
 0x6cd   : > { %4481 = vadd.xlane.f32.xlu1 %v4480_v20  ;;  %4487 = vadd.xlane.f32.xlu0 %v4486_v2  ;;  %v12868_v14 = vpop.f32.mrb[55].mxu1  ;;  %v15093_v55 = vpop.permute.xlu0 %6201  ;;  %v15124_v22 = vadd.f32 %v4263_v56, %v14379_v61 }
 0x6cf   : > { %v15091_v42 = vpop.permute.xlu1 %6359  ;;  %v4387_v13 = vsel %vm475_vm2, %v15124_v22, -inf }
 0x6d1   : > { %v15099_v52 = vpop.permute.xlu0 %6279 }
 0x6d3   : > { %v15097_v3 = vpop.permute.xlu1 %6437 }
 0x6d5   : > { %v15107_v20 = vpop.permute.xlu0 %6357 }
 0x6d7   : > { %v15103_v54 = vpop.permute.xlu1 %6515 }
 0x6d9   : > { %v15113_v14 = vpop.permute.xlu0 %6435 }
 0x6db   : > { %v15111_v2 = vpop.permute.xlu1 %6593 }
 0x6de   : > { %7061 = vrot.lane.b32.xlu1 %v14254_v36, %s13948_s6 }
 0x6e2   : > { %7059 = vrot.lane.b32.xlu1 %v14254_v36, %s13949_s7 }
 0x6e3   : > { %6981 = vrot.lane.b32.xlu0 %v14246_v33, %s13949_s7 }
 0x6e6   : > { %7139 = vrot.lane.b32.xlu1 %v14252_v35, %s13948_s6 }
 0x702   : > { %4376 = vmax.xlane.f32.xlu0 %v4375_v16  ;;  %v15117_v16 = vpop.permute.xlu1 %6671 }
 0x706   : > { %v15079_v57 = vpop.f32.mrb[56].mxu0 }
 0x707   : > { %v12883_v45 = vpop.f32.mrb[57].mxu0 }
 0x708   : > { %v15119_v45 = vpop.permute.xlu0 %6513 }
 0x70a   : > { %4382 = vmax.xlane.f32.xlu1 %v4381_v62  ;;  %v15121_v62 = vpop.permute.xlu1 %6749 }
 0x70c   : > { %v15126_v12 = vpop.permute.xlu0 %6591 }
 0x70e   : > { %v15130_v51 = vpop.permute.xlu1 %6827 }
 0x710   : > { %v15132_v47 = vpop.permute.xlu0 %6669 }
 0x712   : > { %v15134_v18 = vpop.permute.xlu1 %6905 }
 0x714   : > { %v15136_v8 = vpop.permute.xlu0 %6747 }
 0x716   : > { %v15138_v49 = vpop.permute.xlu1 %6903 }
 0x718   : > { %7137 = vrot.lane.b32.xlu0 %v14252_v35, %s13949_s7  ;;  %v15140_v4 = vpop.permute.xlu0 %6825 }
 0x71a   : > { %v15142_v56 = vpop.permute.xlu1 %6983 }
 0x71b   : > { %7217 = vrot.lane.b32.xlu1 %v14260_v38, %s13948_s6 }
 0x71f   : > { %7215 = vrot.lane.b32.xlu1 %v14260_v38, %s13949_s7 }
 0x723   : > { %7295 = vrot.lane.b32.xlu1 %v14258_v37, %s13948_s6 }
 0x727   : > { %7293 = vrot.lane.b32.xlu1 %v14258_v37, %s13949_s7 }
 0x737   : > { %4388 = vmax.xlane.f32.xlu0 %v4387_v13 }
 0x749   : > { %v4365_v10 = vpop.xlane.xlu0 %4364 }
 0x74a   : > { %v4399_v63 = vsub.f32 %v15024_v53, %v4365_v10 }
 0x74c   : > { %v4421_v9 = vmul.f32 1.442695, %v4399_v63 }
 0x74d   : > { %v4470_v60 = vpop.xlane.xlu1 %4469 }
 0x74e   : > { %13619 = vpow2.f32 %v4421_v9 }
 0x751   : > { %v4371_v5 = vpop.xlane.xlu1 %4370 }
 0x752   : > { %v4464_v13 = vpop.xlane.xlu0 %4463  ;;  %v4401_v15 = vsub.f32 %v15033_v6, %v4371_v5 }
 0x753   : > { %13621 = vrcp.f32 %v4464_v13  ;;  %v4593_v46 = vpop.f32.mrb[56].mxu1 }
 0x754   : > { %v4425_v1 = vmul.f32 1.442695, %v4401_v15  ;;  %v12878_v37 = vpop.f32.mrb[57].mxu1  ;;  %13623 = vrcp.f32 %v4470_v60 }
 0x756   : > { %13625 = vpow2.f32 %v4425_v1  ;;  %v4476_v35 = vpop.xlane.xlu0 %4475 }
 0x757   : > { %v4745_v33 = vpop.f32.mrb[58].mxu1  ;;  %13627 = vrcp.f32 %v4476_v35  ;;  %v16335_v35 = vmov 0.0  }
 0x758   : > { %v15146_v61 = vpop.eup %13619  ;;  %v12888_v25 = vpop.f32.mrb[59].mxu1 }
 0x759   : > { %v4459_v63 = vsel %vm475_vm2, %v15146_v61, 0.0 }
 0x75a   : > { %v4482_v9 = vpop.xlane.xlu1 %4481  ;;  %4460 = vadd.xlane.f32.xlu1 %v4459_v63  ;;  %v4488_v37 = vpop.xlane.xlu0 %4487 }
 0x75b   : > { %v4897_v10 = vpop.f32.mrb[60].mxu1  ;;  %13629 = vrcp.f32 %v4482_v9 }
 0x75c   : > { %v4821_v53 = vpop.f32.mrb[58].mxu0  ;;  %v12898_v5 = vpop.f32.mrb[61].mxu1  ;;  %13631 = vrcp.f32 %v4488_v37 }
 0x75d   : > { %v13622_v6 = vpop.eup %13621  ;;  %v12893_v15 = vpop.f32.mrb[59].mxu0 }
 0x75e   : > { %v4512_v1 = vmul.f32 %v13622_v6, %v15037_v17  ;;  %v13624_v60 = vpop.eup %13623  ;;  %v15175_v6 = vld [vmem:[#allocation7 + $0x8] sm:$0xff] }
 0x75f   : > { %v4514_v17 = vmul.f32 %v13624_v60, %v15030_v40 }
 0x760   : > { %v15151_v13 = vpop.eup %13625  ;;  %v4973_v23 = vpop.f32.mrb[60].mxu0  ;;  %12912 = vmatmul.mubr.msk.f32.vlgmr.msra.gmra.mrb[62].mxu0 %vm475_vm2, %v4512_v1 }
 0x761   : > { %12920 = vmatpush3.msra.mxu0 %v15074_v21  ;;  %v12903_v25 = vpop.f32.mrb[61].mxu0  ;;  %12921 = vmatprep.mubr.msk.f32.mxu0 %vm13941_vm1, %v16335_v35  ;;  %v4465_v63 = vsel %vm475_vm2, %v15151_v13, 0.0  ;;  %v13628_v9 = vpop.eup %13627 }
 0x762   : > { %12929 = vmatprep.subr.mxu0 %v16335_v35  ;;  %4466 = vadd.xlane.f32.xlu0 %v4465_v63  ;;  %v4516_v21 = vmul.f32 %v13628_v9, %v15043_v0 }
 0x764   : > { %12922 = vmatmul.mubr.msk.f32.vlgmr.msra.gmra.mrb[64].mxu0 %vm475_vm2, %v4514_v17 }
 0x765   : > { %12930 = vmatpush3.msra.mxu0 %v15063_v48  ;;  %12931 = vmatprep.mubr.msk.f32.mxu0 %vm13941_vm1, %v16335_v35  ;;  %v13630_v5 = vpop.eup %13629 }
 0x766   : > { %12939 = vmatprep.subr.mxu0 %v16335_v35  ;;  %v4518_v40 = vmul.f32 %v13630_v5, %v15049_v19  ;;  %v13632_v48 = vpop.eup %13631 }
 0x767   : > { %v4520_v0 = vmul.f32 %v13632_v48, %v15047_v59 }
 0x768   : > { %12932 = vmatmul.mubr.msk.f32.vlgmr.msra.gmra.mrb[66].mxu0 %vm475_vm2, %v4516_v21 }
 0x769   : > { %12940 = vmatpush3.msra.mxu0 %v15065_v50  ;;  %12941 = vmatprep.mubr.msk.f32.mxu0 %vm13941_vm1, %v16335_v35 }
 0x76a   : > { %12949 = vmatprep.subr.mxu0 %v16335_v35 }
 0x76b   : > { %5129 = vrot.lane.b32.xlu1 %v14242_v32, %s13947_s30 }
 0x76c   : > { %12942 = vmatmul.mubr.msk.f32.vlgmr.msra.gmra.mrb[68].mxu0 %vm475_vm2, %v4518_v40 }
 0x76d   : > { %12950 = vmatpush3.msra.mxu0 %v15083_v58  ;;  %12951 = vmatprep.mubr.msk.f32.mxu0 %vm13941_vm1, %v16335_v35 }
 0x76e   : > { %12954 = vmatprep.subr.mxu0 %v15175_v6 }
 0x76f   : > { %7547 = vrot.lane.b32.xlu1 %v14219_v24, %s13950_s28 }
 0x770   : > { %12952 = vmatmul.mubr.msk.f32.vlgmr.msra.gmra.mrb[70].mxu0 %vm475_vm2, %v4520_v0 }
 0x771   : > { %12955 = vmatpush3.msra.mxu0 %v15175_v6  ;;  %12956 = vmatprep.mubr.msk.f32.mxu0 %vm475_vm2, %v4593_v46 }
 0x772   : > { %13006 = vmatprep.subr.mxu0 %v16335_v35 }
 0x773   : > { %7699 = vrot.lane.b32.xlu1 %v14224_v26, %s13950_s28 }
 0x774   : > { %12957 = vmatmul.mubr.msk.f32.vlgmr.msra.gmra.mrb[72].mxu0 %vm475_vm2, %v15079_v57 }
 0x775   : > { %12959 = vmatprep.mubr.msk.f32.mxu0 %vm475_vm2, %v4745_v33  ;;  %v6982_v33 = vpop.permute.xlu0 %6981 }
 0x777   : > { %7851 = vrot.lane.b32.xlu1 %v14230_v28, %s13950_s28 }
 0x778   : > { %13007 = vmatpush3.xpose.msk.msra.mxu0 %vm475_vm2, %v15070_v43 }
 0x779   : > { %12960 = vmatmul.mubr.msk.f32.gmra.mrb[74].mxu0 %vm475_vm2, %v4821_v53  ;;  %13011 = vmatprep.subr.mxu0 %v16335_v35 }
 0x77a   : > { %12962 = vmatprep.mubr.msk.f32.mxu0 %vm475_vm2, %v4897_v10 }
 0x77b   : > { %7927 = vrot.lane.b32.xlu1 %v14228_v27, %s13950_s28 }
 0x77d   : > { %12963 = vmatmul.mubr.msk.f32.gmra.mrb[76].mxu0 %vm475_vm2, %v4973_v23  ;;  %v7062_v23 = vpop.permute.xlu1 %7061 }
 0x77e   : > { %13008 = vmatprep.mubr.msk.f32.mxu0 %vm13941_vm1, %v16335_v35 }
 0x77f   : > { %8079 = vrot.lane.b32.xlu1 %v14234_v29, %s13950_s28 }
 0x781   : > { %13009 = vmatmul.mubr.msk.f32.vlgmr.msra.gmra.mrb[78].mxu0 %vm475_vm2, %v15089_v41  ;;  %v7060_v46 = vpop.permute.xlu1 %7059 }
 0x782   : > { %13012 = vmatpush3.xpose.msk.msra.mxu0 %vm475_vm2, %v15081_v39  ;;  %13013 = vmatprep.mubr.msk.f32.mxu0 %vm13941_vm1, %v16335_v35 }
 0x783   : > { %13016 = vmatprep.subr.mxu0 %v16335_v35  ;;  %8231 = vrot.lane.b32.xlu1 %v14240_v31, %s13950_s28 }
 0x785   : > { %13014 = vmatmul.mubr.msk.f32.vlgmr.msra.gmra.mrb[80].mxu0 %vm475_vm2, %v15093_v55  ;;  %v7140_v43 = vpop.permute.xlu1 %7139 }
 0x786   : > { %13017 = vmatpush3.xpose.msk.msra.mxu0 %vm475_vm2, %v15087_v11  ;;  %13018 = vmatprep.mubr.msk.f32.mxu0 %vm13941_vm1, %v16335_v35 }
 0x787   : > { %13021 = vmatprep.subr.mxu0 %v16335_v35 }
 0x789   : > { %13019 = vmatmul.mubr.msk.f32.vlgmr.msra.gmra.mrb[82].mxu0 %vm475_vm2, %v15099_v52  ;;  %v16336_v52 = vld [vmem:[#allocation12_spill] sm:$0xff] }
 0x78a   : > { %13022 = vmatpush3.xpose.msk.msra.mxu0 %vm475_vm2, %v15091_v42  ;;  %13023 = vmatprep.mubr.msk.f32.mxu0 %vm13941_vm1, %v16335_v35 }
 0x78b   : > { %13026 = vmatprep.subr.mxu0 %v16335_v35 }
 0x78d   : > { %13024 = vmatmul.mubr.msk.f32.vlgmr.msra.gmra.mrb[84].mxu0 %vm475_vm2, %v15107_v20 }
 0x78e   : > { %13027 = vmatpush3.xpose.msk.msra.mxu0 %vm475_vm2, %v15097_v3  ;;  %13028 = vmatprep.mubr.msk.f32.mxu0 %vm13941_vm1, %v16335_v35 }
 0x78f   : > { %v4377_v59 = vpop.xlane.xlu0 %4376  ;;  %13031 = vmatprep.subr.mxu0 %v16335_v35 }
 0x790   : > { %v4403_v19 = vsub.f32 %v15068_v44, %v4377_v59 }
 0x791   : > { %13029 = vmatmul.mubr.msk.f32.vlgmr.msra.gmra.mrb[86].mxu0 %vm475_vm2, %v15113_v14 }
 0x792   : > { %v4429_v50 = vmul.f32 1.442695, %v4403_v19  ;;  %13032 = vmatpush3.xpose.msk.msra.mxu0 %vm475_vm2, %v15103_v54  ;;  %13033 = vmatprep.mubr.msk.f32.mxu0 %vm13941_vm1, %v16335_v35  ;;  %v16337_v54 = vld [vmem:[#allocation13_spill] sm:$0xff] }
 0x793   : > { %13036 = vmatprep.subr.mxu0 %v16335_v35 }
 0x794   : > { %13633 = vpow2.f32 %v4429_v50 }
 0x795   : > { %13034 = vmatmul.mubr.msk.f32.vlgmr.msra.gmra.mrb[88].mxu0 %vm475_vm2, %v15119_v45 }
 0x796   : > { %13037 = vmatpush3.xpose.msk.msra.mxu0 %vm475_vm2, %v15111_v2  ;;  %13038 = vmatprep.mubr.msk.f32.mxu0 %vm13941_vm1, %v16335_v35 }
 0x797   : > { %v4383_v44 = vpop.xlane.xlu1 %4382  ;;  %13041 = vmatprep.subr.mxu0 %v16335_v35 }
 0x798   : > { %v4405_v57 = vsub.f32 %v15077_v7, %v4383_v44 }
 0x799   : > { %13039 = vmatmul.mubr.msk.f32.vlgmr.msra.gmra.mrb[90].mxu0 %vm475_vm2, %v15126_v12 }
 0x79a   : > { %v4433_v39 = vmul.f32 1.442695, %v4405_v57  ;;  %13042 = vmatpush3.xpose.msk.msra.mxu0 %vm475_vm2, %v15117_v16  ;;  %13043 = vmatprep.mubr.msk.f32.mxu0 %vm13941_vm1, %v16335_v35  ;;  %v16342_v57 = vld [vmem:[#allocation17_spill] sm:$0xff] }
 0x79b   : > { %13046 = vmatprep.subr.mxu0 %v16335_v35 }
 0x79c   : > { %13635 = vpow2.f32 %v4433_v39 }
 0x79d   : > { %13044 = vmatmul.mubr.msk.f32.vlgmr.msra.gmra.mrb[92].mxu0 %vm475_vm2, %v15132_v47 }
 0x79e   : > { %v15263_v58 = vpop.eup %13633  ;;  %13047 = vmatpush3.xpose.msk.msra.mxu0 %vm475_vm2, %v15121_v62  ;;  %13048 = vmatprep.mubr.msk.f32.mxu0 %vm13941_vm1, %v16335_v35 }
 0x79f   : > { %13051 = vmatprep.subr.mxu0 %v16335_v35  ;;  %v4471_v12 = vsel %vm475_vm2, %v15263_v58, 0.0 }
 0x7a0   : > { %4472 = vadd.xlane.f32.xlu0 %v4471_v12 }
 0x7a1   : > { %13049 = vmatmul.mubr.msk.f32.vlgmr.msra.gmra.mrb[94].mxu0 %vm475_vm2, %v15136_v8  ;;  %v7218_v8 = vpop.permute.xlu1 %7217 }
 0x7a2   : > { %13052 = vmatpush3.xpose.msk.msra.mxu0 %vm475_vm2, %v15130_v51  ;;  %13053 = vmatprep.mubr.msk.f32.mxu0 %vm13941_vm1, %v16335_v35 }
 0x7a3   : > { %13056 = vmatprep.subr.mxu0 %v16335_v35 }
 0x7a5   : > { %13054 = vmatmul.mubr.msk.f32.vlgmr.msra.gmra.mrb[96].mxu0 %vm475_vm2, %v15140_v4 }
 0x7a6   : > { %v15281_v47 = vpop.eup %13635  ;;  %13057 = vmatpush3.xpose.msk.msra.mxu0 %vm475_vm2, %v15134_v18  ;;  %13058 = vmatprep.mubr.msk.f32.mxu0 %vm13941_vm1, %v16335_v35  ;;  %v7216_v18 = vpop.permute.xlu1 %7215 }
 0x7a7   : > { %13061 = vmatprep.subr.mxu0 %v16335_v35  ;;  %v4477_v51 = vsel %vm475_vm2, %v15281_v47, 0.0 }
 0x7a8   : > { %4478 = vadd.xlane.f32.xlu0 %v4477_v51 }
 0x7a9   : > { %13059 = vmatmul.mubr.msk.f32.vlgmr.msra.gmra.mrb[98].mxu0 %vm475_vm2, %v15138_v49  ;;  %v7138_v49 = vpop.permute.xlu0 %7137 }
 0x7aa   : > { %13062 = vmatpush3.xpose.msk.msra.mxu0 %vm475_vm2, %v15142_v56  ;;  %13063 = vmatprep.mubr.msk.f32.mxu0 %vm13941_vm1, %v16335_v35  ;;  %v7296_v4 = vpop.permute.xlu1 %7295 }
 0x7ab   : > { %13066 = vmatprep.subr.mxu0 %v16335_v35 }
 0x7ad   : > { %13064 = vmatmul.mubr.msk.f32.vlgmr.msra.gmra.mrb[100].mxu0 %vm475_vm2, %v6982_v33 }
 0x7ae   : > { %13067 = vmatpush3.xpose.msk.msra.mxu0 %vm475_vm2, %v7062_v23  ;;  %13068 = vmatprep.mubr.msk.f32.mxu0 %vm13941_vm1, %v16335_v35  ;;  %v7294_v7 = vpop.permute.xlu1 %7293 }
 0x7af   : > { %13071 = vmatprep.subr.mxu0 %v16335_v35 }
 0x7b1   : > { %13069 = vmatmul.mubr.msk.f32.vlgmr.msra.gmra.mrb[102].mxu0 %vm475_vm2, %v7060_v46 }
 0x7b2   : > { %13072 = vmatpush3.xpose.msk.msra.mxu0 %vm475_vm2, %v7140_v43  ;;  %13073 = vmatprep.mubr.msk.f32.mxu0 %vm13941_vm1, %v16335_v35 }
 0x7b3   : > { %13076 = vmatprep.subr.mxu0 %v16335_v35 }
 0x7b5   : > { %13074 = vmatmul.mubr.msk.f32.vlgmr.msra.gmra.mrb[104].mxu0 %vm475_vm2, %v7138_v49 }
 0x7b6   : > { %13077 = vmatpush3.xpose.msk.msra.mxu0 %vm475_vm2, %v7218_v8  ;;  %13078 = vmatprep.mubr.msk.f32.mxu0 %vm13941_vm1, %v16335_v35 }
 0x7b7   : > { %13081 = vmatprep.subr.mxu0 %v16335_v35 }
 0x7b9   : > { %13079 = vmatmul.mubr.msk.f32.vlgmr.msra.gmra.mrb[106].mxu0 %vm475_vm2, %v7216_v18 }
 0x7ba   : > { %13082 = vmatpush3.xpose.msk.msra.mxu0 %vm475_vm2, %v7296_v4  ;;  %13083 = vmatprep.mubr.msk.f32.mxu0 %vm13941_vm1, %v16335_v35 }
 0x7bb   : > { %13091 = vmatprep.subr.mxu0 %v16335_v35 }
 0x7bd   : > { %13084 = vmatmul.mubr.msk.f32.vlgmr.msra.gmra.mrb[108].mxu0 %vm475_vm2, %v7294_v7 }
 0x7be   : > { %4977 = vrot.lane.b32.xlu0 %v14236_v30, %s13947_s30  ;;  %13093 = vmatprep.mubr.msk.f32.mxu0 %vm13941_vm1, %v16335_v35 }
 0x7c2   : > { %5281 = vrot.lane.b32.xlu0 %v14248_v34, %s13947_s30 }
 0x7c4   : > { %v4389_v11 = vpop.xlane.xlu0 %4388 }
 0x7c5   : > { %v4407_v41 = vsub.f32 %v15124_v22, %v4389_v11 }
 0x7c6   : > { %5433 = vrot.lane.b32.xlu0 %v14254_v36, %s13947_s30 }
 0x7c7   : > { %v4437_v42 = vmul.f32 1.442695, %v4407_v41 }
 0x7c9   : > { %13637 = vpow2.f32 %v4437_v42 }
 0x7d3   : > { %v15327_v55 = vpop.eup %13637 }
 0x7d4   : > { %v4483_v3 = vsel %vm475_vm2, %v15327_v55, 0.0 }
 0x7e5   : > { %4484 = vadd.xlane.f32.xlu0 %v4483_v3 }
 0x7e7   : > { %v4461_v22 = vpop.xlane.xlu1 %4460 }
 0x7e8   : > { %13639 = vrcp.f32 %v4461_v22 }
 0x7eb   : > { %v5130_v1 = vpop.permute.xlu1 %5129 }
 0x7ef   : > { %v4467_v20 = vpop.xlane.xlu0 %4466 }
 0x7f0   : > { %13641 = vrcp.f32 %v4467_v20 }
 0x7f2   : > { %v13640_v62 = vpop.eup %13639 }
 0x7f3   : > { %v4511_v15 = vmul.f32 %v13640_v62, %v15146_v61 }
 0x7fa   : > { %v13642_v37 = vpop.eup %13641 }
 0x7fb   : > { %5585 = vrot.lane.b32.xlu0 %v14260_v38, %s13947_s30  ;;  %v4513_v17 = vmul.f32 %v13642_v37, %v15151_v13  ;;  %s13954_s30 = smov [#allocation8]  }
 0x7fc   : > { %s13867_s6 = sshll.u32 %s13954_s30, 4  ;;  %s13868_s6 = int_to_ptr.vmem [resolvable:$false] %s13867_s6 }
 0x7fd   : > { %s13869_s7 = scalar_lea.vmem %s13868_s6, 4096  ;;  %p13870_p7 = scmp.lt.s32.totalorder %s16233_s25, %s13868_s6 }
 0x7fe   : > { %p13871_p9 = scmp.lt.s32.totalorder %s13869_s7, %s13863_s12 }
 0x7ff   : > { %7623 = vrot.lane.b32.xlu0 %v16336_v52, %s13950_s28 }
 0x800   : > { %p13872_p12 = por %p13871_p9, %p13870_p7 }
 0x802   : > { %p13873_p1 = pnand %p13872_p12, %p13866_p3 }
 0x803   : > { %7775 = vrot.lane.b32.xlu0 %v16337_v54, %s13950_s28 }
 0x807   : > { %8003 = vrot.lane.b32.xlu0 %v14236_v30, %s13950_s28 }
 0x80b   : > { %8155 = vrot.lane.b32.xlu0 %v14242_v32, %s13950_s28 }
 0x82d   : > { %v4473_v2 = vpop.xlane.xlu0 %4472 }
 0x82e   : > { %13643 = vrcp.f32 %v4473_v2 }
 0x833   : > { %v15341_v14 = vpop.f32.mrb[62].mxu0 }
 0x834   : > { %v12913_v16 = vpop.f32.mrb[63].mxu0 }
 0x835   : > { %v4479_v45 = vpop.xlane.xlu0 %4478 }
 0x836   : > { %13645 = vrcp.f32 %v4479_v45 }
 0x837   : > { %v15343_v56 = vpop.f32.mrb[64].mxu0 }
 0x838   : > { %v12923_v10 = vpop.f32.mrb[65].mxu0  ;;  %v13644_v61 = vpop.eup %13643 }
 0x839   : > { %v4978_v53 = vpop.permute.xlu0 %4977  ;;  %v4515_v40 = vmul.f32 %v13644_v61, %v15263_v58 }
 0x83a   : > { %12905 = vmatpush3.msra.mxu1 %v4978_v53 }
 0x83b   : > { %12907 = vmatmul.mubr.msk.f32.vlgmr.msra.gmra.mrb[62].mxu1 %vm475_vm2, %v4511_v15  ;;  %12914 = vmatprep.subr.mxu1 %v16335_v35  ;;  %v15348_v60 = vpop.f32.mrb[66].mxu0 }
 0x83c   : > { %12915 = vmatpush3.msra.mxu1 %v5130_v1  ;;  %v12933_v25 = vpop.f32.mrb[67].mxu0  ;;  %12916 = vmatprep.mubr.msk.f32.mxu1 %vm13941_vm1, %v16335_v35 }
 0x83d   : > { %v5282_v63 = vpop.permute.xlu0 %5281  ;;  %12924 = vmatprep.subr.mxu1 %v16335_v35 }
 0x83f   : > { %12917 = vmatmul.mubr.msk.f32.vlgmr.msra.gmra.mrb[64].mxu1 %vm475_vm2, %v4513_v17  ;;  %v15355_v9 = vpop.f32.mrb[68].mxu0 }
 0x840   : > { %12925 = vmatpush3.msra.mxu1 %v5282_v63  ;;  %v12943_v21 = vpop.f32.mrb[69].mxu0  ;;  %12926 = vmatprep.mubr.msk.f32.mxu1 %vm13941_vm1, %v16335_v35  ;;  %v13646_v48 = vpop.eup %13645 }
 0x841   : > { %v5434_v5 = vpop.permute.xlu0 %5433  ;;  %12934 = vmatprep.subr.mxu1 %v16335_v35  ;;  %v4517_v23 = vmul.f32 %v13646_v48, %v15281_v47 }
 0x843   : > { %12927 = vmatmul.mubr.msk.f32.vlgmr.msra.gmra.mrb[66].mxu1 %vm475_vm2, %v4515_v40  ;;  %v15362_v0 = vpop.f32.mrb[70].mxu0 }
 0x844   : > { %12935 = vmatpush3.msra.mxu1 %v5434_v5  ;;  %v12953_v13 = vpop.f32.mrb[71].mxu0  ;;  %12936 = vmatprep.mubr.msk.f32.mxu1 %vm13941_vm1, %v16335_v35 }
 0x845   : > { %12944 = vmatprep.subr.mxu1 %v16335_v35 }
 0x847   : > { %12937 = vmatmul.mubr.msk.f32.vlgmr.msra.gmra.mrb[68].mxu1 %vm475_vm2, %v4517_v23  ;;  %v15369_v33 = vpop.f32.mrb[72].mxu0 }
 0x848   : > { %v15371_v46 = vpop.f32.mrb[73].mxu0  ;;  %12946 = vmatprep.mubr.msk.f32.mxu1 %vm13941_vm1, %v16335_v35 }
 0x84c   : > { %v15375_v59 = vpop.f32.mrb[74].mxu0 }
 0x84d   : > { %16338 = vst [vmem:[#allocation12_spill] sm:$0xff] %v15375_v59  ;;  %v15377_v19 = vpop.f32.mrb[75].mxu0 }
 0x84e   : > { %16339 = vst [vmem:[#allocation13_spill] sm:$0xff] %v15377_v19 }
 0x850   : > { %v15379_v50 = vpop.f32.mrb[76].mxu0 }
 0x851   : > { %16340 = vst [vmem:[#allocation34_spill] sm:$0xff] %v15379_v50  ;;  %v15381_v43 = vpop.f32.mrb[77].mxu0 }
 0x852   : > { %16341 = vst [vmem:[#allocation35_spill] sm:$0xff] %v15381_v43 }
 0x854   : > { %v6197_v44 = vpop.f32.mrb[78].mxu0 }
 0x855   : > { %v15384_v39 = vadd.f32 %v6197_v44, %v16342_v57  ;;  %v13010_v58 = vpop.f32.mrb[79].mxu0 }
 0x857   : > { %v7371_v12 = vsel %vm475_vm2, %v15384_v39, -inf }
 0x858   : > { %7372 = vmax.xlane.f32.xlu0 %v7371_v12  ;;  %v6275_v47 = vpop.f32.mrb[80].mxu0 }
 0x859   : > { %v15389_v51 = vadd.f32 %v6275_v47, %v16342_v57  ;;  %v13015_v8 = vpop.f32.mrb[81].mxu0 }
 0x85b   : > { %v7374_v18 = vsel %vm475_vm2, %v15389_v51, -inf }
 0x85c   : > { %7375 = vmax.xlane.f32.xlu1 %v7374_v18  ;;  %v6353_v49 = vpop.f32.mrb[82].mxu0 }
 0x85d   : > { %v15394_v4 = vadd.f32 %v6353_v49, %v16342_v57  ;;  %v13020_v7 = vpop.f32.mrb[83].mxu0 }
 0x85f   : > { %v7377_v11 = vsel %vm475_vm2, %v15394_v4, -inf }
 0x860   : > { %7378 = vmax.xlane.f32.xlu0 %v7377_v11  ;;  %v6431_v41 = vpop.f32.mrb[84].mxu0 }
 0x861   : > { %v15399_v42 = vadd.f32 %v6431_v41, %v16342_v57  ;;  %v13025_v3 = vpop.f32.mrb[85].mxu0 }
 0x863   : > { %v7380_v22 = vsel %vm475_vm2, %v15399_v42, -inf }
 0x864   : > { %7381 = vmax.xlane.f32.xlu0 %v7380_v22  ;;  %v6509_v20 = vpop.f32.mrb[86].mxu0 }
 0x865   : > { %v15404_v2 = vadd.f32 %v6509_v20, %v16342_v57  ;;  %v13030_v16 = vpop.f32.mrb[87].mxu0 }
 0x867   : > { %v7383_v45 = vsel %vm475_vm2, %v15404_v2, -inf }
 0x868   : > { %7384 = vmax.xlane.f32.xlu1 %v7383_v45  ;;  %v6587_v62 = vpop.f32.mrb[88].mxu0 }
 0x869   : > { %v15409_v10 = vadd.f32 %v6587_v62, %v16342_v57  ;;  %v13035_v53 = vpop.f32.mrb[89].mxu0 }
 0x86b   : > { %v7386_v15 = vsel %vm475_vm2, %v15409_v10, -inf }
 0x86c   : > { %7387 = vmax.xlane.f32.xlu0 %v7386_v15  ;;  %v6665_v37 = vpop.f32.mrb[90].mxu0 }
 0x86d   : > { %v15414_v1 = vadd.f32 %v6665_v37, %v16342_v57  ;;  %v13040_v25 = vpop.f32.mrb[91].mxu0 }
 0x86f   : > { %v7389_v63 = vsel %vm475_vm2, %v15414_v1, -inf }
 0x870   : > { %7390 = vmax.xlane.f32.xlu1 %v7389_v63  ;;  %v6743_v17 = vpop.f32.mrb[92].mxu0 }
 0x871   : > { %v15419_v61 = vadd.f32 %v6743_v17, %v16342_v57  ;;  %v13045_v21 = vpop.f32.mrb[93].mxu0 }
 0x872   : > { %v4485_v5 = vpop.xlane.xlu0 %4484 }
 0x873   : > { %13647 = vrcp.f32 %v4485_v5  ;;  %v7392_v40 = vsel %vm475_vm2, %v15419_v61, -inf }
 0x874   : > { %7393 = vmax.xlane.f32.xlu0 %v7392_v40  ;;  %v6821_v48 = vpop.f32.mrb[94].mxu0 }
 0x875   : > { %v15424_v13 = vadd.f32 %v6821_v48, %v16342_v57  ;;  %v13050_v23 = vpop.f32.mrb[95].mxu0 }
 0x876   : > { %v5586_v44 = vpop.permute.xlu0 %5585 }
 0x877   : > { %12945 = vmatpush3.msra.mxu1 %v5586_v44  ;;  %v7395_v58 = vsel %vm475_vm2, %v15424_v13, -inf }
 0x878   : > { %7396 = vmax.xlane.f32.xlu1 %v7395_v58  ;;  %v6899_v12 = vpop.f32.mrb[96].mxu0  ;;  %13386 = vmatprep.subr.mxu1 %v15175_v6 }
 0x879   : > { %v15430_v47 = vadd.f32 %v6899_v12, %v16342_v57  ;;  %v13055_v8 = vpop.f32.mrb[97].mxu0 }
 0x87a   : > { %v7624_v18 = vpop.permute.xlu0 %7623 }
 0x87b   : > { %13092 = vmatpush3.msra.mxu0 %v7624_v18  ;;  %v7398_v49 = vsel %vm475_vm2, %v15430_v47, -inf  ;;  %v16343_v18 = vld [vmem:[#allocation14_spill] sm:$0xff] }
 0x87c   : > { %7399 = vmax.xlane.f32.xlu0 %v7398_v49  ;;  %v6977_v7 = vpop.f32.mrb[98].mxu0  ;;  %13101 = vmatprep.subr.mxu0 %v16335_v35  ;;  %v16344_v49 = vld [vmem:[#allocation15_spill] sm:$0xff] }
 0x87d   : > { %v13648_v11 = vpop.eup %13647  ;;  %v15436_v41 = vadd.f32 %v6977_v7, %v16342_v57  ;;  %v13060_v3 = vpop.f32.mrb[99].mxu0 }
 0x87e   : > { %v4519_v22 = vmul.f32 %v13648_v11, %v15327_v55  ;;  %v15476_v7 = vpop.permute.xlu1 %7547 }
 0x87f   : > { %v7401_v20 = vsel %vm475_vm2, %v15436_v41, -inf }
 0x880   : > { %7402 = vmax.xlane.f32.xlu1 %v7401_v20  ;;  %v7055_v16 = vpop.f32.mrb[100].mxu0  ;;  %12947 = vmatmul.mubr.msk.f32.vlgmr.msra.gmra.mrb[70].mxu1 %vm475_vm2, %v4519_v22  ;;  %v15482_v22 = vpop.permute.xlu0 %7775  ;;  %v15484_v20 = vld [vmem:[#allocation7] sm:$0xff] }
 0x881   : > { %v15443_v45 = vadd.f32 %v7055_v16, %v16342_v57  ;;  %v13065_v62 = vpop.f32.mrb[101].mxu0  ;;  %13387 = vmatpush3.msra.mxu1 %v15175_v6 }
 0x882   : > { %v15478_v11 = vpop.permute.xlu1 %7699  ;;  %12980 = vmatprep.subr.mxu1 %v15484_v20 }
 0x883   : > { %v7404_v53 = vsel %vm475_vm2, %v15443_v45, -inf }
 0x884   : > { %7405 = vmax.xlane.f32.xlu0 %v7404_v53  ;;  %v7133_v15 = vpop.f32.mrb[102].mxu0  ;;  %v15489_v62 = vpop.permute.xlu0 %8003 }
 0x885   : > { %v15449_v55 = vadd.f32 %v7133_v15, %v16342_v57  ;;  %v13070_v37 = vpop.f32.mrb[103].mxu0 }
 0x886   : > { %v15480_v3 = vpop.permute.xlu1 %7851 }
 0x887   : > { %v7407_v25 = vsel %vm475_vm2, %v15449_v55, -inf }
 0x888   : > { %7408 = vmax.xlane.f32.xlu1 %v7407_v25  ;;  %v7211_v63 = vpop.f32.mrb[104].mxu0  ;;  %v15493_v15 = vpop.permute.xlu0 %8155 }
 0x889   : > { %v15454_v17 = vadd.f32 %v7211_v63, %v16342_v57  ;;  %v13075_v21 = vpop.f32.mrb[105].mxu0 }
 0x88a   : > { %v15487_v16 = vpop.permute.xlu1 %7927 }
 0x88b   : > { %v7410_v6 = vsel %vm475_vm2, %v15454_v17, -inf }
 0x88c   : > { %7411 = vmax.xlane.f32.xlu0 %v7410_v6  ;;  %v7289_v5 = vpop.f32.mrb[106].mxu0 }
 0x88d   : > { %v15459_v40 = vadd.f32 %v7289_v5, %v16342_v57  ;;  %v13080_v48 = vpop.f32.mrb[107].mxu0 }
 0x88e   : > { %v15491_v53 = vpop.permute.xlu1 %8079 }
 0x88f   : > { %v7413_v23 = vsel %vm475_vm2, %v15459_v40, -inf }
 0x890   : > { %7414 = vmax.xlane.f32.xlu1 %v7413_v23  ;;  %v7367_v44 = vpop.f32.mrb[108].mxu0 }
 0x891   : > { %v15464_v58 = vadd.f32 %v7367_v44, %v16342_v57  ;;  %v13085_v12 = vpop.f32.mrb[109].mxu0 }
 0x892   : > { %v15495_v37 = vpop.permute.xlu1 %8231 }
 0x893   : > { %v7416_v8 = vsel %vm475_vm2, %v15464_v58, -inf }
 0x894   : > { %7417 = vmax.xlane.f32.xlu0 %v7416_v8 }
 0x8a1   : > { %8383 = vrot.lane.b32.xlu1 %v16343_v18, %s13950_s28 }
 0x8a5   : > { %8535 = vrot.lane.b32.xlu1 %v16344_v49, %s13950_s28 }
 0x8aa   : > { %8307 = vrot.lane.b32.xlu0 %v14248_v34, %s13950_s28 }
 0x8ae   : > { %8459 = vrot.lane.b32.xlu0 %v14254_v36, %s13950_s28 }
 0x8e5   : > { %v7373_v25 = vpop.xlane.xlu0 %7372 }
 0x8e6   : > { %v7419_v63 = vsub.f32 %v15384_v39, %v7373_v25 }
 0x8e8   : > { %v7435_v21 = vmul.f32 1.442695, %v7419_v63 }
 0x8e9   : > { %v7376_v6 = vpop.xlane.xlu1 %7375 }
 0x8ea   : > { %13649 = vpow2.f32 %v7435_v21  ;;  %v7420_v5 = vsub.f32 %v15389_v51, %v7376_v6 }
 0x8ec   : > { %v7437_v48 = vmul.f32 1.442695, %v7420_v5 }
 0x8ed   : > { %v7379_v23 = vpop.xlane.xlu0 %7378 }
 0x8ee   : > { %13651 = vpow2.f32 %v7437_v48  ;;  %v7421_v44 = vsub.f32 %v15394_v4, %v7379_v23 }
 0x8f0   : > { %v7439_v12 = vmul.f32 1.442695, %v7421_v44 }
 0x8f1   : > { %v7382_v8 = vpop.xlane.xlu0 %7381 }
 0x8f2   : > { %13653 = vpow2.f32 %v7439_v12  ;;  %v7422_v43 = vsub.f32 %v15399_v42, %v7382_v8 }
 0x8f4   : > { %v15501_v50 = vpop.eup %13649  ;;  %v7441_v19 = vmul.f32 1.442695, %v7422_v43 }
 0x8f5   : > { %v7385_v59 = vpop.xlane.xlu1 %7384  ;;  %v7467_v39 = vsel %vm475_vm2, %v15501_v50, 0.0 }
 0x8f6   : > { %13655 = vpow2.f32 %v7441_v19  ;;  %v7423_v51 = vsub.f32 %v15404_v2, %v7385_v59  ;;  %7468 = vadd.xlane.f32.xlu1 %v7467_v39 }
 0x8f8   : > { %v15506_v25 = vpop.eup %13651  ;;  %v7443_v63 = vmul.f32 1.442695, %v7423_v51 }
 0x8f9   : > { %v7388_v4 = vpop.xlane.xlu0 %7387  ;;  %v7470_v21 = vsel %vm475_vm2, %v15506_v25, 0.0 }
 0x8fa   : > { %13657 = vpow2.f32 %v7443_v63  ;;  %v7424_v42 = vsub.f32 %v15409_v10, %v7388_v4  ;;  %7471 = vadd.xlane.f32.xlu0 %v7470_v21 }
 0x8fc   : > { %v15511_v43 = vpop.eup %13653  ;;  %v7445_v6 = vmul.f32 1.442695, %v7424_v42 }
 0x8fd   : > { %v7391_v5 = vpop.xlane.xlu1 %7390  ;;  %v7473_v19 = vsel %vm475_vm2, %v15511_v43, 0.0 }
 0x8fe   : > { %13659 = vpow2.f32 %v7445_v6  ;;  %v7425_v59 = vsub.f32 %v15414_v1, %v7391_v5  ;;  %7474 = vadd.xlane.f32.xlu1 %v7473_v19 }
 0x900   : > { %v15516_v2 = vpop.eup %13655  ;;  %v7447_v48 = vmul.f32 1.442695, %v7425_v59 }
 0x901   : > { %v7394_v23 = vpop.xlane.xlu0 %7393  ;;  %v7476_v44 = vsel %vm475_vm2, %v15516_v2, 0.0 }
 0x902   : > { %13661 = vpow2.f32 %v7447_v48  ;;  %v7426_v10 = vsub.f32 %v15419_v61, %v7394_v23  ;;  %7477 = vadd.xlane.f32.xlu0 %v7476_v44 }
 0x904   : > { %v15521_v12 = vpop.eup %13657  ;;  %v7449_v8 = vmul.f32 1.442695, %v7426_v10 }
 0x905   : > { %v7397_v39 = vpop.xlane.xlu1 %7396  ;;  %v7479_v51 = vsel %vm475_vm2, %v15521_v12, 0.0 }
 0x906   : > { %13663 = vpow2.f32 %v7449_v8  ;;  %v7427_v1 = vsub.f32 %v15424_v13, %v7397_v39  ;;  %7480 = vadd.xlane.f32.xlu1 %v7479_v51 }
 0x908   : > { %v15526_v63 = vpop.eup %13659  ;;  %v7451_v4 = vmul.f32 1.442695, %v7427_v1 }
 0x909   : > { %v7400_v21 = vpop.xlane.xlu0 %7399  ;;  %v7482_v42 = vsel %vm475_vm2, %v15526_v63, 0.0 }
 0x90a   : > { %13665 = vpow2.f32 %v7451_v4  ;;  %v7428_v61 = vsub.f32 %v15430_v47, %v7400_v21  ;;  %7483 = vadd.xlane.f32.xlu0 %v7482_v42 }
 0x90c   : > { %v15531_v6 = vpop.eup %13661  ;;  %v7453_v5 = vmul.f32 1.442695, %v7428_v61 }
 0x90d   : > { %v7403_v19 = vpop.xlane.xlu1 %7402  ;;  %v7485_v59 = vsel %vm475_vm2, %v15531_v6, 0.0 }
 0x90e   : > { %13667 = vpow2.f32 %v7453_v5  ;;  %v7429_v13 = vsub.f32 %v15436_v41, %v7403_v19  ;;  %7486 = vadd.xlane.f32.xlu1 %v7485_v59  ;;  %v5049_v48 = vpop.f32.mrb[62].mxu1 }
 0x90f   : > { %v12908_v23 = vpop.f32.mrb[63].mxu1  ;;  %12965 = vmatprep.mubr.msk.f32.mxu1 %vm475_vm2, %v5049_v48 }
 0x910   : > { %v15537_v44 = vpop.eup %13663  ;;  %v7455_v10 = vmul.f32 1.442695, %v7429_v13  ;;  %12966 = vmatmul.mubr.msk.f32.vlgmr.msra.gmra.mrb[72].mxu1 %vm475_vm2, %v15341_v14 }
 0x911   : > { %v7406_v47 = vpop.xlane.xlu0 %7405  ;;  %v7488_v8 = vsel %vm475_vm2, %v15537_v44, 0.0  ;;  %12981 = vmatpush3.msra.mxu1 %v15484_v20 }
 0x912   : > { %13669 = vpow2.f32 %v7455_v10  ;;  %v7430_v41 = vsub.f32 %v15443_v45, %v7406_v47  ;;  %7489 = vadd.xlane.f32.xlu0 %v7488_v8  ;;  %v5201_v39 = vpop.f32.mrb[64].mxu1  ;;  %13086 = vmatprep.subr.mxu1 %v16335_v35 }
 0x913   : > { %v12918_v51 = vpop.f32.mrb[65].mxu1  ;;  %12968 = vmatprep.mubr.msk.f32.mxu1 %vm475_vm2, %v5201_v39 }
 0x914   : > { %v15547_v1 = vpop.eup %13665  ;;  %v7457_v4 = vmul.f32 1.442695, %v7430_v41  ;;  %12969 = vmatmul.mubr.msk.f32.gmra.mrb[74].mxu1 %vm475_vm2, %v15343_v56 }
 0x915   : > { %v7409_v14 = vpop.xlane.xlu1 %7408  ;;  %v7491_v20 = vsel %vm475_vm2, %v15547_v1, 0.0 }
 0x916   : > { %13671 = vpow2.f32 %v7457_v4  ;;  %v7431_v45 = vsub.f32 %v15449_v55, %v7409_v14  ;;  %7492 = vadd.xlane.f32.xlu1 %v7491_v20  ;;  %v5353_v21 = vpop.f32.mrb[66].mxu1 }
 0x917   : > { %v12928_v42 = vpop.f32.mrb[67].mxu1  ;;  %12971 = vmatprep.mubr.msk.f32.mxu1 %vm475_vm2, %v5353_v21 }
 0x918   : > { %v15555_v61 = vpop.eup %13667  ;;  %v7459_v5 = vmul.f32 1.442695, %v7431_v45  ;;  %12972 = vmatmul.mubr.msk.f32.gmra.mrb[76].mxu1 %vm475_vm2, %v15348_v60 }
 0x919   : > { %v7412_v19 = vpop.xlane.xlu0 %7411  ;;  %v7494_v56 = vsel %vm475_vm2, %v15555_v61, 0.0 }
 0x91a   : > { %13673 = vpow2.f32 %v7459_v5  ;;  %v7432_v59 = vsub.f32 %v15454_v17, %v7412_v19  ;;  %7495 = vadd.xlane.f32.xlu0 %v7494_v56  ;;  %v5505_v55 = vpop.f32.mrb[68].mxu1  ;;  %v16345_v5 = vld [vmem:[#allocation16_spill] sm:$0xff] }
 0x91b   : > { %v12938_v13 = vpop.f32.mrb[69].mxu1  ;;  %12974 = vmatprep.mubr.msk.f32.mxu1 %vm475_vm2, %v5505_v55  ;;  %v16347_v55 = vld [vmem:[#allocation19_spill] sm:$0xff] }
 0x91c   : > { %v15563_v48 = vpop.eup %13669  ;;  %v7461_v23 = vmul.f32 1.442695, %v7432_v59  ;;  %12975 = vmatmul.mubr.msk.f32.gmra.mrb[78].mxu1 %vm475_vm2, %v15355_v9  ;;  %v16346_v59 = vld [vmem:[#allocation18_spill] sm:$0xff]  ;;  %v16348_v13 = vld [vmem:[#allocation20_spill] sm:$0xff] }
 0x91d   : > { %v7415_v10 = vpop.xlane.xlu1 %7414  ;;  %v7497_v60 = vsel %vm475_vm2, %v15563_v48, 0.0 }
 0x91e   : > { %13675 = vpow2.f32 %v7461_v23  ;;  %v7433_v47 = vsub.f32 %v15459_v40, %v7415_v10  ;;  %7498 = vadd.xlane.f32.xlu1 %v7497_v60  ;;  %v16350_v23 = vld [vmem:[#allocation22_spill] sm:$0xff]  ;;  %v16352_v10 = vld [vmem:[#allocation23_spill] sm:$0xff]  ;;  %v16353_v60 = vld [vmem:[#allocation25_spill] sm:$0xff] }
 0x920   : > { %v15570_v17 = vpop.eup %13671  ;;  %v7463_v8 = vmul.f32 1.442695, %v7433_v47  ;;  %v16354_v47 = vld [vmem:[#allocation30_spill] sm:$0xff] }
 0x921   : > { %v7418_v41 = vpop.xlane.xlu0 %7417  ;;  %v7500_v39 = vsel %vm475_vm2, %v15570_v17, 0.0 }
 0x922   : > { %13677 = vpow2.f32 %v7463_v8  ;;  %v7434_v51 = vsub.f32 %v15464_v58, %v7418_v41  ;;  %7501 = vadd.xlane.f32.xlu0 %v7500_v39  ;;  %v16355_v8 = vld [vmem:[#allocation26_spill] sm:$0xff]  ;;  %v16356_v41 = vld [vmem:[#allocation31_spill] sm:$0xff] }
 0x923   : > { %v16357_v39 = vld [vmem:[#allocation27_spill] sm:$0xff] }
 0x924   : > { %v15575_v9 = vpop.eup %13673  ;;  %v7465_v4 = vmul.f32 1.442695, %v7434_v51  ;;  %v16358_v51 = vld [vmem:[#allocation32_spill] sm:$0xff] }
 0x925   : > { %v7503_v14 = vsel %vm475_vm2, %v15575_v9, 0.0 }
 0x926   : > { %13679 = vpow2.f32 %v7465_v4  ;;  %7504 = vadd.xlane.f32.xlu1 %v7503_v14  ;;  %v16359_v4 = vld [vmem:[#allocation28_spill] sm:$0xff]  ;;  %v16360_v14 = vld [vmem:[#allocation33_spill] sm:$0xff] }
 0x928   : > { %v15579_v40 = vpop.eup %13675 }
 0x929   : > { %v7506_v20 = vsel %vm475_vm2, %v15579_v40, 0.0 }
 0x92a   : > { %7507 = vadd.xlane.f32.xlu0 %v7506_v20  ;;  %v16361_v20 = vld [vmem:[#allocation29_spill] sm:$0xff] }
 0x92c   : > { %v15583_v45 = vpop.eup %13677 }
 0x92d   : > { %v7509_v58 = vsel %vm475_vm2, %v15583_v45, 0.0 }
 0x92e   : > { %7510 = vadd.xlane.f32.xlu1 %v7509_v58  ;;  %v15686_v58 = vpop.permute.xlu1 %8383 }
 0x930   : > { %v15587_v21 = vpop.eup %13679 }
 0x931   : > { %v7512_v42 = vsel %vm475_vm2, %v15587_v21, 0.0 }
 0x932   : > { %7513 = vadd.xlane.f32.xlu0 %v7512_v42  ;;  %v15692_v42 = vpop.permute.xlu0 %8307 }
 0x93f   : > { %8687 = vrot.lane.b32.xlu1 %v16345_v5, %s13950_s28 }
 0x943   : > { %8972 = vrot.lane.b32.xlu1 %v14219_v24, %s13951_s27 }
 0x947   : > { %9050 = vrot.lane.b32.xlu1 %v16336_v52, %s13951_s27 }
 0x948   : > { %8611 = vrot.lane.b32.xlu0 %v14260_v38, %s13950_s28 }
 0x94b   : > { %9128 = vrot.lane.b32.xlu1 %v14224_v26, %s13951_s27 }
 0x94c   : > { %8974 = vrot.lane.b32.xlu0 %v14219_v24, %s13952_s20 }
 0x94f   : > { %9206 = vrot.lane.b32.xlu1 %v16337_v54, %s13951_s27 }
 0x950   : > { %9052 = vrot.lane.b32.xlu0 %v16336_v52, %s13952_s20 }
 0x953   : > { %9284 = vrot.lane.b32.xlu1 %v14230_v28, %s13951_s27  ;;  %v5657_v19 = vpop.f32.mrb[70].mxu1 }
 0x954   : > { %9130 = vrot.lane.b32.xlu0 %v14224_v26, %s13952_s20  ;;  %v12948_v56 = vpop.f32.mrb[71].mxu1  ;;  %12977 = vmatprep.mubr.msk.f32.mxu1 %vm475_vm2, %v5657_v19  ;;  %v15694_v19 = vpop.permute.xlu1 %8535 }
 0x955   : > { %12978 = vmatmul.mubr.msk.f32.gmra.mrb[80].mxu1 %vm475_vm2, %v15362_v0  ;;  %v16349_v0 = vld [vmem:[#allocation21_spill] sm:$0xff]  ;;  %v15700_v56 = vpop.permute.xlu0 %8459 }
 0x956   : > { %12982 = vmatprep.mubr.msk.f32.mxu1 %vm475_vm2, %v16346_v59 }
 0x957   : > { %9362 = vrot.lane.b32.xlu1 %v14228_v27, %s13951_s27 }
 0x958   : > { %9208 = vrot.lane.b32.xlu0 %v16337_v54, %s13952_s20 }
 0x959   : > { %12983 = vmatmul.mubr.msk.f32.vlgmr.msra.gmra.mrb[82].mxu1 %vm475_vm2, %v16347_v55 }
 0x95a   : > { %13087 = vmatpush3.msra.mxu1 %v15476_v7  ;;  %12985 = vmatprep.mubr.msk.f32.mxu1 %vm475_vm2, %v16348_v13  ;;  %v16351_v7 = vld [vmem:[#allocation24_spill] sm:$0xff] }
 0x95b   : > { %9440 = vrot.lane.b32.xlu1 %v14236_v30, %s13951_s27  ;;  %13096 = vmatprep.subr.mxu1 %v16335_v35 }
 0x95c   : > { %9286 = vrot.lane.b32.xlu0 %v14230_v28, %s13952_s20 }
 0x95d   : > { %12986 = vmatmul.mubr.msk.f32.gmra.mrb[84].mxu1 %vm475_vm2, %v16349_v0 }
 0x95e   : > { %12988 = vmatprep.mubr.msk.f32.mxu1 %vm475_vm2, %v16350_v23 }
 0x95f   : > { %9518 = vrot.lane.b32.xlu1 %v14234_v29, %s13951_s27 }
 0x960   : > { %9364 = vrot.lane.b32.xlu0 %v14228_v27, %s13952_s20 }
 0x961   : > { %12989 = vmatmul.mubr.msk.f32.gmra.mrb[86].mxu1 %vm475_vm2, %v16351_v7 }
 0x962   : > { %12991 = vmatprep.mubr.msk.f32.mxu1 %vm475_vm2, %v16352_v10 }
 0x963   : > { %9676 = vrot.lane.b32.xlu1 %v14240_v31, %s13952_s20 }
 0x964   : > { %9442 = vrot.lane.b32.xlu0 %v14236_v30, %s13952_s20 }
 0x965   : > { %12992 = vmatmul.mubr.msk.f32.gmra.mrb[72].mxu1 %vm475_vm2, %v16353_v60 }
 0x966   : > { %12994 = vmatprep.mubr.msk.f32.mxu1 %vm475_vm2, %v16354_v47 }
 0x967   : > { %9674 = vrot.lane.b32.xlu1 %v14240_v31, %s13951_s27 }
 0x968   : > { %9520 = vrot.lane.b32.xlu0 %v14234_v29, %s13952_s20 }
 0x969   : > { %12995 = vmatmul.mubr.msk.f32.gmra.mrb[74].mxu1 %vm475_vm2, %v16355_v8 }
 0x96a   : > { %12997 = vmatprep.mubr.msk.f32.mxu1 %vm475_vm2, %v16356_v41 }
 0x96b   : > { %9832 = vrot.lane.b32.xlu1 %v16343_v18, %s13952_s20 }
 0x96c   : > { %9598 = vrot.lane.b32.xlu0 %v14242_v32, %s13952_s20 }
 0x96d   : > { %12998 = vmatmul.mubr.msk.f32.gmra.mrb[76].mxu1 %vm475_vm2, %v16357_v39 }
 0x96e   : > { %13000 = vmatprep.mubr.msk.f32.mxu1 %vm475_vm2, %v16358_v51 }
 0x96f   : > { %9830 = vrot.lane.b32.xlu1 %v16343_v18, %s13951_s27 }
 0x970   : > { %9596 = vrot.lane.b32.xlu0 %v14242_v32, %s13951_s27 }
 0x971   : > { %13001 = vmatmul.mubr.msk.f32.gmra.mrb[78].mxu1 %vm475_vm2, %v16359_v4 }
 0x972   : > { %13003 = vmatprep.mubr.msk.f32.mxu1 %vm475_vm2, %v16360_v14 }
 0x973   : > { %9988 = vrot.lane.b32.xlu1 %v16344_v49, %s13952_s20 }
 0x974   : > { %9754 = vrot.lane.b32.xlu0 %v14248_v34, %s13952_s20 }
 0x975   : > { %13004 = vmatmul.mubr.msk.f32.gmra.mrb[80].mxu1 %vm475_vm2, %v16361_v20 }
 0x976   : > { %13088 = vmatprep.mubr.msk.f32.mxu1 %vm13941_vm1, %v16335_v35 }
 0x977   : > { %9986 = vrot.lane.b32.xlu1 %v16344_v49, %s13951_s27 }
 0x978   : > { %9752 = vrot.lane.b32.xlu0 %v14248_v34, %s13951_s27 }
 0x97b   : > { %10144 = vrot.lane.b32.xlu1 %v16345_v5, %s13952_s20 }
 0x97c   : > { %9910 = vrot.lane.b32.xlu0 %v14254_v36, %s13952_s20 }
 0x97f   : > { %10142 = vrot.lane.b32.xlu1 %v16345_v5, %s13951_s27 }
 0x980   : > { %9908 = vrot.lane.b32.xlu0 %v14254_v36, %s13951_s27 }
 0x983   : > { %10396 = vrot.lane.b32.xlu1 %v14219_v24, %s13953_s29  ;;  %v7469_v59 = vpop.xlane.xlu1 %7468 }
 0x984   : > { %13681 = vrcp.f32 %v7469_v59  ;;  %10066 = vrot.lane.b32.xlu0 %v14260_v38, %s13952_s20 }
 0x987   : > { %10548 = vrot.lane.b32.xlu1 %v14224_v26, %s13953_s29  ;;  %v7472_v55 = vpop.xlane.xlu0 %7471 }
 0x988   : > { %13683 = vrcp.f32 %v7472_v55  ;;  %10064 = vrot.lane.b32.xlu0 %v14260_v38, %s13951_s27 }
 0x98b   : > { %v7475_v13 = vpop.xlane.xlu1 %7474 }
 0x98c   : > { %13685 = vrcp.f32 %v7475_v13  ;;  %10472 = vrot.lane.b32.xlu0 %v16336_v52, %s13953_s29  ;;  %v469_v13 = vld [vmem:[#allocation7 + $0x10] sm:$0xff] }
 0x98e   : > { %v13682_v0 = vpop.eup %13681 }
 0x98f   : > { %v7531_v24 = vmul.f32 %v13682_v0, %v15501_v50  ;;  %v7478_v23 = vpop.xlane.xlu0 %7477 }
 0x990   : > { %13687 = vrcp.f32 %v7478_v23 }
 0x991   : > { %13089 = vmatmul.mubr.msk.f32.vlgmr.msra.gmra.mrb[88].mxu1 %vm475_vm2, %v7531_v24 }
 0x992   : > { %v13684_v7 = vpop.eup %13683  ;;  %13097 = vmatpush3.msra.mxu1 %v15478_v11  ;;  %13098 = vmatprep.mubr.msk.f32.mxu1 %vm13941_vm1, %v16335_v35 }
 0x993   : > { %v7532_v26 = vmul.f32 %v13684_v7, %v15506_v25  ;;  %v7481_v10 = vpop.xlane.xlu1 %7480  ;;  %13106 = vmatprep.subr.mxu1 %v16335_v35 }
 0x994   : > { %13689 = vrcp.f32 %v7481_v10 }
 0x995   : > { %13094 = vmatmul.mubr.msk.f32.vlgmr.msra.gmra.mrb[110].mxu0 %vm475_vm2, %v7532_v26 }
 0x996   : > { %v13686_v52 = vpop.eup %13685  ;;  %13102 = vmatpush3.msra.mxu0 %v15482_v22  ;;  %13103 = vmatprep.mubr.msk.f32.mxu0 %vm13941_vm1, %v16335_v35 }
 0x997   : > { %v7533_v50 = vmul.f32 %v13686_v52, %v15511_v43  ;;  %v7484_v11 = vpop.xlane.xlu0 %7483  ;;  %13111 = vmatprep.subr.mxu0 %v16335_v35 }
 0x998   : > { %13691 = vrcp.f32 %v7484_v11 }
 0x999   : > { %13099 = vmatmul.mubr.msk.f32.vlgmr.msra.gmra.mrb[90].mxu1 %vm475_vm2, %v7533_v50 }
 0x99a   : > { %v13688_v25 = vpop.eup %13687  ;;  %13107 = vmatpush3.msra.mxu1 %v15480_v3  ;;  %13108 = vmatprep.mubr.msk.f32.mxu1 %vm13941_vm1, %v16335_v35 }
 0x99b   : > { %v7534_v60 = vmul.f32 %v13688_v25, %v15516_v2  ;;  %v7487_v22 = vpop.xlane.xlu1 %7486  ;;  %13116 = vmatprep.subr.mxu1 %v16335_v35 }
 0x99c   : > { %13693 = vrcp.f32 %v7487_v22 }
 0x99d   : > { %13104 = vmatmul.mubr.msk.f32.vlgmr.msra.gmra.mrb[112].mxu0 %vm475_vm2, %v7534_v60 }
 0x99e   : > { %v13690_v43 = vpop.eup %13689  ;;  %13112 = vmatpush3.msra.mxu0 %v15487_v16  ;;  %13113 = vmatprep.mubr.msk.f32.mxu0 %vm13941_vm1, %v16335_v35 }
 0x99f   : > { %v7535_v47 = vmul.f32 %v13690_v43, %v15521_v12  ;;  %v7490_v3 = vpop.xlane.xlu0 %7489  ;;  %13121 = vmatprep.subr.mxu0 %v16335_v35 }
 0x9a0   : > { %13695 = vrcp.f32 %v7490_v3 }
 0x9a1   : > { %13109 = vmatmul.mubr.msk.f32.vlgmr.msra.gmra.mrb[92].mxu1 %vm475_vm2, %v7535_v47 }
 0x9a2   : > { %v13692_v2 = vpop.eup %13691  ;;  %13117 = vmatpush3.msra.mxu1 %v15489_v62  ;;  %13118 = vmatprep.mubr.msk.f32.mxu1 %vm13941_vm1, %v16335_v35 }
 0x9a3   : > { %v7536_v8 = vmul.f32 %v13692_v2, %v15526_v63  ;;  %v7493_v16 = vpop.xlane.xlu1 %7492  ;;  %13126 = vmatprep.subr.mxu1 %v16335_v35 }
 0x9a4   : > { %13697 = vrcp.f32 %v7493_v16 }
 0x9a5   : > { %13114 = vmatmul.mubr.msk.f32.vlgmr.msra.gmra.mrb[114].mxu0 %vm475_vm2, %v7536_v8 }
 0x9a6   : > { %v13694_v12 = vpop.eup %13693  ;;  %13122 = vmatpush3.msra.mxu0 %v15491_v53  ;;  %13123 = vmatprep.mubr.msk.f32.mxu0 %vm13941_vm1, %v16335_v35 }
 0x9a7   : > { %v7537_v41 = vmul.f32 %v13694_v12, %v15531_v6  ;;  %v7496_v62 = vpop.xlane.xlu0 %7495  ;;  %13131 = vmatprep.subr.mxu0 %v16335_v35 }
 0x9a8   : > { %13699 = vrcp.f32 %v7496_v62 }
 0x9a9   : > { %13119 = vmatmul.mubr.msk.f32.vlgmr.msra.gmra.mrb[94].mxu1 %vm475_vm2, %v7537_v41 }
 0x9aa   : > { %v13696_v63 = vpop.eup %13695  ;;  %13127 = vmatpush3.msra.mxu1 %v15493_v15  ;;  %13128 = vmatprep.mubr.msk.f32.mxu1 %vm13941_vm1, %v16335_v35 }
 0x9ab   : > { %v7538_v39 = vmul.f32 %v13696_v63, %v15537_v44  ;;  %v7499_v53 = vpop.xlane.xlu1 %7498  ;;  %13136 = vmatprep.subr.mxu1 %v16335_v35 }
 0x9ac   : > { %13701 = vrcp.f32 %v7499_v53 }
 0x9ad   : > { %13124 = vmatmul.mubr.msk.f32.vlgmr.msra.gmra.mrb[116].mxu0 %vm475_vm2, %v7538_v39 }
 0x9ae   : > { %v13698_v6 = vpop.eup %13697  ;;  %13132 = vmatpush3.msra.mxu0 %v15495_v37  ;;  %13133 = vmatprep.mubr.msk.f32.mxu0 %vm13941_vm1, %v16335_v35 }
 0x9af   : > { %v7539_v51 = vmul.f32 %v13698_v6, %v15547_v1  ;;  %v7502_v15 = vpop.xlane.xlu0 %7501  ;;  %13141 = vmatprep.subr.mxu0 %v16335_v35 }
 0x9b0   : > { %13703 = vrcp.f32 %v7502_v15 }
 0x9b1   : > { %13129 = vmatmul.mubr.msk.f32.vlgmr.msra.gmra.mrb[96].mxu1 %vm475_vm2, %v7539_v51 }
 0x9b2   : > { %v13700_v44 = vpop.eup %13699  ;;  %13137 = vmatpush3.msra.mxu1 %v15692_v42  ;;  %13138 = vmatprep.mubr.msk.f32.mxu1 %vm13941_vm1, %v16335_v35 }
 0x9b3   : > { %v7540_v4 = vmul.f32 %v13700_v44, %v15555_v61  ;;  %v7505_v37 = vpop.xlane.xlu1 %7504  ;;  %13146 = vmatprep.subr.mxu1 %v16335_v35 }
 0x9b4   : > { %13705 = vrcp.f32 %v7505_v37 }
 0x9b5   : > { %13134 = vmatmul.mubr.msk.f32.vlgmr.msra.gmra.mrb[118].mxu0 %vm475_vm2, %v7540_v4 }
 0x9b6   : > { %v13702_v1 = vpop.eup %13701  ;;  %13142 = vmatpush3.msra.mxu0 %v15686_v58  ;;  %13143 = vmatprep.mubr.msk.f32.mxu0 %vm13941_vm1, %v16335_v35 }
 0x9b7   : > { %v7541_v14 = vmul.f32 %v13702_v1, %v15563_v48  ;;  %v7508_v20 = vpop.xlane.xlu0 %7507  ;;  %13151 = vmatprep.subr.mxu0 %v16335_v35 }
 0x9b8   : > { %13707 = vrcp.f32 %v7508_v20 }
 0x9b9   : > { %13139 = vmatmul.mubr.msk.f32.vlgmr.msra.gmra.mrb[98].mxu1 %vm475_vm2, %v7541_v14 }
 0x9ba   : > { %v13704_v61 = vpop.eup %13703  ;;  %13147 = vmatpush3.msra.mxu1 %v15700_v56  ;;  %13148 = vmatprep.mubr.msk.f32.mxu1 %vm13941_vm1, %v16335_v35 }
 0x9bb   : > { %v7542_v42 = vmul.f32 %v13704_v61, %v15570_v17  ;;  %v7511_v58 = vpop.xlane.xlu1 %7510  ;;  %13156 = vmatprep.subr.mxu1 %v16335_v35 }
 0x9bc   : > { %13709 = vrcp.f32 %v7511_v58 }
 0x9bd   : > { %13144 = vmatmul.mubr.msk.f32.vlgmr.msra.gmra.mrb[120].mxu0 %vm475_vm2, %v7542_v42 }
 0x9be   : > { %v13706_v48 = vpop.eup %13705  ;;  %13152 = vmatpush3.msra.mxu0 %v15694_v19  ;;  %13153 = vmatprep.mubr.msk.f32.mxu0 %vm13941_vm1, %v16335_v35 }
 0x9bf   : > { %v7543_v59 = vmul.f32 %v13706_v48, %v15575_v9  ;;  %v8688_v56 = vpop.permute.xlu1 %8687  ;;  %v7514_v55 = vpop.xlane.xlu0 %7513  ;;  %13161 = vmatprep.subr.mxu0 %v16335_v35 }
 0x9c0   : > { %13711 = vrcp.f32 %v7514_v55 }
 0x9c1   : > { %13149 = vmatmul.mubr.msk.f32.vlgmr.msra.gmra.mrb[100].mxu1 %vm475_vm2, %v7543_v59 }
 0x9c2   : > { %v13708_v17 = vpop.eup %13707  ;;  %13158 = vmatprep.mubr.msk.f32.mxu1 %vm13941_vm1, %v16335_v35 }
 0x9c3   : > { %v7544_v0 = vmul.f32 %v13708_v17, %v15579_v40  ;;  %v8973_v19 = vpop.permute.xlu1 %8972  ;;  %v8612_v24 = vpop.permute.xlu0 %8611 }
 0x9c4   : > { %13157 = vmatpush3.msra.mxu1 %v8612_v24 }
 0x9c5   : > { %13154 = vmatmul.mubr.msk.f32.vlgmr.msra.gmra.mrb[122].mxu0 %vm475_vm2, %v7544_v0  ;;  %13166 = vmatprep.subr.mxu1 %v469_v13 }
 0x9c6   : > { %v13710_v9 = vpop.eup %13709  ;;  %13162 = vmatpush3.msra.mxu0 %v8688_v56  ;;  %13163 = vmatprep.mubr.msk.f32.mxu0 %vm13941_vm1, %v16335_v35 }
 0x9c7   : > { %v7545_v23 = vmul.f32 %v13710_v9, %v15583_v45  ;;  %v9051_v7 = vpop.permute.xlu1 %9050  ;;  %v8975_v26 = vpop.permute.xlu0 %8974  ;;  %13192 = vmatprep.subr.mxu0 %v16335_v35 }
 0x9c9   : > { %13159 = vmatmul.mubr.msk.f32.vlgmr.msra.gmra.mrb[102].mxu1 %vm475_vm2, %v7545_v23 }
 0x9ca   : > { %v13712_v40 = vpop.eup %13711  ;;  %13167 = vmatpush3.msra.mxu1 %v469_v13 }
 0x9cb   : > { %v7546_v10 = vmul.f32 %v13712_v40, %v15587_v21  ;;  %v9129_v52 = vpop.permute.xlu1 %9128  ;;  %v9053_v50 = vpop.permute.xlu0 %9052  ;;  %13232 = vmatprep.subr.mxu1 %v16335_v35 }
 0x9cd   : > { %13164 = vmatmul.mubr.msk.f32.vlgmr.msra.gmra.mrb[124].mxu0 %vm475_vm2, %v7546_v10 }
 0x9ce   : > { %13193 = vmatpush3.xpose.msk.msra.mxu0 %vm475_vm2, %v8975_v26  ;;  %13194 = vmatprep.mubr.msk.f32.mxu0 %vm13941_vm1, %v16335_v35 }
 0x9cf   : > { %v9207_v45 = vpop.permute.xlu1 %9206  ;;  %v9131_v11 = vpop.permute.xlu0 %9130  ;;  %13197 = vmatprep.subr.mxu0 %v16335_v35 }
 0x9d1   : > { %13195 = vmatmul.mubr.msk.f32.vlgmr.msra.gmra.mrb[126].mxu0 %vm475_vm2, %v8973_v19 }
 0x9d2   : > { %13198 = vmatpush3.xpose.msk.msra.mxu0 %vm475_vm2, %v9053_v50  ;;  %13199 = vmatprep.mubr.msk.f32.mxu0 %vm13941_vm1, %v16335_v35 }
 0x9d3   : > { %v9285_v21 = vpop.permute.xlu1 %9284  ;;  %v9209_v25 = vpop.permute.xlu0 %9208  ;;  %13202 = vmatprep.subr.mxu0 %v16335_v35 }
 0x9d5   : > { %13200 = vmatmul.mubr.msk.f32.vlgmr.msra.gmra.mrb[128].mxu0 %vm475_vm2, %v9051_v7 }
 0x9d6   : > { %13203 = vmatpush3.xpose.msk.msra.mxu0 %vm475_vm2, %v9131_v11  ;;  %13204 = vmatprep.mubr.msk.f32.mxu0 %vm13941_vm1, %v16335_v35 }
 0x9d7   : > { %v9363_v60 = vpop.permute.xlu1 %9362  ;;  %v9287_v22 = vpop.permute.xlu0 %9286  ;;  %13207 = vmatprep.subr.mxu0 %v16335_v35 }
 0x9d9   : > { %13205 = vmatmul.mubr.msk.f32.vlgmr.msra.gmra.mrb[130].mxu0 %vm475_vm2, %v9129_v52 }
 0x9da   : > { %13208 = vmatpush3.xpose.msk.msra.mxu0 %vm475_vm2, %v9209_v25  ;;  %13209 = vmatprep.mubr.msk.f32.mxu0 %vm13941_vm1, %v16335_v35 }
 0x9db   : > { %v9441_v43 = vpop.permute.xlu1 %9440  ;;  %v9365_v47 = vpop.permute.xlu0 %9364  ;;  %13212 = vmatprep.subr.mxu0 %v16335_v35 }
 0x9dd   : > { %13210 = vmatmul.mubr.msk.f32.vlgmr.msra.gmra.mrb[132].mxu0 %vm475_vm2, %v9207_v45 }
 0x9de   : > { %13213 = vmatpush3.xpose.msk.msra.mxu0 %vm475_vm2, %v9287_v22  ;;  %13214 = vmatprep.mubr.msk.f32.mxu0 %vm13941_vm1, %v16335_v35 }
 0x9df   : > { %v9519_v3 = vpop.permute.xlu1 %9518  ;;  %v9443_v2 = vpop.permute.xlu0 %9442  ;;  %13217 = vmatprep.subr.mxu0 %v16335_v35 }
 0x9e1   : > { %13215 = vmatmul.mubr.msk.f32.vlgmr.msra.gmra.mrb[134].mxu0 %vm475_vm2, %v9285_v21 }
 0x9e2   : > { %13218 = vmatpush3.xpose.msk.msra.mxu0 %vm475_vm2, %v9365_v47  ;;  %13219 = vmatprep.mubr.msk.f32.mxu0 %vm13941_vm1, %v16335_v35 }
 0x9e3   : > { %v9677_v8 = vpop.permute.xlu1 %9676  ;;  %v9521_v16 = vpop.permute.xlu0 %9520  ;;  %13222 = vmatprep.subr.mxu0 %v16335_v35 }
 0x9e5   : > { %13220 = vmatmul.mubr.msk.f32.vlgmr.msra.gmra.mrb[136].mxu0 %vm475_vm2, %v9363_v60 }
 0x9e6   : > { %13223 = vmatpush3.xpose.msk.msra.mxu0 %vm475_vm2, %v9443_v2  ;;  %13224 = vmatprep.mubr.msk.f32.mxu0 %vm13941_vm1, %v16335_v35 }
 0x9e7   : > { %v9675_v12 = vpop.permute.xlu1 %9674  ;;  %v9599_v41 = vpop.permute.xlu0 %9598  ;;  %13227 = vmatprep.subr.mxu0 %v16335_v35 }
 0x9e9   : > { %13225 = vmatmul.mubr.msk.f32.vlgmr.msra.gmra.mrb[138].mxu0 %vm475_vm2, %v9441_v43 }
 0x9ea   : > { %13228 = vmatpush3.xpose.msk.msra.mxu0 %vm475_vm2, %v9521_v16  ;;  %13229 = vmatprep.mubr.msk.f32.mxu0 %vm13941_vm1, %v16335_v35 }
 0x9eb   : > { %v9833_v62 = vpop.permute.xlu1 %9832  ;;  %v15836_v63 = vpop.permute.xlu0 %9596  ;;  %13237 = vmatprep.subr.mxu0 %v16335_v35 }
 0x9ed   : > { %13230 = vmatmul.mubr.msk.f32.vlgmr.msra.gmra.mrb[140].mxu0 %vm475_vm2, %v9519_v3 }
 0x9ee   : > { %13238 = vmatpush3.xpose.msk.msra.mxu0 %vm475_vm2, %v9677_v8  ;;  %13239 = vmatprep.mubr.msk.f32.mxu0 %vm13941_vm1, %v16335_v35 }
 0x9ef   : > { %v9831_v39 = vpop.permute.xlu1 %9830  ;;  %v15843_v53 = vpop.permute.xlu0 %9754  ;;  %13247 = vmatprep.subr.mxu0 %v16335_v35 }
 0x9f1   : > { %13240 = vmatmul.mubr.msk.f32.vlgmr.msra.gmra.mrb[142].mxu0 %vm475_vm2, %v9675_v12 }
 0x9f2   : > { %13248 = vmatpush3.xpose.msk.msra.mxu0 %vm475_vm2, %v9833_v62  ;;  %13249 = vmatprep.mubr.msk.f32.mxu0 %vm13941_vm1, %v16335_v35 }
 0x9f3   : > { %v9989_v6 = vpop.permute.xlu1 %9988  ;;  %v15850_v51 = vpop.permute.xlu0 %9752  ;;  %13257 = vmatprep.subr.mxu0 %v16335_v35 }
 0x9f5   : > { %13250 = vmatmul.mubr.msk.f32.vlgmr.msra.gmra.mrb[144].mxu0 %vm475_vm2, %v9831_v39 }
 0x9f6   : > { %13258 = vmatpush3.xpose.msk.msra.mxu0 %vm475_vm2, %v9989_v6  ;;  %13259 = vmatprep.mubr.msk.f32.mxu0 %vm13941_vm1, %v16335_v35 }
 0x9f7   : > { %v9987_v15 = vpop.permute.xlu1 %9986  ;;  %v15857_v44 = vpop.permute.xlu0 %9910  ;;  %13267 = vmatprep.subr.mxu0 %v16335_v35 }
 0x9f9   : > { %13260 = vmatmul.mubr.msk.f32.vlgmr.msra.gmra.mrb[146].mxu0 %vm475_vm2, %v9987_v15 }
 0x9fa   : > { %13269 = vmatprep.mubr.msk.f32.mxu0 %vm13941_vm1, %v16335_v35 }
 0x9fb   : > { %v10145_v4 = vpop.permute.xlu1 %10144  ;;  %v15863_v37 = vpop.permute.xlu0 %9908 }
 0x9fc   : > { %13268 = vmatpush3.xpose.msk.msra.mxu0 %vm475_vm2, %v10145_v4 }
 0x9fd   : > { %13277 = vmatprep.subr.mxu0 %v16335_v35 }
 0x9ff   : > { %v10143_v1 = vpop.permute.xlu1 %10142  ;;  %v15867_v14 = vpop.permute.xlu0 %10066 }
 0xa00   : > { %13270 = vmatmul.mubr.msk.f32.vlgmr.msra.gmra.mrb[148].mxu0 %vm475_vm2, %v10143_v1 }
 0xa01   : > { %13279 = vmatprep.mubr.msk.f32.mxu0 %vm13941_vm1, %v16335_v35 }
 0xa03   : > { %v15872_v20 = vpop.permute.xlu0 %10064 }
 0xa07   : > { %v10473_v61 = vpop.permute.xlu0 %10472 }
 0xa08   : > { %13278 = vmatpush3.msra.mxu0 %v10473_v61 }
 0xa09   : > { %13287 = vmatprep.subr.mxu0 %v16335_v35 }
 0xa64   : > { %v7619_v42 = vpop.f32.mrb[88].mxu1 }
 0xa65   : > { %v13090_v58 = vpop.f32.mrb[89].mxu1  ;;  %13168 = vmatprep.mubr.msk.f32.mxu1 %vm475_vm2, %v7619_v42 }
 0xa66   : > { %v10397_v58 = vpop.permute.xlu1 %10396 }
 0xa68   : > { %v7695_v48 = vpop.f32.mrb[110].mxu0 }
 0xa69   : > { %v13095_v59 = vpop.f32.mrb[111].mxu0  ;;  %13169 = vmatmul.mubr.msk.f32.vlgmr.msra.gmra.mrb[82].mxu1 %vm475_vm2, %v7695_v48 }
 0xa6a   : > { %13233 = vmatpush3.xpose.msk.msra.mxu1 %vm475_vm2, %v9599_v41 }
 0xa6b   : > { %13242 = vmatprep.subr.mxu1 %v16335_v35 }
 0xa6c   : > { %v7771_v56 = vpop.f32.mrb[90].mxu1 }
 0xa6d   : > { %v13100_v55 = vpop.f32.mrb[91].mxu1  ;;  %13171 = vmatprep.mubr.msk.f32.mxu1 %vm475_vm2, %v7771_v56 }
 0xa70   : > { %v7847_v17 = vpop.f32.mrb[112].mxu0 }
 0xa71   : > { %v13105_v13 = vpop.f32.mrb[113].mxu0  ;;  %13172 = vmatmul.mubr.msk.f32.gmra.mrb[84].mxu1 %vm475_vm2, %v7847_v17 }
 0xa74   : > { %v7923_v0 = vpop.f32.mrb[92].mxu1 }
 0xa75   : > { %v13110_v19 = vpop.f32.mrb[93].mxu1  ;;  %13174 = vmatprep.mubr.msk.f32.mxu1 %vm475_vm2, %v7923_v0 }
 0xa78   : > { %v7999_v24 = vpop.f32.mrb[114].mxu0 }
 0xa79   : > { %v13115_v9 = vpop.f32.mrb[115].mxu0  ;;  %13175 = vmatmul.mubr.msk.f32.gmra.mrb[86].mxu1 %vm475_vm2, %v7999_v24 }
 0xa7c   : > { %v8075_v23 = vpop.f32.mrb[94].mxu1 }
 0xa7d   : > { %v13120_v7 = vpop.f32.mrb[95].mxu1  ;;  %13177 = vmatprep.mubr.msk.f32.mxu1 %vm475_vm2, %v8075_v23 }
 0xa80   : > { %v8151_v26 = vpop.f32.mrb[116].mxu0 }
 0xa81   : > { %v13125_v40 = vpop.f32.mrb[117].mxu0  ;;  %13178 = vmatmul.mubr.msk.f32.gmra.mrb[72].mxu1 %vm475_vm2, %v8151_v26 }
 0xa84   : > { %v8227_v10 = vpop.f32.mrb[96].mxu1 }
 0xa85   : > { %v13130_v52 = vpop.f32.mrb[97].mxu1  ;;  %13180 = vmatprep.mubr.msk.f32.mxu1 %vm475_vm2, %v8227_v10 }
 0xa88   : > { %v8303_v50 = vpop.f32.mrb[118].mxu0 }
 0xa89   : > { %v13135_v45 = vpop.f32.mrb[119].mxu0  ;;  %13181 = vmatmul.mubr.msk.f32.gmra.mrb[74].mxu1 %vm475_vm2, %v8303_v50 }
 0xa8c   : > { %v8379_v11 = vpop.f32.mrb[98].mxu1 }
 0xa8d   : > { %v13140_v21 = vpop.f32.mrb[99].mxu1  ;;  %13183 = vmatprep.mubr.msk.f32.mxu1 %vm475_vm2, %v8379_v11 }
 0xa90   : > { %v8455_v25 = vpop.f32.mrb[120].mxu0 }
 0xa91   : > { %v13145_v60 = vpop.f32.mrb[121].mxu0  ;;  %13184 = vmatmul.mubr.msk.f32.gmra.mrb[76].mxu1 %vm475_vm2, %v8455_v25 }
 0xa94   : > { %v8531_v22 = vpop.f32.mrb[100].mxu1 }
 0xa95   : > { %v13150_v43 = vpop.f32.mrb[101].mxu1  ;;  %13186 = vmatprep.mubr.msk.f32.mxu1 %vm475_vm2, %v8531_v22 }
 0xa98   : > { %v8607_v47 = vpop.f32.mrb[122].mxu0 }
 0xa99   : > { %v13155_v3 = vpop.f32.mrb[123].mxu0  ;;  %13187 = vmatmul.mubr.msk.f32.gmra.mrb[78].mxu1 %vm475_vm2, %v8607_v47 }
 0xa9c   : > { %v8683_v2 = vpop.f32.mrb[102].mxu1 }
 0xa9d   : > { %v13160_v8 = vpop.f32.mrb[103].mxu1  ;;  %13189 = vmatprep.mubr.msk.f32.mxu1 %vm475_vm2, %v8683_v2 }
 0xaa0   : > { %v8759_v16 = vpop.f32.mrb[124].mxu0 }
 0xaa1   : > { %v13165_v12 = vpop.f32.mrb[125].mxu0  ;;  %13190 = vmatmul.mubr.msk.f32.gmra.mrb[80].mxu1 %vm475_vm2, %v8759_v16 }
 0xaa2   : > { %13234 = vmatprep.mubr.msk.f32.mxu1 %vm13941_vm1, %v16335_v35 }
 0xaa4   : > { %v9046_v41 = vpop.f32.mrb[126].mxu0 }
 0xaa5   : > { %v15896_v62 = vadd.f32 %v9046_v41, %v16342_v57  ;;  %v13196_v39 = vpop.f32.mrb[127].mxu0  ;;  %13235 = vmatmul.mubr.msk.f32.vlgmr.msra.gmra.mrb[104].mxu1 %vm475_vm2, %v15836_v63 }
 0xaa6   : > { %13243 = vmatpush3.xpose.msk.msra.mxu1 %vm475_vm2, %v15843_v53  ;;  %13244 = vmatprep.mubr.msk.f32.mxu1 %vm13941_vm1, %v16335_v35 }
 0xaa7   : > { %13252 = vmatprep.subr.mxu1 %v16335_v35  ;;  %v10220_v6 = vsel %vm475_vm2, %v15896_v62, -inf }
 0xaa8   : > { %10221 = vmax.xlane.f32.xlu0 %v10220_v6  ;;  %v9124_v15 = vpop.f32.mrb[128].mxu0  ;;  %v15985_v6 = vpop.permute.xlu1 %10548 }
 0xaa9   : > { %v15908_v4 = vadd.f32 %v9124_v15, %v16342_v57  ;;  %v13201_v1 = vpop.f32.mrb[129].mxu0  ;;  %13245 = vmatmul.mubr.msk.f32.vlgmr.msra.gmra.mrb[106].mxu1 %vm475_vm2, %v15850_v51 }
 0xaaa   : > { %13253 = vmatpush3.xpose.msk.msra.mxu1 %vm475_vm2, %v15857_v44  ;;  %13254 = vmatprep.mubr.msk.f32.mxu1 %vm13941_vm1, %v16335_v35 }
 0xaab   : > { %13262 = vmatprep.subr.mxu1 %v16335_v35  ;;  %v10223_v63 = vsel %vm475_vm2, %v15908_v4, -inf }
 0xaac   : > { %10224 = vmax.xlane.f32.xlu1 %v10223_v63  ;;  %v9202_v53 = vpop.f32.mrb[130].mxu0 }
 0xaad   : > { %v15920_v61 = vadd.f32 %v9202_v53, %v16342_v57  ;;  %v13206_v42 = vpop.f32.mrb[131].mxu0  ;;  %13255 = vmatmul.mubr.msk.f32.vlgmr.msra.gmra.mrb[108].mxu1 %vm475_vm2, %v15863_v37 }
 0xaae   : > { %13263 = vmatpush3.xpose.msk.msra.mxu1 %vm475_vm2, %v15867_v14  ;;  %13264 = vmatprep.mubr.msk.f32.mxu1 %vm13941_vm1, %v16335_v35 }
 0xaaf   : > { %13272 = vmatprep.subr.mxu1 %v16335_v35  ;;  %v10226_v51 = vsel %vm475_vm2, %v15920_v61, -inf }
 0xab0   : > { %10227 = vmax.xlane.f32.xlu0 %v10226_v51  ;;  %v9280_v44 = vpop.f32.mrb[132].mxu0 }
 0xab1   : > { %v15932_v48 = vadd.f32 %v9280_v44, %v16342_v57  ;;  %v13211_v59 = vpop.f32.mrb[133].mxu0  ;;  %13265 = vmatmul.mubr.msk.f32.vlgmr.msra.gmra.mrb[110].mxu1 %vm475_vm2, %v15872_v20 }
 0xab2   : > { %13273 = vmatpush3.msra.mxu1 %v10397_v58  ;;  %13274 = vmatprep.mubr.msk.f32.mxu1 %vm13941_vm1, %v16335_v35 }
 0xab3   : > { %v10229_v37 = vsel %vm475_vm2, %v15932_v48, -inf  ;;  %13282 = vmatprep.subr.mxu1 %v16335_v35 }
 0xab4   : > { %10230 = vmax.xlane.f32.xlu0 %v10229_v37  ;;  %v9358_v14 = vpop.f32.mrb[134].mxu0 }
 0xab5   : > { %v15942_v56 = vadd.f32 %v9358_v14, %v16342_v57  ;;  %v13216_v55 = vpop.f32.mrb[135].mxu0 }
 0xab7   : > { %v10232_v17 = vsel %vm475_vm2, %v15942_v56, -inf }
 0xab8   : > { %10233 = vmax.xlane.f32.xlu1 %v10232_v17  ;;  %v9436_v20 = vpop.f32.mrb[136].mxu0 }
 0xab9   : > { %v15947_v13 = vadd.f32 %v9436_v20, %v16342_v57  ;;  %v13221_v0 = vpop.f32.mrb[137].mxu0 }
 0xabb   : > { %v10235_v19 = vsel %vm475_vm2, %v15947_v13, -inf }
 0xabc   : > { %10236 = vmax.xlane.f32.xlu0 %v10235_v19  ;;  %v9514_v24 = vpop.f32.mrb[138].mxu0 }
 0xabd   : > { %v15952_v9 = vadd.f32 %v9514_v24, %v16342_v57  ;;  %v13226_v23 = vpop.f32.mrb[139].mxu0 }
 0xabf   : > { %v10238_v7 = vsel %vm475_vm2, %v15952_v9, -inf }
 0xac0   : > { %10239 = vmax.xlane.f32.xlu1 %v10238_v7  ;;  %v9592_v26 = vpop.f32.mrb[140].mxu0 }
 0xac1   : > { %v15957_v40 = vadd.f32 %v9592_v26, %v16342_v57  ;;  %v13231_v10 = vpop.f32.mrb[141].mxu0 }
 0xac3   : > { %v10241_v52 = vsel %vm475_vm2, %v15957_v40, -inf }
 0xac4   : > { %10242 = vmax.xlane.f32.xlu0 %v10241_v52  ;;  %v9748_v50 = vpop.f32.mrb[142].mxu0 }
 0xac5   : > { %v15962_v45 = vadd.f32 %v9748_v50, %v16342_v57  ;;  %v13241_v11 = vpop.f32.mrb[143].mxu0 }
 0xac7   : > { %v10247_v21 = vsel %vm475_vm2, %v15962_v45, -inf }
 0xac8   : > { %10248 = vmax.xlane.f32.xlu0 %v10247_v21  ;;  %v9904_v25 = vpop.f32.mrb[144].mxu0 }
 0xac9   : > { %v15967_v60 = vadd.f32 %v9904_v25, %v16342_v57  ;;  %v13251_v22 = vpop.f32.mrb[145].mxu0 }
 0xacb   : > { %v10253_v43 = vsel %vm475_vm2, %v15967_v60, -inf }
 0xacc   : > { %10254 = vmax.xlane.f32.xlu0 %v10253_v43  ;;  %v10060_v47 = vpop.f32.mrb[146].mxu0 }
 0xacd   : > { %v15972_v3 = vadd.f32 %v10060_v47, %v16342_v57  ;;  %v13261_v2 = vpop.f32.mrb[147].mxu0 }
 0xacf   : > { %v10259_v8 = vsel %vm475_vm2, %v15972_v3, -inf }
 0xad0   : > { %10260 = vmax.xlane.f32.xlu0 %v10259_v8 }
 0xad1   : > { %10700 = vrot.lane.b32.xlu1 %v14230_v28, %s13953_s29 }
 0xad3   : > { %v10216_v16 = vpop.f32.mrb[148].mxu0 }
 0xad4   : > { %v15979_v12 = vadd.f32 %v10216_v16, %v16342_v57  ;;  %v13271_v41 = vpop.f32.mrb[149].mxu0 }
 0xad6   : > { %v10265_v39 = vsel %vm475_vm2, %v15979_v12, -inf }
 0xad7   : > { %10266 = vmax.xlane.f32.xlu0 %v10265_v39 }
 0xaed   : > { %10624 = vrot.lane.b32.xlu0 %v16337_v54, %s13953_s29 }
 0xb35   : > { %v10222_v15 = vpop.xlane.xlu0 %10221 }
 0xb36   : > { %v10268_v1 = vsub.f32 %v15896_v62, %v10222_v15 }
 0xb38   : > { %v10284_v63 = vmul.f32 1.442695, %v10268_v1 }
 0xb39   : > { %v10225_v53 = vpop.xlane.xlu1 %10224 }
 0xb3a   : > { %13713 = vpow2.f32 %v10284_v63  ;;  %v10269_v28 = vsub.f32 %v15908_v4, %v10225_v53 }
 0xb3c   : > { %v10286_v42 = vmul.f32 1.442695, %v10269_v28 }
 0xb3d   : > { %v10228_v51 = vpop.xlane.xlu0 %10227 }
 0xb3e   : > { %13715 = vpow2.f32 %v10286_v42  ;;  %v10270_v44 = vsub.f32 %v15920_v61, %v10228_v51 }
 0xb40   : > { %v10288_v58 = vmul.f32 1.442695, %v10270_v44 }
 0xb41   : > { %v10231_v59 = vpop.xlane.xlu0 %10230 }
 0xb42   : > { %13717 = vpow2.f32 %v10288_v58  ;;  %v10271_v54 = vsub.f32 %v15932_v48, %v10231_v59 }
 0xb44   : > { %v15991_v37 = vpop.eup %13713  ;;  %v10290_v14 = vmul.f32 1.442695, %v10271_v54 }
 0xb45   : > { %v10234_v55 = vpop.xlane.xlu1 %10233  ;;  %v10316_v62 = vsel %vm475_vm2, %v15991_v37, 0.0 }
 0xb46   : > { %13719 = vpow2.f32 %v10290_v14  ;;  %v10272_v4 = vsub.f32 %v15942_v56, %v10234_v55  ;;  %10317 = vadd.xlane.f32.xlu1 %v10316_v62 }
 0xb48   : > { %v15996_v17 = vpop.eup %13715  ;;  %v10292_v20 = vmul.f32 1.442695, %v10272_v4 }
 0xb49   : > { %v10237_v61 = vpop.xlane.xlu0 %10236  ;;  %v10319_v0 = vsel %vm475_vm2, %v15996_v17, 0.0 }
 0xb4a   : > { %13721 = vpow2.f32 %v10292_v20  ;;  %v10273_v48 = vsub.f32 %v15947_v13, %v10237_v61  ;;  %10320 = vadd.xlane.f32.xlu0 %v10319_v0 }
 0xb4c   : > { %v16001_v19 = vpop.eup %13717  ;;  %v10294_v24 = vmul.f32 1.442695, %v10273_v48 }
 0xb4d   : > { %v10240_v23 = vpop.xlane.xlu1 %10239  ;;  %v10322_v7 = vsel %vm475_vm2, %v16001_v19, 0.0 }
 0xb4e   : > { %13723 = vpow2.f32 %v10294_v24  ;;  %v10274_v56 = vsub.f32 %v15952_v9, %v10240_v23  ;;  %10323 = vadd.xlane.f32.xlu1 %v10322_v7 }
 0xb50   : > { %v16006_v26 = vpop.eup %13719  ;;  %v10296_v10 = vmul.f32 1.442695, %v10274_v56 }
 0xb51   : > { %v10243_v52 = vpop.xlane.xlu0 %10242  ;;  %v10325_v50 = vsel %vm475_vm2, %v16006_v26, 0.0 }
 0xb52   : > { %13725 = vpow2.f32 %v10296_v10  ;;  %v10275_v13 = vsub.f32 %v15957_v40, %v10243_v52  ;;  %10326 = vadd.xlane.f32.xlu0 %v10325_v50 }
 0xb54   : > { %v16011_v11 = vpop.eup %13721  ;;  %v10298_v21 = vmul.f32 1.442695, %v10275_v13 }
 0xb55   : > { %v10249_v25 = vpop.xlane.xlu0 %10248  ;;  %v10328_v22 = vsel %vm475_vm2, %v16011_v11, 0.0 }
 0xb56   : > { %13727 = vpow2.f32 %v10298_v21  ;;  %v10277_v9 = vsub.f32 %v15962_v45, %v10249_v25  ;;  %10329 = vadd.xlane.f32.xlu1 %v10328_v22 }
 0xb58   : > { %v16016_v43 = vpop.eup %13723  ;;  %v10302_v47 = vmul.f32 1.442695, %v10277_v9 }
 0xb59   : > { %v10255_v2 = vpop.xlane.xlu0 %10254  ;;  %v10331_v8 = vsel %vm475_vm2, %v16016_v43, 0.0 }
 0xb5a   : > { %13729 = vpow2.f32 %v10302_v47  ;;  %v10279_v40 = vsub.f32 %v15967_v60, %v10255_v2  ;;  %10332 = vadd.xlane.f32.xlu0 %v10331_v8 }
 0xb5c   : > { %v16021_v16 = vpop.eup %13725  ;;  %v10306_v41 = vmul.f32 1.442695, %v10279_v40 }
 0xb5d   : > { %v10261_v39 = vpop.xlane.xlu0 %10260  ;;  %v10334_v15 = vsel %vm475_vm2, %v16021_v16, 0.0 }
 0xb5e   : > { %13731 = vpow2.f32 %v10306_v41  ;;  %v10281_v45 = vsub.f32 %v15972_v3, %v10261_v39  ;;  %10335 = vadd.xlane.f32.xlu1 %v10334_v15 }
 0xb60   : > { %v16026_v1 = vpop.eup %13727  ;;  %v10310_v63 = vmul.f32 1.442695, %v10281_v45 }
 0xb61   : > { %v10337_v53 = vsel %vm475_vm2, %v16026_v1, 0.0 }
 0xb62   : > { %13733 = vpow2.f32 %v10310_v63  ;;  %10338 = vadd.xlane.f32.xlu0 %v10337_v53 }
 0xb64   : > { %v16030_v60 = vpop.eup %13729  ;;  %v10267_v28 = vpop.xlane.xlu0 %10266 }
 0xb65   : > { %v10283_v42 = vsub.f32 %v15979_v12, %v10267_v28  ;;  %v10343_v51 = vsel %vm475_vm2, %v16030_v60, 0.0 }
 0xb66   : > { %10344 = vadd.xlane.f32.xlu0 %v10343_v51 }
 0xb67   : > { %v10314_v44 = vmul.f32 1.442695, %v10283_v42 }
 0xb68   : > { %v16035_v3 = vpop.eup %13731 }
 0xb69   : > { %13735 = vpow2.f32 %v10314_v44  ;;  %v10349_v58 = vsel %vm475_vm2, %v16035_v3, 0.0 }
 0xb6a   : > { %10350 = vadd.xlane.f32.xlu0 %v10349_v58 }
 0xb6c   : > { %v16039_v59 = vpop.eup %13733 }
 0xb6d   : > { %v10355_v54 = vsel %vm475_vm2, %v16039_v59, 0.0 }
 0xb6e   : > { %10356 = vadd.xlane.f32.xlu0 %v10355_v54 }
 0xb73   : > { %v16043_v14 = vpop.eup %13735 }
 0xb74   : > { %v10361_v12 = vsel %vm475_vm2, %v16043_v14, 0.0 }
 0xb75   : > { %10362 = vadd.xlane.f32.xlu0 %v10361_v12 }
 0xb78   : > { %v9670_v55 = vpop.f32.mrb[104].mxu1 }
 0xb79   : > { %v16048_v62 = vadd.f32 %v9670_v55, %v16342_v57  ;;  %v13236_v4 = vpop.f32.mrb[105].mxu1 }
 0xb7b   : > { %v10244_v20 = vsel %vm475_vm2, %v16048_v62, -inf }
 0xb7c   : > { %v9826_v61 = vpop.f32.mrb[106].mxu1  ;;  %10245 = vmax.xlane.f32.xlu1 %v10244_v20 }
 0xb7d   : > { %v16053_v0 = vadd.f32 %v9826_v61, %v16342_v57  ;;  %v13246_v48 = vpop.f32.mrb[107].mxu1 }
 0xb7f   : > { %v10250_v24 = vsel %vm475_vm2, %v16053_v0, -inf }
 0xb80   : > { %v9982_v23 = vpop.f32.mrb[108].mxu1  ;;  %10251 = vmax.xlane.f32.xlu1 %v10250_v24 }
 0xb81   : > { %v16058_v7 = vadd.f32 %v9982_v23, %v16342_v57  ;;  %v13256_v56 = vpop.f32.mrb[109].mxu1 }
 0xb83   : > { %v10256_v10 = vsel %vm475_vm2, %v16058_v7, -inf }
 0xb84   : > { %v10138_v52 = vpop.f32.mrb[110].mxu1  ;;  %10257 = vmax.xlane.f32.xlu1 %v10256_v10 }
 0xb85   : > { %v16063_v50 = vadd.f32 %v10138_v52, %v16342_v57  ;;  %v13266_v13 = vpop.f32.mrb[111].mxu1 }
 0xb87   : > { %v10262_v21 = vsel %vm475_vm2, %v16063_v50, -inf }
 0xb88   : > { %10263 = vmax.xlane.f32.xlu1 %v10262_v21 }
 0xb8b   : > { %10852 = vrot.lane.b32.xlu0 %v14236_v30, %s13953_s29  ;;  %v10701_v30 = vpop.permute.xlu1 %10700 }
 0xb8f   : > { %11004 = vrot.lane.b32.xlu0 %v14242_v32, %s13953_s29  ;;  %v10625_v32 = vpop.permute.xlu0 %10624 }
 0xb93   : > { %11156 = vrot.lane.b32.xlu0 %v14248_v34, %s13953_s29 }
 0xb97   : > { %11308 = vrot.lane.b32.xlu0 %v14254_v36, %s13953_s29 }
 0xb99   : > { %10776 = vrot.lane.b32.xlu1 %v14228_v27, %s13953_s29 }
 0xb9b   : > { %11460 = vrot.lane.b32.xlu0 %v14260_v38, %s13953_s29 }
 0xb9d   : > { %10928 = vrot.lane.b32.xlu1 %v14234_v29, %s13953_s29 }
 0xba1   : > { %11080 = vrot.lane.b32.xlu1 %v14240_v31, %s13953_s29 }
 0xba5   : > { %11232 = vrot.lane.b32.xlu1 %v16343_v18, %s13953_s29 }
 0xba9   : > { %11384 = vrot.lane.b32.xlu1 %v16344_v49, %s13953_s29 }
 0xbd3   : > { %v10318_v34 = vpop.xlane.xlu1 %10317 }
 0xbd4   : > { %13737 = vrcp.f32 %v10318_v34 }
 0xbd7   : > { %v10321_v27 = vpop.xlane.xlu0 %10320 }
 0xbd8   : > { %13739 = vrcp.f32 %v10321_v27 }
 0xbdb   : > { %v10324_v36 = vpop.xlane.xlu1 %10323 }
 0xbdc   : > { %13741 = vrcp.f32 %v10324_v36 }
 0xbde   : > { %v13738_v38 = vpop.eup %13737 }
 0xbdf   : > { %v10380_v29 = vmul.f32 %v13738_v38, %v15991_v37  ;;  %v10327_v57 = vpop.xlane.xlu0 %10326 }
 0xbe0   : > { %13743 = vrcp.f32 %v10327_v57 }
 0xbe1   : > { %13275 = vmatmul.mubr.msk.f32.vlgmr.msra.gmra.mrb[112].mxu1 %vm475_vm2, %v10380_v29 }
 0xbe2   : > { %v13740_v31 = vpop.eup %13739  ;;  %13283 = vmatpush3.msra.mxu1 %v15985_v6  ;;  %13284 = vmatprep.mubr.msk.f32.mxu1 %vm13941_vm1, %v16335_v35 }
 0xbe3   : > { %v10381_v18 = vmul.f32 %v13740_v31, %v15996_v17  ;;  %v10330_v49 = vpop.xlane.xlu1 %10329  ;;  %13292 = vmatprep.subr.mxu1 %v16335_v35 }
 0xbe4   : > { %13745 = vrcp.f32 %v10330_v49 }
 0xbe5   : > { %13280 = vmatmul.mubr.msk.f32.vlgmr.msra.gmra.mrb[150].mxu0 %vm475_vm2, %v10381_v18 }
 0xbe6   : > { %v13742_v25 = vpop.eup %13741  ;;  %13288 = vmatpush3.msra.mxu0 %v10625_v32  ;;  %13289 = vmatprep.mubr.msk.f32.mxu0 %vm13941_vm1, %v16335_v35 }
 0xbe7   : > { %v10382_v37 = vmul.f32 %v13742_v25, %v16001_v19  ;;  %13297 = vmatprep.subr.mxu0 %v16335_v35  ;;  %v10333_v22 = vpop.xlane.xlu0 %10332 }
 0xbe9   : > { %13285 = vmatmul.mubr.msk.f32.vlgmr.msra.gmra.mrb[114].mxu1 %vm475_vm2, %v10382_v37 }
 0xbea   : > { %v13744_v6 = vpop.eup %13743  ;;  %13293 = vmatpush3.msra.mxu1 %v10701_v30  ;;  %13294 = vmatprep.mubr.msk.f32.mxu1 %vm13941_vm1, %v16335_v35 }
 0xbeb   : > { %v10383_v17 = vmul.f32 %v13744_v6, %v16006_v26  ;;  %13302 = vmatprep.subr.mxu1 %v16335_v35  ;;  %v10336_v8 = vpop.xlane.xlu1 %10335 }
 0xbec   : > { %13747 = vrcp.f32 %v10336_v8 }
 0xbed   : > { %13290 = vmatmul.mubr.msk.f32.vlgmr.msra.gmra.mrb[152].mxu0 %vm475_vm2, %v10383_v17  ;;  %13749 = vrcp.f32 %v10333_v22 }
 0xbee   : > { %v13746_v9 = vpop.eup %13745  ;;  %13299 = vmatprep.mubr.msk.f32.mxu0 %vm13941_vm1, %v16335_v35 }
 0xbef   : > { %v10384_v19 = vmul.f32 %v13746_v9, %v16011_v11  ;;  %v10339_v47 = vpop.xlane.xlu0 %10338 }
 0xbf1   : > { %13295 = vmatmul.mubr.msk.f32.vlgmr.msra.gmra.mrb[116].mxu1 %vm475_vm2, %v10384_v19 }
 0xbf2   : > { %13304 = vmatprep.mubr.msk.f32.mxu1 %vm13941_vm1, %v16335_v35 }
 0xbf3   : > { %v10345_v2 = vpop.xlane.xlu0 %10344 }
 0xbf6   : > { %v13748_v39 = vpop.eup %13747 }
 0xbf7   : > { %v10351_v26 = vpop.xlane.xlu0 %10350  ;;  %v10386_v15 = vmul.f32 %v13748_v39, %v16021_v16  ;;  %v13750_v55 = vpop.eup %13749 }
 0xbf8   : > { %v10385_v61 = vmul.f32 %v13750_v55, %v16016_v43 }
 0xbfb   : > { %v10357_v40 = vpop.xlane.xlu0 %10356 }
 0xc02   : > { %v16111_v41 = vpop.xlane.xlu0 %10362 }
 0xc06   : > { %v10853_v45 = vpop.permute.xlu0 %10852 }
 0xc07   : > { %13303 = vmatpush3.msra.mxu1 %v10853_v45 }
 0xc08   : > { %13305 = vmatmul.mubr.msk.f32.vlgmr.msra.gmra.mrb[118].mxu1 %vm475_vm2, %v10386_v15  ;;  %13312 = vmatprep.subr.mxu1 %v16335_v35 }
 0xc09   : > { %v10246_v11 = vpop.xlane.xlu1 %10245  ;;  %13314 = vmatprep.mubr.msk.f32.mxu1 %vm13941_vm1, %v16335_v35 }
 0xc0a   : > { %v10276_v63 = vsub.f32 %v16048_v62, %v10246_v11  ;;  %v11005_v53 = vpop.permute.xlu0 %11004 }
 0xc0b   : > { %13313 = vmatpush3.msra.mxu1 %v11005_v53 }
 0xc0c   : > { %v10300_v28 = vmul.f32 1.442695, %v10276_v63  ;;  %13322 = vmatprep.subr.mxu1 %v16335_v35 }
 0xc0d   : > { %v10252_v42 = vpop.xlane.xlu1 %10251 }
 0xc0e   : > { %13751 = vpow2.f32 %v10300_v28  ;;  %v10278_v16 = vsub.f32 %v16053_v0, %v10252_v42 }
 0xc0f   : > { %13753 = vrcp.f32 %v10339_v47 }
 0xc10   : > { %v10304_v51 = vmul.f32 1.442695, %v10278_v16 }
 0xc11   : > { %v10258_v44 = vpop.xlane.xlu1 %10257 }
 0xc12   : > { %13755 = vpow2.f32 %v10304_v51  ;;  %v10280_v58 = vsub.f32 %v16058_v7, %v10258_v44 }
 0xc13   : > { %13757 = vrcp.f32 %v10345_v2 }
 0xc14   : > { %v10308_v54 = vmul.f32 1.442695, %v10280_v58 }
 0xc15   : > { %v10264_v12 = vpop.xlane.xlu1 %10263 }
 0xc16   : > { %13759 = vpow2.f32 %v10308_v54  ;;  %v10282_v62 = vsub.f32 %v16063_v50, %v10264_v12 }
 0xc17   : > { %13761 = vrcp.f32 %v10351_v26 }
 0xc18   : > { %v13752_v4 = vpop.eup %13751  ;;  %v10312_v20 = vmul.f32 1.442695, %v10282_v62 }
 0xc19   : > { %v10777_v48 = vpop.permute.xlu1 %10776  ;;  %v10340_v0 = vsel %vm475_vm2, %v13752_v4, 0.0  ;;  %v13754_v24 = vpop.eup %13753 }
 0xc1a   : > { %13763 = vpow2.f32 %v10312_v20  ;;  %10341 = vadd.xlane.f32.xlu1 %v10340_v0  ;;  %13298 = vmatpush3.msra.mxu0 %v10777_v48  ;;  %v10387_v7 = vmul.f32 %v13754_v24, %v16026_v1 }
 0xc1b   : > { %13300 = vmatmul.mubr.msk.f32.vlgmr.msra.gmra.mrb[154].mxu0 %vm475_vm2, %v10385_v61  ;;  %13307 = vmatprep.subr.mxu0 %v16335_v35  ;;  %13765 = vrcp.f32 %v10357_v40  ;;  %v470_v40 = vld [vmem:[#allocation7 + $0x18] sm:$0xff] }
 0xc1c   : > { %v13756_v23 = vpop.eup %13755  ;;  %13309 = vmatprep.mubr.msk.f32.mxu0 %vm13941_vm1, %v16335_v35 }
 0xc1d   : > { %v10929_v56 = vpop.permute.xlu1 %10928  ;;  %v10346_v43 = vsel %vm475_vm2, %v13756_v23, 0.0  ;;  %v13758_v10 = vpop.eup %13757 }
 0xc1e   : > { %10347 = vadd.xlane.f32.xlu1 %v10346_v43  ;;  %13308 = vmatpush3.msra.mxu0 %v10929_v56  ;;  %v10389_v50 = vmul.f32 %v13758_v10, %v16030_v60 }
 0xc1f   : > { %13310 = vmatmul.mubr.msk.f32.vlgmr.msra.gmra.mrb[156].mxu0 %vm475_vm2, %v10387_v7  ;;  %13317 = vmatprep.subr.mxu0 %v16335_v35 }
 0xc20   : > { %v13760_v52 = vpop.eup %13759  ;;  %13319 = vmatprep.mubr.msk.f32.mxu0 %vm13941_vm1, %v16335_v35 }
 0xc21   : > { %v11081_v13 = vpop.permute.xlu1 %11080  ;;  %v10352_v21 = vsel %vm475_vm2, %v13760_v52, 0.0  ;;  %v13762_v1 = vpop.eup %13761 }
 0xc22   : > { %10353 = vadd.xlane.f32.xlu1 %v10352_v21  ;;  %13318 = vmatpush3.msra.mxu0 %v11081_v13  ;;  %v10391_v32 = vmul.f32 %v13762_v1, %v16035_v3 }
 0xc23   : > { %13320 = vmatmul.mubr.msk.f32.vlgmr.msra.gmra.mrb[158].mxu0 %vm475_vm2, %v10389_v50  ;;  %13327 = vmatprep.subr.mxu0 %v16335_v35  ;;  %v12250_v50 = vld [vmem:[%s16284_s3] ss:$0 sm:$0xff] }
 0xc24   : > { %v13764_v30 = vpop.eup %13763  ;;  %13329 = vmatprep.mubr.msk.f32.mxu0 %vm13941_vm1, %v16335_v35 }
 0xc25   : > { %v11233_v34 = vpop.permute.xlu1 %11232  ;;  %v10358_v27 = vsel %vm475_vm2, %v13764_v30, 0.0  ;;  %v13766_v60 = vpop.eup %13765 }
 0xc26   : > { %10359 = vadd.xlane.f32.xlu1 %v10358_v27  ;;  %13328 = vmatpush3.msra.mxu0 %v11233_v34  ;;  %v10393_v36 = vmul.f32 %v13766_v60, %v16039_v59  ;;  %v11157_v59 = vpop.permute.xlu0 %11156  ;;  %v16362_v60 = vld [vmem:[#allocation12_spill] sm:$0xff] }
 0xc27   : > { %13330 = vmatmul.mubr.msk.f32.vlgmr.msra.gmra.mrb[160].mxu0 %vm475_vm2, %v10391_v32  ;;  %13337 = vmatprep.subr.mxu0 %v16335_v35 }
 0xc28   : > { %13339 = vmatprep.mubr.msk.f32.mxu0 %vm13941_vm1, %v16335_v35 }
 0xc29   : > { %v11385_v38 = vpop.permute.xlu1 %11384 }
 0xc2a   : > { %13338 = vmatpush3.msra.mxu0 %v11385_v38  ;;  %v11309_v22 = vpop.permute.xlu0 %11308 }
 0xc2b   : > { %13340 = vmatmul.mubr.msk.f32.vlgmr.msra.gmra.mrb[162].mxu0 %vm475_vm2, %v10393_v36  ;;  %13347 = vmatprep.subr.mxu0 %v16335_v35 }
 0xc2c   : > { %13349 = vmatprep.mubr.msk.f32.mxu0 %vm13941_vm1, %v16335_v35 }
 0xc37   : > { %11536 = vrot.lane.b32.xlu1 %v16345_v5, %s13953_s29 }
 0xca7   : > { %v10342_v3 = vpop.xlane.xlu1 %10341 }
 0xca8   : > { %13767 = vrcp.f32 %v10342_v3 }
 0xca9   : > { %13769 = vrcp.f32 %v16111_v41  ;;  %v11461_v41 = vpop.permute.xlu0 %11460 }
 0xcab   : > { %v10348_v29 = vpop.xlane.xlu1 %10347 }
 0xcac   : > { %13771 = vrcp.f32 %v10348_v29 }
 0xcaf   : > { %v10354_v57 = vpop.xlane.xlu1 %10353 }
 0xcb0   : > { %13773 = vrcp.f32 %v10354_v57 }
 0xcb2   : > { %v13768_v31 = vpop.eup %13767 }
 0xcb3   : > { %v10388_v18 = vmul.f32 %v13768_v31, %v13752_v4  ;;  %v10360_v49 = vpop.xlane.xlu1 %10359  ;;  %v13770_v25 = vpop.eup %13769 }
 0xcb4   : > { %13775 = vrcp.f32 %v10360_v49  ;;  %v10468_v37 = vpop.f32.mrb[112].mxu1  ;;  %v10395_v5 = vmul.f32 %v13770_v25, %v16043_v14  ;;  %v16365_v49 = vld [vmem:[#allocation35_spill] sm:$0xff] }
 0xcb5   : > { %v13276_v6 = vpop.f32.mrb[113].mxu1  ;;  %13315 = vmatmul.mubr.msk.f32.vlgmr.msra.gmra.mrb[120].mxu1 %vm475_vm2, %v10388_v18 }
 0xcb6   : > { %v13772_v17 = vpop.eup %13771  ;;  %13323 = vmatpush3.msra.mxu1 %v11157_v59  ;;  %13324 = vmatprep.mubr.msk.f32.mxu1 %vm13941_vm1, %v16335_v35  ;;  %v16364_v59 = vld [vmem:[#allocation34_spill] sm:$0xff] }
 0xcb7   : > { %v10390_v9 = vmul.f32 %v13772_v17, %v13756_v23  ;;  %v11537_v19 = vpop.permute.xlu1 %11536  ;;  %13332 = vmatprep.subr.mxu1 %v16335_v35 }
 0xcb8   : > { %v10544_v47 = vpop.f32.mrb[150].mxu0  ;;  %13348 = vmatpush3.msra.mxu0 %v11537_v19 }
 0xcb9   : > { %v13281_v2 = vpop.f32.mrb[151].mxu0  ;;  %13325 = vmatmul.mubr.msk.f32.vlgmr.msra.gmra.mrb[122].mxu1 %vm475_vm2, %v10390_v9  ;;  %13350 = vmatmul.mubr.msk.f32.vlgmr.msra.gmra.mrb[164].mxu0 %vm475_vm2, %v10395_v5 }
 0xcba   : > { %v13774_v8 = vpop.eup %13773  ;;  %13333 = vmatpush3.msra.mxu1 %v11309_v22  ;;  %13334 = vmatprep.mubr.msk.f32.mxu1 %vm13941_vm1, %v16335_v35 }
 0xcbb   : > { %v10392_v26 = vmul.f32 %v13774_v8, %v13760_v52  ;;  %13342 = vmatprep.subr.mxu1 %v16335_v35 }
 0xcbc   : > { %v10620_v14 = vpop.f32.mrb[114].mxu1 }
 0xcbd   : > { %v13286_v39 = vpop.f32.mrb[115].mxu1  ;;  %13335 = vmatmul.mubr.msk.f32.vlgmr.msra.gmra.mrb[124].mxu1 %vm475_vm2, %v10392_v26 }
 0xcbe   : > { %v13776_v15 = vpop.eup %13775  ;;  %13343 = vmatpush3.msra.mxu1 %v11461_v41  ;;  %13344 = vmatprep.mubr.msk.f32.mxu1 %vm13941_vm1, %v16335_v35 }
 0xcbf   : > { %v10394_v45 = vmul.f32 %v13776_v15, %v13764_v30  ;;  %13352 = vmatprep.subr.mxu1 %v470_v40 }
 0xcc0   : > { %v10696_v11 = vpop.f32.mrb[152].mxu0 }
 0xcc1   : > { %v13291_v63 = vpop.f32.mrb[153].mxu0  ;;  %13345 = vmatmul.mubr.msk.f32.vlgmr.msra.gmra.mrb[126].mxu1 %vm475_vm2, %v10394_v45 }
 0xcc2   : > { %13354 = vmatprep.mubr.msk.f32.mxu1 %vm475_vm2, %v10468_v37  ;;  %13353 = vmatpush3.msra.mxu1 %v470_v40 }
 0xcc4   : > { %v10772_v53 = vpop.f32.mrb[116].mxu1 }
 0xcc5   : > { %v13296_v28 = vpop.f32.mrb[117].mxu1  ;;  %13355 = vmatmul.mubr.msk.f32.vlgmr.msra.gmra.mrb[82].mxu1 %vm475_vm2, %v10544_v47 }
 0xcc6   : > { %13357 = vmatprep.mubr.msk.f32.mxu1 %vm475_vm2, %v10620_v14 }
 0xcc9   : > { %13358 = vmatmul.mubr.msk.f32.gmra.mrb[84].mxu1 %vm475_vm2, %v10696_v11 }
 0xcca   : > { %13360 = vmatprep.mubr.msk.f32.mxu1 %vm475_vm2, %v10772_v53 }
 0xcdb   : > { %v10924_v35 = vpop.f32.mrb[118].mxu1 }
 0xcdc   : > { %v13306_v42 = vpop.f32.mrb[119].mxu1 }
 0xcee   : > { %v10848_v16 = vpop.f32.mrb[154].mxu0 }
 0xcef   : > { %v13301_v51 = vpop.f32.mrb[155].mxu0  ;;  %13361 = vmatmul.mubr.msk.f32.gmra.mrb[86].mxu1 %vm475_vm2, %v10848_v16 }
 0xcf0   : > { %13363 = vmatprep.mubr.msk.f32.mxu1 %vm475_vm2, %v10924_v35 }
 0xcf2   : > { %v11000_v44 = vpop.f32.mrb[156].mxu0 }
 0xcf3   : > { %v13311_v58 = vpop.f32.mrb[157].mxu0  ;;  %13364 = vmatmul.mubr.msk.f32.gmra.mrb[72].mxu1 %vm475_vm2, %v11000_v44 }
 0xcf6   : > { %v11152_v54 = vpop.f32.mrb[158].mxu0 }
 0xcf7   : > { %v13321_v12 = vpop.f32.mrb[159].mxu0 }
 0xcfa   : > { %v11304_v55 = vpop.f32.mrb[160].mxu0 }
 0xcfb   : > { %v13331_v62 = vpop.f32.mrb[161].mxu0 }
 0xcfe   : > { %v11456_v4 = vpop.f32.mrb[162].mxu0 }
 0xcff   : > { %v13341_v20 = vpop.f32.mrb[163].mxu0 }
 0xd88   : > { %v11076_v61 = vpop.f32.mrb[120].mxu1 }
 0xd89   : > { %v13316_v48 = vpop.f32.mrb[121].mxu1  ;;  %13366 = vmatprep.mubr.msk.f32.mxu1 %vm475_vm2, %v11076_v61 }
 0xd8a   : > { %13367 = vmatmul.mubr.msk.f32.gmra.mrb[74].mxu1 %vm475_vm2, %v11152_v54 }
 0xd8c   : > { %v11228_v0 = vpop.f32.mrb[122].mxu1  ;;  %v11608_v24 = vpop.f32.mrb[164].mxu0 }
 0xd8d   : > { %v13326_v23 = vpop.f32.mrb[123].mxu1  ;;  %v13351_v7 = vpop.f32.mrb[165].mxu0  ;;  %13369 = vmatprep.mubr.msk.f32.mxu1 %vm475_vm2, %v11228_v0 }
 0xd8e   : > { %13370 = vmatmul.mubr.msk.f32.gmra.mrb[76].mxu1 %vm475_vm2, %v11304_v55 }
 0xd90   : > { %v11380_v56 = vpop.f32.mrb[124].mxu1 }
 0xd91   : > { %v13336_v43 = vpop.f32.mrb[125].mxu1  ;;  %13372 = vmatprep.mubr.msk.f32.mxu1 %vm475_vm2, %v11380_v56 }
 0xd92   : > { %13373 = vmatmul.mubr.msk.f32.gmra.mrb[78].mxu1 %vm475_vm2, %v11456_v4 }
 0xd94   : > { %v11532_v10 = vpop.f32.mrb[126].mxu1 }
 0xd95   : > { %v13346_v52 = vpop.f32.mrb[127].mxu1  ;;  %13375 = vmatprep.mubr.msk.f32.mxu1 %vm475_vm2, %v11532_v10 }
 0xd96   : > { %13376 = vmatmul.mubr.msk.f32.gmra.mrb[80].mxu1 %vm475_vm2, %v11608_v24 }
 0xd98   : > { %v13356_v13 = vpop.f32.mrb[82].mxu1 }
 0xd99   : > { %v13388_v21 = vadd.f32 %v13356_v13, %v15369_v33  ;;  %v11726_v1 = vpop.f32.mrb[83].mxu1  ;;  %v16363_v33 = vld [vmem:[#allocation13_spill] sm:$0xff] }
 0xd9a   : > { %v13389_v30 = vadd.f32 %v11726_v1, %v15371_v46 }
 0xd9b   : > { %v11828_v32 = vadd.f32 %v13388_v21, %v12250_v50 }
 0xd9c   : > { %v11827_v34 = vadd.f32 %v13389_v30, %v12250_v50  ;;  %v13359_v27 = vpop.f32.mrb[84].mxu1 }
 0xd9d   : > { %11844 = vst.msk [vmem:[%s16192_s24 + $0x8] sm:$0xff] %vm267_vm0, %v11828_v32  ;;  %v13390_v36 = vadd.f32 %v13359_v27, %v16362_v60  ;;  %v11736_v38 = vpop.f32.mrb[85].mxu1 }
 0xd9e   : > { %11843 = vst.msk [vmem:[%s16192_s24] sm:$0xff] %vm267_vm0, %v11827_v34  ;;  %v13391_v46 = vadd.f32 %v11736_v38, %v16363_v33 }
 0xd9f   : > { %v11830_v3 = vadd.f32 %v13390_v36, %v12250_v50 }
 0xda0   : > { %v11829_v29 = vadd.f32 %v13391_v46, %v12250_v50 }
 0xda1   : > { %11846 = vst.msk [vmem:[%s16192_s24 + $0x18] sm:$0xff] %vm267_vm0, %v11830_v3 }
 0xda2   : > { %11845 = vst.msk [vmem:[%s16192_s24 + $0x10] sm:$0xff] %vm267_vm0, %v11829_v29 }
 0xdc2   : > { %v13362_v57 = vpop.f32.mrb[86].mxu1 }
 0xdc3   : > { %v13392_v31 = vadd.f32 %v13362_v57, %v16364_v59  ;;  %v11746_v18 = vpop.f32.mrb[87].mxu1 }
 0xdc4   : > { %v13393_v25 = vadd.f32 %v11746_v18, %v16365_v49 }
 0xdc5   : > { %v11832_v37 = vadd.f32 %v13392_v31, %v12250_v50 }
 0xdc6   : > { %v11831_v6 = vadd.f32 %v13393_v25, %v12250_v50  ;;  %v13365_v17 = vpop.f32.mrb[72].mxu1 }
 0xdc7   : > { %11848 = vst.msk [vmem:[%s16192_s24 + $0x28] sm:$0xff] %vm267_vm0, %v11832_v37  ;;  %v11834_v5 = vadd.f32 %v13365_v17, %v12250_v50  ;;  %v11756_v22 = vpop.f32.mrb[73].mxu1 }
 0xdc8   : > { %11847 = vst.msk [vmem:[%s16192_s24 + $0x20] sm:$0xff] %vm267_vm0, %v11831_v6  ;;  %v11833_v9 = vadd.f32 %v12250_v50, %v11756_v22 }
 0xdc9   : > { %11850 = vst.msk [vmem:[%s16192_s24 + $0x38] sm:$0xff] %vm267_vm0, %v11834_v5 }
 0xdca   : > { %11849 = vst.msk [vmem:[%s16192_s24 + $0x30] sm:$0xff] %vm267_vm0, %v11833_v9 }
 0xe5d   : > { %v13368_v19 = vpop.f32.mrb[74].mxu1 }
 0xe5e   : > { %v11836_v47 = vadd.f32 %v13368_v19, %v12250_v50  ;;  %v11766_v2 = vpop.f32.mrb[75].mxu1 }
 0xe5f   : > { %v11835_v8 = vadd.f32 %v12250_v50, %v11766_v2 }
 0xe60   : > { %11852 = vst.msk [vmem:[%s16192_s24 + $0x48] sm:$0xff] %vm267_vm0, %v11836_v47 }
 0xe61   : > { %11851 = vst.msk [vmem:[%s16192_s24 + $0x40] sm:$0xff] %vm267_vm0, %v11835_v8  ;;  %v13371_v26 = vpop.f32.mrb[76].mxu1 }
 0xe62   : > { %v11838_v14 = vadd.f32 %v13371_v26, %v12250_v50  ;;  %v11776_v40 = vpop.f32.mrb[77].mxu1 }
 0xe63   : > { %v11837_v41 = vadd.f32 %v12250_v50, %v11776_v40 }
 0xe64   : > { %11854 = vst.msk [vmem:[%s16192_s24 + $0x58] sm:$0xff] %vm267_vm0, %v11838_v14 }
 0xe65   : > { %11853 = vst.msk [vmem:[%s16192_s24 + $0x50] sm:$0xff] %vm267_vm0, %v11837_v41  ;;  %v13374_v39 = vpop.f32.mrb[78].mxu1 }
 0xe66   : > { %v11840_v15 = vadd.f32 %v13374_v39, %v12250_v50  ;;  %v11786_v45 = vpop.f32.mrb[79].mxu1 }
 0xe67   : > { %v11839_v11 = vadd.f32 %v12250_v50, %v11786_v45 }
 0xe68   : > { %11856 = vst.msk [vmem:[%s16192_s24 + $0x68] sm:$0xff] %vm267_vm0, %v11840_v15 }
 0xe69   : > { %11855 = vst.msk [vmem:[%s16192_s24 + $0x60] sm:$0xff] %vm267_vm0, %v11839_v11  ;;  %v13377_v63 = vpop.f32.mrb[80].mxu1 }
 0xe6a   : > { %v11842_v53 = vadd.f32 %v13377_v63, %v12250_v50  ;;  %v11796_v28 = vpop.f32.mrb[81].mxu1 }
 0xe6b   : > { %v11841_v35 = vadd.f32 %v12250_v50, %v11796_v28 }
 0xe6c   : > { %11858 = vst.msk [vmem:[%s16192_s24 + $0x78] sm:$0xff] %vm267_vm0, %v11842_v53 }
 0xe6d   : > { %11857 = vst.msk [vmem:[%s16192_s24 + $0x70] sm:$0xff] %vm267_vm0, %v11841_v35 }
 0xe6e   : > { %13876 = shalt.err (!%p13873_p1)
}
 0xe6f   : > { %s13877_s28 = scalar_lea.hbm %s16231_s11, 2048  ;;  %s13881_s29 = scalar_lea.hbm %s16285_s4, 4096 }
 0xe70   : > { %p13878_p13 = scmp.ne.s32.totalorder %s16231_s11, %s13877_s28  ;;  %p13882_p4 = scmp.lt.u32.totalorder %s16231_s11, %s16285_s4 }
 0xe71   : > { %p13883_p5 = scmp.lt.u32.totalorder %s13881_s29, %s13877_s28  ;;  %p13885_p11 = scmp.lt.u32.totalorder %s13877_s28, %s16231_s11 }
 0xe72   : > { %p13879_p6 = pnand %p13878_p13, %p16366_p0 }
 0xe73   : > { %p13884_p8 = por %p13883_p5, %p13882_p4 }
 0xe74   : > { %p13880_p10 = pneg %p13879_p6 }
 0xe75   : > { %p13886_p2 = por %p13885_p11, %p13884_p8 }
 0xe77   : > { %p13887_p3 = pnand %p13886_p2, %p13880_p10 }
 0xe79   : > { %13890 = shalt.err (!%p13887_p3)
}
 0xe7a   : > { %s13955_s24 = smov 128   ;;  %s13956_s10 = smov 8  }
 0xe7b   : > { %13446 = dma.vmem_to_hbm [thread:$0]  (%p16366_p0), %s16233_s25, 2048, %s16231_s11, %s11860_s19, %s13955_s24, %s13955_s24, %s13956_s10  }
 0xe7c PF: > { %s11888_s21 = sand.u32 1, %s13921_s15   ;;  %p16367_p7 = scmp.ne.s32.totalorder %s16304_s22, 0 }
 0xe7d   : > { %p16368_p9 = scmp.ge.s32.totalorder %s13933_s18, 2  ;;  %s11889_s23 = scalar_lea.sflag [#allocation4], %s11888_s21 }
 0xe7f   : > { %p13460_p12 = pnand %p16368_p9, %p16367_p7 }
 0xe81   : > { %13916 = dma.done.wait (!%p13460_p12), %s11889_s23, 2048  }
 0xe82   : > { %13918 = vsyncadd (!%p13460_p12), %s11889_s23, 4294965248  ;;  %p18_p1 = scmp.ge.s32.totalorder %s14098_s26, 4   ;;  %s16369_s15 = smov %s13925_s16 }
 0xe83   : > { %s16370_s16 = smov %s13929_s17  ;;  %s16371_s17 = smov %s14114_s14 }
 0xe84   : > { %s16372_s18 = smov %s14098_s26  ;;  %20 = sbr.rel (!%p18_p1) target bundleno = 6 (0x6), region = 89 }
 0xe8b   :  { %11894 = vsyncpa [#allocation3], 1 }
 0xe8c   :  { %11896 = vsyncpa [#allocation3 + $0x1], 1 }
 0xe8d   :  { %11897 = vsyncpa [#allocation6], 1 }
 0xe8e   :  { %11898 = vsyncpa [#allocation4], 1 }
 0xe8f   :  { %11900 = vsyncpa [#allocation4 + $0x1], 1 }

</bundles_post_ra>
